<compile_context>
chip_gen: v6e
topology: v6e:2x2x1
jax: 0.10.0
libtpu: 0.0.40
codegen_flags: <defaults>
</compile_context>

<pallas_src>
import jax
import jax.numpy as jnp
from jax import lax
from jax.experimental import pallas as pl
from jax.experimental.pallas import tpu as pltpu

# ---- problem sizes (small, consistent with the module's __init__) ----
B = 2          # batch
N = 16         # node_num
DIN = 4        # dim_in
H = 32         # dim_out / hidden_dim
K = 3          # cheb_k
DE = 8         # embed_dim
C = DIN + H    # AVWGCN input channels (dim_in + hidden)
BN = B * N     # row-stacked batch*nodes
T = 8          # fused recurrent steps (sequence length)


def agcrn_seq_kernel(x_ref, s0_ref, e_ref, p_ref, mask_ref,
                     selg_ref, selu_ref, foldz_ref, foldr_ref, foldu_ref,
                     wgx_ref, wgs_ref, bgz_ref, bgr_ref,
                     wux_ref, wus_ref, bup_ref,
                     o_ref,
                     st, a2_s, eg_s, eu_s, bz_s, br_s, bu_s):
    f32 = jnp.float32
    t = pl.program_id(0)

    # ---- one-time setup: initial state + all node-embedding-derived data ----
    @pl.when(t == 0)
    def _init():
        st[...] = s0_ref[...]
        E = e_ref[...]                                        # (N, DE)
        P = p_ref[...]                                        # (BN, N) 0/1 batch replicator
        # adaptive adjacency A = softmax(relu(E @ E^T), axis=1)
        a = lax.dot_general(E, E, (((1,), (1,)), ((), ())),
                            preferred_element_type=f32)       # (N, N)
        a = jnp.maximum(a, 0.0)
        a = jnp.exp(a - jnp.max(a, axis=1, keepdims=True))
        a = a / jnp.sum(a, axis=1, keepdims=True)             # exact; runs once, off hot path
        # lift to block-diagonal (BN, BN): replicate via matmul, mask via one VPU mul
        pa = jnp.dot(P, a, preferred_element_type=f32)        # (BN, N)
        a_rep = lax.dot_general(pa, P, (((1,), (1,)), ((), ())),
                                preferred_element_type=f32)   # (BN, BN)
        a2_s[...] = a_rep * mask_ref[...]
        # per-row embedding constants (time-invariant)
        e_rows = jnp.dot(P, E, preferred_element_type=f32)    # (BN, DE)
        eg_s[...] = jnp.dot(e_rows, selg_ref[...], preferred_element_type=f32)
        eu_s[...] = jnp.dot(e_rows, selu_ref[...], preferred_element_type=f32)
        bz_s[...] = jnp.dot(e_rows, bgz_ref[...], preferred_element_type=f32)
        br_s[...] = jnp.dot(e_rows, bgr_ref[...], preferred_element_type=f32)
        bu_s[...] = jnp.dot(e_rows, bup_ref[...], preferred_element_type=f32)

    # ---- one recurrent AGCRNCell step ----
    x = x_ref[0]                                              # (BN, DIN)
    s = st[...]                                               # (BN, H)
    a2 = a2_s[...]                                            # (BN, BN)

    # Chebyshev supports on the x part (shared by gate & update):
    # T0 @ x == x (identity implicit), T2 @ x = 2*A@(A@x) - x
    xk1 = jnp.dot(a2, x, preferred_element_type=f32)
    xk2 = 2.0 * jnp.dot(a2, xk1, preferred_element_type=f32) - x

    def gconv_slab(s0, wx_ref, ws_ref, e_exp):
        """AVWGCN product slab: inputs split into the shared x part and the
        state part s0; weights pre-laid-out as (K, part, DE*O)."""
        s1 = jnp.dot(a2, s0, preferred_element_type=f32)
        s2 = 2.0 * jnp.dot(a2, s1, preferred_element_type=f32) - s0
        p = jnp.dot(x, wx_ref[0], preferred_element_type=f32)
        p = p + jnp.dot(s0, ws_ref[0], preferred_element_type=f32)
        p = p + jnp.dot(xk1, wx_ref[1], preferred_element_type=f32)
        p = p + jnp.dot(s1, ws_ref[1], preferred_element_type=f32)
        p = p + jnp.dot(xk2, wx_ref[2], preferred_element_type=f32)
        p = p + jnp.dot(s2, ws_ref[2], preferred_element_type=f32)
        return p * e_exp                                      # (BN, DE*O) slab

    # gate: embed-dim reduction + z/r split via constant fold matrices (MXU,
    # no unaligned lane slices)
    pg = gconv_slab(s, wgx_ref, wgs_ref, eg_s[...])           # (BN, DE*2H)
    z = jax.nn.sigmoid(jnp.dot(pg, foldz_ref[...], preferred_element_type=f32) + bz_s[...])
    r = jax.nn.sigmoid(jnp.dot(pg, foldr_ref[...], preferred_element_type=f32) + br_s[...])
    # update / candidate
    pu = gconv_slab(z * s, wux_ref, wus_ref, eu_s[...])       # (BN, DE*H)
    hc = jnp.tanh(jnp.dot(pu, foldu_ref[...], preferred_element_type=f32) + bu_s[...])

    h = r * s + (1.0 - r) * hc
    st[...] = h
    o_ref[0] = h


# ------------------- one-time parameter / constant layout -------------------
def _split_pool(wpool, o_width):
    """(DE, K, C, O) -> x part (K, DIN, DE*O) and state part (K, H, DE*O),
    with [k, i, d*O + o] = wpool[d, k, i (+DIN), o].  Pure layout glue."""
    wx = jnp.transpose(wpool[:, :, :DIN, :], (1, 2, 0, 3)).reshape(K, DIN, DE * o_width)
    ws = jnp.transpose(wpool[:, :, DIN:, :], (1, 2, 0, 3)).reshape(K, H, DE * o_width)
    return wx, ws


def _sel_matrix(o_width):
    """S[d, d*o_width + o] = 1: expands per-row embeddings onto the slab lanes."""
    d_of_col = jnp.arange(DE * o_width) // o_width
    return (jnp.arange(DE)[:, None] == d_of_col[None, :]).astype(jnp.float32)


def _fold_matrix(o_width, out_dim, offset):
    """F[d*o_width + o, o2] = 1 iff o == offset + o2: embed-dim sum (+ output split)."""
    o_of_col = jnp.arange(DE * o_width) % o_width
    return (o_of_col[:, None] == (offset + jnp.arange(out_dim))[None, :]).astype(jnp.float32)


def prepare_params(wg_pool, bg_pool, wu_pool, bu_pool):
    """One-time weight re-layout + constant selector/fold/replication matrices.
    Called once at parameter setup, NOT per step."""
    wgx, wgs = _split_pool(wg_pool, 2 * H)
    wux, wus = _split_pool(wu_pool, H)
    rows = jnp.arange(BN)
    P = (rows[:, None] % N == jnp.arange(N)[None, :]).astype(jnp.float32)        # (BN, N)
    mask = ((rows[:, None] // N) == (rows[None, :] // N)).astype(jnp.float32)    # (BN, BN)
    return dict(
        P=P, mask=mask,
        selg=_sel_matrix(2 * H), selu=_sel_matrix(H),
        foldz=_fold_matrix(2 * H, H, 0), foldr=_fold_matrix(2 * H, H, H),
        foldu=_fold_matrix(H, H, 0),
        wgx=wgx, wgs=wgs, bgz=bg_pool[:, :H], bgr=bg_pool[:, H:],
        wux=wux, wus=wus, bup=bu_pool,
    )


# ------------------------------- wrappers -----------------------------------
def agcrn_cell_sequence(x_seq, state0, node_embeddings, p):
    """Run the AGCRNCell recurrently over x_seq (T, B, N, DIN) in ONE kernel."""
    t_steps = x_seq.shape[0]
    xs = x_seq.reshape(t_steps, BN, DIN).astype(jnp.float32)
    s0 = state0.reshape(BN, H).astype(jnp.float32)

    def resident(shape):
        n = len(shape)
        return pl.BlockSpec(shape, lambda t, n=n: (0,) * n)   # same block every step

    operands = (xs, s0, node_embeddings.astype(jnp.float32), p["P"], p["mask"],
                p["selg"], p["selu"], p["foldz"], p["foldr"], p["foldu"],
                p["wgx"], p["wgs"], p["bgz"], p["bgr"],
                p["wux"], p["wus"], p["bup"])
    in_specs = [pl.BlockSpec((1, BN, DIN), lambda t: (t, 0, 0))]
    in_specs += [resident(op.shape) for op in operands[1:]]

    out = pl.pallas_call(
        agcrn_seq_kernel,
        out_shape=jax.ShapeDtypeStruct((t_steps, BN, H), jnp.float32),
        grid_spec=pltpu.PrefetchScalarGridSpec(
            num_scalar_prefetch=0,
            grid=(t_steps,),
            in_specs=in_specs,
            out_specs=pl.BlockSpec((1, BN, H), lambda t: (t, 0, 0)),
            scratch_shapes=[
                pltpu.VMEM((BN, H), jnp.float32),            # carried hidden state
                pltpu.VMEM((BN, BN), jnp.float32),           # block-diag adjacency
                pltpu.VMEM((BN, DE * 2 * H), jnp.float32),   # gate embed expansion
                pltpu.VMEM((BN, DE * H), jnp.float32),       # update embed expansion
                pltpu.VMEM((BN, H), jnp.float32),            # bias z
                pltpu.VMEM((BN, H), jnp.float32),            # bias r
                pltpu.VMEM((BN, H), jnp.float32),            # bias update
            ]),
        compiler_params=pltpu.CompilerParams(
            dimension_semantics=("arbitrary",),               # recurrence => sequential
            vmem_limit_bytes=16 * 1024 * 1024,                # explicit budget (v5e-safe)
        ),
    )(*operands)
    return out.reshape(t_steps, B, N, H)


def agcrn_cell(x, state, node_embeddings, p):
    """Single AGCRNCell.forward (module semantics) == T=1 case of the fused kernel."""
    return agcrn_cell_sequence(x[None], state, node_embeddings, p)[0]


# ---------------- pure-JAX reference for validation ----------------
def _avwgcn_ref(xc, E, wpool, bpool):
    A = jax.nn.softmax(jax.nn.relu(E @ E.T), axis=1)
    sup = [jnp.eye(E.shape[0], dtype=jnp.float32), A]
    for _k in range(2, K):
        sup.append(2.0 * A @ sup[-1] - sup[-2])
    supports = jnp.stack(sup, 0)                              # (K, N, N)
    weights = jnp.einsum('nd,dkio->nkio', E, wpool)           # (N, K, C, O)
    bias = E @ bpool                                          # (N, O)
    x_g = jnp.einsum('knm,bmc->bknc', supports, xc)
    x_g = jnp.transpose(x_g, (0, 2, 1, 3))                    # (B, N, K, C)
    return jnp.einsum('bnki,nkio->bno', x_g, weights) + bias


def _agcrn_cell_ref(x, state, E, wg, bg, wu, bu):
    inp = jnp.concatenate([x, state], axis=-1)
    z_r = jax.nn.sigmoid(_avwgcn_ref(inp, E, wg, bg))
    z, r = z_r[..., :H], z_r[..., H:]
    cand = jnp.concatenate([x, z * state], axis=-1)
    hc = jnp.tanh(_avwgcn_ref(cand, E, wu, bu))
    return r * state + (1.0 - r) * hc


if __name__ == "__main__":
    key = jax.random.PRNGKey(0)
    ks = jax.random.split(key, 7)
    x_seq = jax.random.normal(ks[0], (T, B, N, DIN), jnp.float32)
    state0 = jax.random.normal(ks[1], (B, N, H), jnp.float32)
    node_emb = jax.random.normal(ks[2], (N, DE), jnp.float32) * 0.5
    # deterministic synthetic parameters (shapes from AVWGCN.__init__)
    wg_pool = jax.random.normal(ks[3], (DE, K, C, 2 * H), jnp.float32) * 0.1
    bg_pool = jax.random.normal(ks[4], (DE, 2 * H), jnp.float32) * 0.1
    wu_pool = jax.random.normal(ks[5], (DE, K, C, H), jnp.float32) * 0.1
    bu_pool = jax.random.normal(ks[6], (DE, H), jnp.float32) * 0.1

    params = prepare_params(wg_pool, bg_pool, wu_pool, bu_pool)

    # fused T-step recurrent run (one kernel launch)
    h_seq = agcrn_cell_sequence(x_seq, state0, node_emb, params)
    h_seq = jax.block_until_ready(h_seq)

    # reference: recurrent application of the single-step reference cell
    s = state0
    h_refs = []
    for t in range(T):
        s = _agcrn_cell_ref(x_seq[t], s, node_emb, wg_pool, bg_pool, wu_pool, bu_pool)
        h_refs.append(s)
    h_ref = jnp.stack(h_refs, 0)

    assert h_seq.shape == (T, B, N, H)
    err = float(jnp.max(jnp.abs(h_seq - h_ref)))
    assert jnp.allclose(h_seq, h_ref, rtol=1e-3, atol=1e-3), err

    # single-step forward (module-equivalent signature) also validated
    h1 = jax.block_until_ready(agcrn_cell(x_seq[0], state0, node_emb, params))
    assert jnp.allclose(h1, h_ref[0], rtol=1e-3, atol=1e-3)

    print("KERNEL_OK")
</pallas_src>

<mosaic_0001>
module attributes {stable_mosaic.version = 11 : i64} {
  func.func @agcrn_seq_kernel(%arg0: i32, %arg1: memref<1x32x4xf32, #tpu.memory_space<vmem>>, %arg2: memref<32x32xf32, #tpu.memory_space<vmem>>, %arg3: memref<16x8xf32, #tpu.memory_space<vmem>>, %arg4: memref<32x16xf32, #tpu.memory_space<vmem>>, %arg5: memref<32x32xf32, #tpu.memory_space<vmem>>, %arg6: memref<8x512xf32, #tpu.memory_space<vmem>>, %arg7: memref<8x256xf32, #tpu.memory_space<vmem>>, %arg8: memref<512x32xf32, #tpu.memory_space<vmem>>, %arg9: memref<512x32xf32, #tpu.memory_space<vmem>>, %arg10: memref<256x32xf32, #tpu.memory_space<vmem>>, %arg11: memref<3x4x512xf32, #tpu.memory_space<vmem>>, %arg12: memref<3x32x512xf32, #tpu.memory_space<vmem>>, %arg13: memref<8x32xf32, #tpu.memory_space<vmem>>, %arg14: memref<8x32xf32, #tpu.memory_space<vmem>>, %arg15: memref<3x4x256xf32, #tpu.memory_space<vmem>>, %arg16: memref<3x32x256xf32, #tpu.memory_space<vmem>>, %arg17: memref<8x32xf32, #tpu.memory_space<vmem>>, %arg18: memref<1x32x32xf32, #tpu.memory_space<vmem>>, %arg19: memref<32x32xf32, #tpu.memory_space<vmem>>, %arg20: memref<32x32xf32, #tpu.memory_space<vmem>>, %arg21: memref<32x512xf32, #tpu.memory_space<vmem>>, %arg22: memref<32x256xf32, #tpu.memory_space<vmem>>, %arg23: memref<32x32xf32, #tpu.memory_space<vmem>>, %arg24: memref<32x32xf32, #tpu.memory_space<vmem>>, %arg25: memref<32x32xf32, #tpu.memory_space<vmem>>) attributes {dimension_semantics = [#tpu.dimension_semantics<arbitrary>], iteration_bounds = array<i64: 8>, scalar_prefetch = 0 : i64, scratch_operands = 7 : i64, tpu.core_type = #tpu.core_type<tc>, window_params = [{transform_indices = @transform_0, window_bounds = array<i64: 1, 32, 4>}, {pipeline_mode = #tpu.pipeline_mode<synchronous>, transform_indices = @transform_1, window_bounds = array<i64: 32, 32>}, {pipeline_mode = #tpu.pipeline_mode<synchronous>, transform_indices = @transform_2, window_bounds = array<i64: 16, 8>}, {pipeline_mode = #tpu.pipeline_mode<synchronous>, transform_indices = @transform_3, window_bounds = array<i64: 32, 16>}, {pipeline_mode = #tpu.pipeline_mode<synchronous>, transform_indices = @transform_4, window_bounds = array<i64: 32, 32>}, {pipeline_mode = #tpu.pipeline_mode<synchronous>, transform_indices = @transform_5, window_bounds = array<i64: 8, 512>}, {pipeline_mode = #tpu.pipeline_mode<synchronous>, transform_indices = @transform_6, window_bounds = array<i64: 8, 256>}, {pipeline_mode = #tpu.pipeline_mode<synchronous>, transform_indices = @transform_7, window_bounds = array<i64: 512, 32>}, {pipeline_mode = #tpu.pipeline_mode<synchronous>, transform_indices = @transform_8, window_bounds = array<i64: 512, 32>}, {pipeline_mode = #tpu.pipeline_mode<synchronous>, transform_indices = @transform_9, window_bounds = array<i64: 256, 32>}, {pipeline_mode = #tpu.pipeline_mode<synchronous>, transform_indices = @transform_10, window_bounds = array<i64: 3, 4, 512>}, {pipeline_mode = #tpu.pipeline_mode<synchronous>, transform_indices = @transform_11, window_bounds = array<i64: 3, 32, 512>}, {pipeline_mode = #tpu.pipeline_mode<synchronous>, transform_indices = @transform_12, window_bounds = array<i64: 8, 32>}, {pipeline_mode = #tpu.pipeline_mode<synchronous>, transform_indices = @transform_13, window_bounds = array<i64: 8, 32>}, {pipeline_mode = #tpu.pipeline_mode<synchronous>, transform_indices = @transform_14, window_bounds = array<i64: 3, 4, 256>}, {pipeline_mode = #tpu.pipeline_mode<synchronous>, transform_indices = @transform_15, window_bounds = array<i64: 3, 32, 256>}, {pipeline_mode = #tpu.pipeline_mode<synchronous>, transform_indices = @transform_16, window_bounds = array<i64: 8, 32>}, {transform_indices = @transform_17, window_bounds = array<i64: 1, 32, 32>}]} {
    %c0_i32 = arith.constant 0 : i32
    %0 = arith.cmpi eq, %arg0, %c0_i32 : i32
    %1 = arith.extui %0 : i1 to i32
    %c0_i32_0 = arith.constant 0 : i32
    %2 = arith.cmpi ne, %1, %c0_i32_0 : i32
    scf.if %2 {
      %c0_88 = arith.constant 0 : index
      %c0_89 = arith.constant 0 : index
      %105 = vector.load %arg2[%c0_88, %c0_89] : memref<32x32xf32, #tpu.memory_space<vmem>>, vector<32x32xf32>
      %c0_90 = arith.constant 0 : index
      %c0_91 = arith.constant 0 : index
      %106 = vector.load %arg19[%c0_90, %c0_91] : memref<32x32xf32, #tpu.memory_space<vmem>>, vector<32x32xf32>
      tpu.vector_store %arg19[%c0_90, %c0_91], %105 {strides = array<i32>} : memref<32x32xf32, #tpu.memory_space<vmem>>, vector<32x32xf32>,
      %c0_92 = arith.constant 0 : index
      %c0_93 = arith.constant 0 : index
      %107 = vector.load %arg3[%c0_92, %c0_93] : memref<16x8xf32, #tpu.memory_space<vmem>>, vector<16x8xf32>
      %c0_94 = arith.constant 0 : index
      %c0_95 = arith.constant 0 : index
      %108 = vector.load %arg4[%c0_94, %c0_95] : memref<32x16xf32, #tpu.memory_space<vmem>>, vector<32x16xf32>
      %cst_96 = arith.constant dense<0.000000e+00> : vector<16x16xf32>
      %109 = tpu.matmul %107, %107, %cst_96 {dimension_numbers = #tpu.dot_dimension_numbers<[1], [1], [0], [0], [0, 0, 1, 0], [], []>} : vector<16x8xf32>, vector<16x8xf32>, vector<16x16xf32> -> vector<16x16xf32>
      %cst_97 = arith.constant 0.000000e+00 : f32
      %110 = vector.broadcast %cst_97 : f32 to vector<16x16xf32>
      %111 = arith.maximumf %109, %110 : vector<16x16xf32>
      %cst_98 = arith.constant dense<0xFF800000> : vector<16xf32>
      %112 = vector.multi_reduction <maximumf>, %111, %cst_98 [1] : vector<16x16xf32> to vector<16xf32>
      %113 = vector.shape_cast %112 : vector<16xf32> to vector<16x1xf32>
      %114 = vector.broadcast %113 : vector<16x1xf32> to vector<16x16xf32>
      %115 = arith.subf %111, %114 : vector<16x16xf32>
      %116 = math.exp %115 : vector<16x16xf32>
      %cst_99 = arith.constant dense<0.000000e+00> : vector<16xf32>
      %117 = vector.multi_reduction <add>, %116, %cst_99 [1] : vector<16x16xf32> to vector<16xf32>
      %118 = vector.shape_cast %117 : vector<16xf32> to vector<16x1xf32>
      %119 = vector.broadcast %118 : vector<16x1xf32> to vector<16x16xf32>
      %120 = arith.divf %116, %119 : vector<16x16xf32>
      %cst_100 = arith.constant dense<0.000000e+00> : vector<32x16xf32>
      %121 = tpu.matmul %108, %120, %cst_100 {dimension_numbers = #tpu.dot_dimension_numbers<[1], [0], [0], [1], [0, 0, 1, 1], [], []>} : vector<32x16xf32>, vector<16x16xf32>, vector<32x16xf32> -> vector<32x16xf32>
      %cst_101 = arith.constant dense<0.000000e+00> : vector<32x32xf32>
      %122 = tpu.matmul %121, %108, %cst_101 {dimension_numbers = #tpu.dot_dimension_numbers<[1], [1], [0], [0], [0, 0, 1, 0], [], []>} : vector<32x16xf32>, vector<32x16xf32>, vector<32x32xf32> -> vector<32x32xf32>
      %c0_102 = arith.constant 0 : index
      %c0_103 = arith.constant 0 : index
      %123 = vector.load %arg5[%c0_102, %c0_103] : memref<32x32xf32, #tpu.memory_space<vmem>>, vector<32x32xf32>
      %124 = arith.mulf %122, %123 : vector<32x32xf32>
      %c0_104 = arith.constant 0 : index
      %c0_105 = arith.constant 0 : index
      %125 = vector.load %arg20[%c0_104, %c0_105] : memref<32x32xf32, #tpu.memory_space<vmem>>, vector<32x32xf32>
      tpu.vector_store %arg20[%c0_104, %c0_105], %124 {strides = array<i32>} : memref<32x32xf32, #tpu.memory_space<vmem>>, vector<32x32xf32>,
      %cst_106 = arith.constant dense<0.000000e+00> : vector<32x8xf32>
      %126 = tpu.matmul %108, %107, %cst_106 {dimension_numbers = #tpu.dot_dimension_numbers<[1], [0], [0], [1], [0, 0, 1, 1], [], []>} : vector<32x16xf32>, vector<16x8xf32>, vector<32x8xf32> -> vector<32x8xf32>
      %c0_107 = arith.constant 0 : index
      %c0_108 = arith.constant 0 : index
      %127 = vector.load %arg6[%c0_107, %c0_108] : memref<8x512xf32, #tpu.memory_space<vmem>>, vector<8x512xf32>
      %cst_109 = arith.constant dense<0.000000e+00> : vector<32x512xf32>
      %128 = tpu.matmul %126, %127, %cst_109 {dimension_numbers = #tpu.dot_dimension_numbers<[1], [0], [0], [1], [0, 0, 1, 1], [], []>} : vector<32x8xf32>, vector<8x512xf32>, vector<32x512xf32> -> vector<32x512xf32>
      %c0_110 = arith.constant 0 : index
      %c0_111 = arith.constant 0 : index
      %129 = vector.load %arg21[%c0_110, %c0_111] : memref<32x512xf32, #tpu.memory_space<vmem>>, vector<32x512xf32>
      tpu.vector_store %arg21[%c0_110, %c0_111], %128 {strides = array<i32>} : memref<32x512xf32, #tpu.memory_space<vmem>>, vector<32x512xf32>,
      %c0_112 = arith.constant 0 : index
      %c0_113 = arith.constant 0 : index
      %130 = vector.load %arg7[%c0_112, %c0_113] : memref<8x256xf32, #tpu.memory_space<vmem>>, vector<8x256xf32>
      %cst_114 = arith.constant dense<0.000000e+00> : vector<32x256xf32>
      %131 = tpu.matmul %126, %130, %cst_114 {dimension_numbers = #tpu.dot_dimension_numbers<[1], [0], [0], [1], [0, 0, 1, 1], [], []>} : vector<32x8xf32>, vector<8x256xf32>, vector<32x256xf32> -> vector<32x256xf32>
      %c0_115 = arith.constant 0 : index
      %c0_116 = arith.constant 0 : index
      %132 = vector.load %arg22[%c0_115, %c0_116] : memref<32x256xf32, #tpu.memory_space<vmem>>, vector<32x256xf32>
      tpu.vector_store %arg22[%c0_115, %c0_116], %131 {strides = array<i32>} : memref<32x256xf32, #tpu.memory_space<vmem>>, vector<32x256xf32>,
      %c0_117 = arith.constant 0 : index
      %c0_118 = arith.constant 0 : index
      %133 = vector.load %arg13[%c0_117, %c0_118] : memref<8x32xf32, #tpu.memory_space<vmem>>, vector<8x32xf32>
      %cst_119 = arith.constant dense<0.000000e+00> : vector<32x32xf32>
      %134 = tpu.matmul %126, %133, %cst_119 {dimension_numbers = #tpu.dot_dimension_numbers<[1], [0], [0], [1], [0, 0, 1, 1], [], []>} : vector<32x8xf32>, vector<8x32xf32>, vector<32x32xf32> -> vector<32x32xf32>
      %c0_120 = arith.constant 0 : index
      %c0_121 = arith.constant 0 : index
      %135 = vector.load %arg23[%c0_120, %c0_121] : memref<32x32xf32, #tpu.memory_space<vmem>>, vector<32x32xf32>
      tpu.vector_store %arg23[%c0_120, %c0_121], %134 {strides = array<i32>} : memref<32x32xf32, #tpu.memory_space<vmem>>, vector<32x32xf32>,
      %c0_122 = arith.constant 0 : index
      %c0_123 = arith.constant 0 : index
      %136 = vector.load %arg14[%c0_122, %c0_123] : memref<8x32xf32, #tpu.memory_space<vmem>>, vector<8x32xf32>
      %cst_124 = arith.constant dense<0.000000e+00> : vector<32x32xf32>
      %137 = tpu.matmul %126, %136, %cst_124 {dimension_numbers = #tpu.dot_dimension_numbers<[1], [0], [0], [1], [0, 0, 1, 1], [], []>} : vector<32x8xf32>, vector<8x32xf32>, vector<32x32xf32> -> vector<32x32xf32>
      %c0_125 = arith.constant 0 : index
      %c0_126 = arith.constant 0 : index
      %138 = vector.load %arg24[%c0_125, %c0_126] : memref<32x32xf32, #tpu.memory_space<vmem>>, vector<32x32xf32>
      tpu.vector_store %arg24[%c0_125, %c0_126], %137 {strides = array<i32>} : memref<32x32xf32, #tpu.memory_space<vmem>>, vector<32x32xf32>,
      %c0_127 = arith.constant 0 : index
      %c0_128 = arith.constant 0 : index
      %139 = vector.load %arg17[%c0_127, %c0_128] : memref<8x32xf32, #tpu.memory_space<vmem>>, vector<8x32xf32>
      %cst_129 = arith.constant dense<0.000000e+00> : vector<32x32xf32>
      %140 = tpu.matmul %126, %139, %cst_129 {dimension_numbers = #tpu.dot_dimension_numbers<[1], [0], [0], [1], [0, 0, 1, 1], [], []>} : vector<32x8xf32>, vector<8x32xf32>, vector<32x32xf32> -> vector<32x32xf32>
      %c0_130 = arith.constant 0 : index
      %c0_131 = arith.constant 0 : index
      %141 = vector.load %arg25[%c0_130, %c0_131] : memref<32x32xf32, #tpu.memory_space<vmem>>, vector<32x32xf32>
      tpu.vector_store %arg25[%c0_130, %c0_131], %140 {strides = array<i32>} : memref<32x32xf32, #tpu.memory_space<vmem>>, vector<32x32xf32>,
    } else {
    }
    %c0 = arith.constant 0 : index
    %c0_1 = arith.constant 0 : index
    %c0_2 = arith.constant 0 : index
    %3 = vector.load %arg1[%c0, %c0_1, %c0_2] : memref<1x32x4xf32, #tpu.memory_space<vmem>>, vector<1x32x4xf32>
    %4 = vector.shape_cast %3 : vector<1x32x4xf32> to vector<32x4xf32>
    %c0_3 = arith.constant 0 : index
    %c0_4 = arith.constant 0 : index
    %5 = vector.load %arg19[%c0_3, %c0_4] : memref<32x32xf32, #tpu.memory_space<vmem>>, vector<32x32xf32>
    %c0_5 = arith.constant 0 : index
    %c0_6 = arith.constant 0 : index
    %6 = vector.load %arg20[%c0_5, %c0_6] : memref<32x32xf32, #tpu.memory_space<vmem>>, vector<32x32xf32>
    %cst = arith.constant dense<0.000000e+00> : vector<32x4xf32>
    %7 = tpu.matmul %6, %4, %cst {dimension_numbers = #tpu.dot_dimension_numbers<[1], [0], [0], [1], [0, 0, 1, 1], [], []>} : vector<32x32xf32>, vector<32x4xf32>, vector<32x4xf32> -> vector<32x4xf32>
    %cst_7 = arith.constant dense<0.000000e+00> : vector<32x4xf32>
    %8 = tpu.matmul %6, %7, %cst_7 {dimension_numbers = #tpu.dot_dimension_numbers<[1], [0], [0], [1], [0, 0, 1, 1], [], []>} : vector<32x32xf32>, vector<32x4xf32>, vector<32x4xf32> -> vector<32x4xf32>
    %cst_8 = arith.constant 2.000000e+00 : f32
    %9 = vector.broadcast %cst_8 : f32 to vector<32x4xf32>
    %10 = arith.mulf %9, %8 : vector<32x4xf32>
    %11 = arith.subf %10, %4 : vector<32x4xf32>
    %c0_9 = arith.constant 0 : index
    %c0_10 = arith.constant 0 : index
    %12 = vector.load %arg21[%c0_9, %c0_10] : memref<32x512xf32, #tpu.memory_space<vmem>>, vector<32x512xf32>
    %cst_11 = arith.constant dense<0.000000e+00> : vector<32x32xf32>
    %13 = tpu.matmul %6, %5, %cst_11 {dimension_numbers = #tpu.dot_dimension_numbers<[1], [0], [0], [1], [0, 0, 1, 1], [], []>} : vector<32x32xf32>, vector<32x32xf32>, vector<32x32xf32> -> vector<32x32xf32>
    %cst_12 = arith.constant dense<0.000000e+00> : vector<32x32xf32>
    %14 = tpu.matmul %6, %13, %cst_12 {dimension_numbers = #tpu.dot_dimension_numbers<[1], [0], [0], [1], [0, 0, 1, 1], [], []>} : vector<32x32xf32>, vector<32x32xf32>, vector<32x32xf32> -> vector<32x32xf32>
    %cst_13 = arith.constant 2.000000e+00 : f32
    %15 = vector.broadcast %cst_13 : f32 to vector<32x32xf32>
    %16 = arith.mulf %15, %14 : vector<32x32xf32>
    %17 = arith.subf %16, %5 : vector<32x32xf32>
    %c0_14 = arith.constant 0 : index
    %c0_15 = arith.constant 0 : index
    %c0_16 = arith.constant 0 : index
    %18 = vector.load %arg11[%c0_14, %c0_15, %c0_16] : memref<3x4x512xf32, #tpu.memory_space<vmem>>, vector<1x4x512xf32>
    %19 = vector.shape_cast %18 : vector<1x4x512xf32> to vector<4x512xf32>
    %cst_17 = arith.constant dense<0.000000e+00> : vector<32x512xf32>
    %20 = tpu.matmul %4, %19, %cst_17 {dimension_numbers = #tpu.dot_dimension_numbers<[1], [0], [0], [1], [0, 0, 1, 1], [], []>} : vector<32x4xf32>, vector<4x512xf32>, vector<32x512xf32> -> vector<32x512xf32>
    %c0_18 = arith.constant 0 : index
    %c0_19 = arith.constant 0 : index
    %c0_20 = arith.constant 0 : index
    %21 = vector.load %arg12[%c0_18, %c0_19, %c0_20] : memref<3x32x512xf32, #tpu.memory_space<vmem>>, vector<1x32x512xf32>
    %22 = vector.shape_cast %21 : vector<1x32x512xf32> to vector<32x512xf32>
    %cst_21 = arith.constant dense<0.000000e+00> : vector<32x512xf32>
    %23 = tpu.matmul %5, %22, %cst_21 {dimension_numbers = #tpu.dot_dimension_numbers<[1], [0], [0], [1], [0, 0, 1, 1], [], []>} : vector<32x32xf32>, vector<32x512xf32>, vector<32x512xf32> -> vector<32x512xf32>
    %24 = arith.addf %20, %23 : vector<32x512xf32>
    %c1 = arith.constant 1 : index
    %c0_22 = arith.constant 0 : index
    %c0_23 = arith.constant 0 : index
    %25 = vector.load %arg11[%c1, %c0_22, %c0_23] : memref<3x4x512xf32, #tpu.memory_space<vmem>>, vector<1x4x512xf32>
    %26 = vector.shape_cast %25 : vector<1x4x512xf32> to vector<4x512xf32>
    %cst_24 = arith.constant dense<0.000000e+00> : vector<32x512xf32>
    %27 = tpu.matmul %7, %26, %cst_24 {dimension_numbers = #tpu.dot_dimension_numbers<[1], [0], [0], [1], [0, 0, 1, 1], [], []>} : vector<32x4xf32>, vector<4x512xf32>, vector<32x512xf32> -> vector<32x512xf32>
    %28 = arith.addf %24, %27 : vector<32x512xf32>
    %c1_25 = arith.constant 1 : index
    %c0_26 = arith.constant 0 : index
    %c0_27 = arith.constant 0 : index
    %29 = vector.load %arg12[%c1_25, %c0_26, %c0_27] : memref<3x32x512xf32, #tpu.memory_space<vmem>>, vector<1x32x512xf32>
    %30 = vector.shape_cast %29 : vector<1x32x512xf32> to vector<32x512xf32>
    %cst_28 = arith.constant dense<0.000000e+00> : vector<32x512xf32>
    %31 = tpu.matmul %13, %30, %cst_28 {dimension_numbers = #tpu.dot_dimension_numbers<[1], [0], [0], [1], [0, 0, 1, 1], [], []>} : vector<32x32xf32>, vector<32x512xf32>, vector<32x512xf32> -> vector<32x512xf32>
    %32 = arith.addf %28, %31 : vector<32x512xf32>
    %c2 = arith.constant 2 : index
    %c0_29 = arith.constant 0 : index
    %c0_30 = arith.constant 0 : index
    %33 = vector.load %arg11[%c2, %c0_29, %c0_30] : memref<3x4x512xf32, #tpu.memory_space<vmem>>, vector<1x4x512xf32>
    %34 = vector.shape_cast %33 : vector<1x4x512xf32> to vector<4x512xf32>
    %cst_31 = arith.constant dense<0.000000e+00> : vector<32x512xf32>
    %35 = tpu.matmul %11, %34, %cst_31 {dimension_numbers = #tpu.dot_dimension_numbers<[1], [0], [0], [1], [0, 0, 1, 1], [], []>} : vector<32x4xf32>, vector<4x512xf32>, vector<32x512xf32> -> vector<32x512xf32>
    %36 = arith.addf %32, %35 : vector<32x512xf32>
    %c2_32 = arith.constant 2 : index
    %c0_33 = arith.constant 0 : index
    %c0_34 = arith.constant 0 : index
    %37 = vector.load %arg12[%c2_32, %c0_33, %c0_34] : memref<3x32x512xf32, #tpu.memory_space<vmem>>, vector<1x32x512xf32>
    %38 = vector.shape_cast %37 : vector<1x32x512xf32> to vector<32x512xf32>
    %cst_35 = arith.constant dense<0.000000e+00> : vector<32x512xf32>
    %39 = tpu.matmul %17, %38, %cst_35 {dimension_numbers = #tpu.dot_dimension_numbers<[1], [0], [0], [1], [0, 0, 1, 1], [], []>} : vector<32x32xf32>, vector<32x512xf32>, vector<32x512xf32> -> vector<32x512xf32>
    %40 = arith.addf %36, %39 : vector<32x512xf32>
    %41 = arith.mulf %40, %12 : vector<32x512xf32>
    %c0_36 = arith.constant 0 : index
    %c0_37 = arith.constant 0 : index
    %42 = vector.load %arg8[%c0_36, %c0_37] : memref<512x32xf32, #tpu.memory_space<vmem>>, vector<512x32xf32>
    %cst_38 = arith.constant dense<0.000000e+00> : vector<32x32xf32>
    %43 = tpu.matmul %41, %42, %cst_38 {dimension_numbers = #tpu.dot_dimension_numbers<[1], [0], [0], [1], [0, 0, 1, 1], [], []>} : vector<32x512xf32>, vector<512x32xf32>, vector<32x32xf32> -> vector<32x32xf32>
    %c0_39 = arith.constant 0 : index
    %c0_40 = arith.constant 0 : index
    %44 = vector.load %arg23[%c0_39, %c0_40] : memref<32x32xf32, #tpu.memory_space<vmem>>, vector<32x32xf32>
    %45 = arith.addf %43, %44 : vector<32x32xf32>
    %46 = arith.negf %45 : vector<32x32xf32>
    %47 = math.exp %46 : vector<32x32xf32>
    %cst_41 = arith.constant 1.000000e+00 : f32
    %48 = vector.broadcast %cst_41 : f32 to vector<32x32xf32>
    %49 = arith.addf %48, %47 : vector<32x32xf32>
    %50 = arith.divf %48, %49 : vector<32x32xf32>
    %c0_42 = arith.constant 0 : index
    %c0_43 = arith.constant 0 : index
    %51 = vector.load %arg9[%c0_42, %c0_43] : memref<512x32xf32, #tpu.memory_space<vmem>>, vector<512x32xf32>
    %cst_44 = arith.constant dense<0.000000e+00> : vector<32x32xf32>
    %52 = tpu.matmul %41, %51, %cst_44 {dimension_numbers = #tpu.dot_dimension_numbers<[1], [0], [0], [1], [0, 0, 1, 1], [], []>} : vector<32x512xf32>, vector<512x32xf32>, vector<32x32xf32> -> vector<32x32xf32>
    %c0_45 = arith.constant 0 : index
    %c0_46 = arith.constant 0 : index
    %53 = vector.load %arg24[%c0_45, %c0_46] : memref<32x32xf32, #tpu.memory_space<vmem>>, vector<32x32xf32>
    %54 = arith.addf %52, %53 : vector<32x32xf32>
    %55 = arith.negf %54 : vector<32x32xf32>
    %56 = math.exp %55 : vector<32x32xf32>
    %cst_47 = arith.constant 1.000000e+00 : f32
    %57 = vector.broadcast %cst_47 : f32 to vector<32x32xf32>
    %58 = arith.addf %57, %56 : vector<32x32xf32>
    %59 = arith.divf %57, %58 : vector<32x32xf32>
    %60 = arith.mulf %50, %5 : vector<32x32xf32>
    %c0_48 = arith.constant 0 : index
    %c0_49 = arith.constant 0 : index
    %61 = vector.load %arg22[%c0_48, %c0_49] : memref<32x256xf32, #tpu.memory_space<vmem>>, vector<32x256xf32>
    %cst_50 = arith.constant dense<0.000000e+00> : vector<32x32xf32>
    %62 = tpu.matmul %6, %60, %cst_50 {dimension_numbers = #tpu.dot_dimension_numbers<[1], [0], [0], [1], [0, 0, 1, 1], [], []>} : vector<32x32xf32>, vector<32x32xf32>, vector<32x32xf32> -> vector<32x32xf32>
    %cst_51 = arith.constant dense<0.000000e+00> : vector<32x32xf32>
    %63 = tpu.matmul %6, %62, %cst_51 {dimension_numbers = #tpu.dot_dimension_numbers<[1], [0], [0], [1], [0, 0, 1, 1], [], []>} : vector<32x32xf32>, vector<32x32xf32>, vector<32x32xf32> -> vector<32x32xf32>
    %cst_52 = arith.constant 2.000000e+00 : f32
    %64 = vector.broadcast %cst_52 : f32 to vector<32x32xf32>
    %65 = arith.mulf %64, %63 : vector<32x32xf32>
    %66 = arith.subf %65, %60 : vector<32x32xf32>
    %c0_53 = arith.constant 0 : index
    %c0_54 = arith.constant 0 : index
    %c0_55 = arith.constant 0 : index
    %67 = vector.load %arg15[%c0_53, %c0_54, %c0_55] : memref<3x4x256xf32, #tpu.memory_space<vmem>>, vector<1x4x256xf32>
    %68 = vector.shape_cast %67 : vector<1x4x256xf32> to vector<4x256xf32>
    %cst_56 = arith.constant dense<0.000000e+00> : vector<32x256xf32>
    %69 = tpu.matmul %4, %68, %cst_56 {dimension_numbers = #tpu.dot_dimension_numbers<[1], [0], [0], [1], [0, 0, 1, 1], [], []>} : vector<32x4xf32>, vector<4x256xf32>, vector<32x256xf32> -> vector<32x256xf32>
    %c0_57 = arith.constant 0 : index
    %c0_58 = arith.constant 0 : index
    %c0_59 = arith.constant 0 : index
    %70 = vector.load %arg16[%c0_57, %c0_58, %c0_59] : memref<3x32x256xf32, #tpu.memory_space<vmem>>, vector<1x32x256xf32>
    %71 = vector.shape_cast %70 : vector<1x32x256xf32> to vector<32x256xf32>
    %cst_60 = arith.constant dense<0.000000e+00> : vector<32x256xf32>
    %72 = tpu.matmul %60, %71, %cst_60 {dimension_numbers = #tpu.dot_dimension_numbers<[1], [0], [0], [1], [0, 0, 1, 1], [], []>} : vector<32x32xf32>, vector<32x256xf32>, vector<32x256xf32> -> vector<32x256xf32>
    %73 = arith.addf %69, %72 : vector<32x256xf32>
    %c1_61 = arith.constant 1 : index
    %c0_62 = arith.constant 0 : index
    %c0_63 = arith.constant 0 : index
    %74 = vector.load %arg15[%c1_61, %c0_62, %c0_63] : memref<3x4x256xf32, #tpu.memory_space<vmem>>, vector<1x4x256xf32>
    %75 = vector.shape_cast %74 : vector<1x4x256xf32> to vector<4x256xf32>
    %cst_64 = arith.constant dense<0.000000e+00> : vector<32x256xf32>
    %76 = tpu.matmul %7, %75, %cst_64 {dimension_numbers = #tpu.dot_dimension_numbers<[1], [0], [0], [1], [0, 0, 1, 1], [], []>} : vector<32x4xf32>, vector<4x256xf32>, vector<32x256xf32> -> vector<32x256xf32>
    %77 = arith.addf %73, %76 : vector<32x256xf32>
    %c1_65 = arith.constant 1 : index
    %c0_66 = arith.constant 0 : index
    %c0_67 = arith.constant 0 : index
    %78 = vector.load %arg16[%c1_65, %c0_66, %c0_67] : memref<3x32x256xf32, #tpu.memory_space<vmem>>, vector<1x32x256xf32>
    %79 = vector.shape_cast %78 : vector<1x32x256xf32> to vector<32x256xf32>
    %cst_68 = arith.constant dense<0.000000e+00> : vector<32x256xf32>
    %80 = tpu.matmul %62, %79, %cst_68 {dimension_numbers = #tpu.dot_dimension_numbers<[1], [0], [0], [1], [0, 0, 1, 1], [], []>} : vector<32x32xf32>, vector<32x256xf32>, vector<32x256xf32> -> vector<32x256xf32>
    %81 = arith.addf %77, %80 : vector<32x256xf32>
    %c2_69 = arith.constant 2 : index
    %c0_70 = arith.constant 0 : index
    %c0_71 = arith.constant 0 : index
    %82 = vector.load %arg15[%c2_69, %c0_70, %c0_71] : memref<3x4x256xf32, #tpu.memory_space<vmem>>, vector<1x4x256xf32>
    %83 = vector.shape_cast %82 : vector<1x4x256xf32> to vector<4x256xf32>
    %cst_72 = arith.constant dense<0.000000e+00> : vector<32x256xf32>
    %84 = tpu.matmul %11, %83, %cst_72 {dimension_numbers = #tpu.dot_dimension_numbers<[1], [0], [0], [1], [0, 0, 1, 1], [], []>} : vector<32x4xf32>, vector<4x256xf32>, vector<32x256xf32> -> vector<32x256xf32>
    %85 = arith.addf %81, %84 : vector<32x256xf32>
    %c2_73 = arith.constant 2 : index
    %c0_74 = arith.constant 0 : index
    %c0_75 = arith.constant 0 : index
    %86 = vector.load %arg16[%c2_73, %c0_74, %c0_75] : memref<3x32x256xf32, #tpu.memory_space<vmem>>, vector<1x32x256xf32>
    %87 = vector.shape_cast %86 : vector<1x32x256xf32> to vector<32x256xf32>
    %cst_76 = arith.constant dense<0.000000e+00> : vector<32x256xf32>
    %88 = tpu.matmul %66, %87, %cst_76 {dimension_numbers = #tpu.dot_dimension_numbers<[1], [0], [0], [1], [0, 0, 1, 1], [], []>} : vector<32x32xf32>, vector<32x256xf32>, vector<32x256xf32> -> vector<32x256xf32>
    %89 = arith.addf %85, %88 : vector<32x256xf32>
    %90 = arith.mulf %89, %61 : vector<32x256xf32>
    %c0_77 = arith.constant 0 : index
    %c0_78 = arith.constant 0 : index
    %91 = vector.load %arg10[%c0_77, %c0_78] : memref<256x32xf32, #tpu.memory_space<vmem>>, vector<256x32xf32>
    %cst_79 = arith.constant dense<0.000000e+00> : vector<32x32xf32>
    %92 = tpu.matmul %90, %91, %cst_79 {dimension_numbers = #tpu.dot_dimension_numbers<[1], [0], [0], [1], [0, 0, 1, 1], [], []>} : vector<32x256xf32>, vector<256x32xf32>, vector<32x32xf32> -> vector<32x32xf32>
    %c0_80 = arith.constant 0 : index
    %c0_81 = arith.constant 0 : index
    %93 = vector.load %arg25[%c0_80, %c0_81] : memref<32x32xf32, #tpu.memory_space<vmem>>, vector<32x32xf32>
    %94 = arith.addf %92, %93 : vector<32x32xf32>
    %95 = math.tanh %94 : vector<32x32xf32>
    %96 = arith.mulf %59, %5 : vector<32x32xf32>
    %cst_82 = arith.constant 1.000000e+00 : f32
    %97 = vector.broadcast %cst_82 : f32 to vector<32x32xf32>
    %98 = arith.subf %97, %59 : vector<32x32xf32>
    %99 = arith.mulf %98, %95 : vector<32x32xf32>
    %100 = arith.addf %96, %99 : vector<32x32xf32>
    %c0_83 = arith.constant 0 : index
    %c0_84 = arith.constant 0 : index
    %101 = vector.load %arg19[%c0_83, %c0_84] : memref<32x32xf32, #tpu.memory_space<vmem>>, vector<32x32xf32>
    tpu.vector_store %arg19[%c0_83, %c0_84], %100 {strides = array<i32>} : memref<32x32xf32, #tpu.memory_space<vmem>>, vector<32x32xf32>,
    %c0_85 = arith.constant 0 : index
    %c0_86 = arith.constant 0 : index
    %c0_87 = arith.constant 0 : index
    %102 = vector.load %arg18[%c0_85, %c0_86, %c0_87] : memref<1x32x32xf32, #tpu.memory_space<vmem>>, vector<1x32x32xf32>
    %103 = vector.shape_cast %102 : vector<1x32x32xf32> to vector<32x32xf32>
    %104 = vector.shape_cast %100 : vector<32x32xf32> to vector<1x32x32xf32>
    tpu.vector_store %arg18[%c0_85, %c0_86, %c0_87], %104 {strides = array<i32>} : memref<1x32x32xf32, #tpu.memory_space<vmem>>, vector<1x32x32xf32>,
    return
  }
  func.func @transform_0(%arg0: i32) -> (i32, i32, i32) {
    %c0_i32 = arith.constant 0 : i32
    %c0_i32_0 = arith.constant 0 : i32
    %c0_i32_1 = arith.constant 0 : i32
    return %arg0, %c0_i32, %c0_i32_0 : i32, i32, i32
  }
  func.func @transform_1(%arg0: i32) -> (i32, i32) {
    %c0_i32 = arith.constant 0 : i32
    %c0_i32_0 = arith.constant 0 : i32
    %c0_i32_1 = arith.constant 0 : i32
    return %c0_i32, %c0_i32_0 : i32, i32
  }
  func.func @transform_2(%arg0: i32) -> (i32, i32) {
    %c0_i32 = arith.constant 0 : i32
    %c0_i32_0 = arith.constant 0 : i32
    %c0_i32_1 = arith.constant 0 : i32
    return %c0_i32, %c0_i32_0 : i32, i32
  }
  func.func @transform_3(%arg0: i32) -> (i32, i32) {
    %c0_i32 = arith.constant 0 : i32
    %c0_i32_0 = arith.constant 0 : i32
    %c0_i32_1 = arith.constant 0 : i32
    return %c0_i32, %c0_i32_0 : i32, i32
  }
  func.func @transform_4(%arg0: i32) -> (i32, i32) {
    %c0_i32 = arith.constant 0 : i32
    %c0_i32_0 = arith.constant 0 : i32
    %c0_i32_1 = arith.constant 0 : i32
    return %c0_i32, %c0_i32_0 : i32, i32
  }
  func.func @transform_5(%arg0: i32) -> (i32, i32) {
    %c0_i32 = arith.constant 0 : i32
    %c0_i32_0 = arith.constant 0 : i32
    %c0_i32_1 = arith.constant 0 : i32
    return %c0_i32, %c0_i32_0 : i32, i32
  }
  func.func @transform_6(%arg0: i32) -> (i32, i32) {
    %c0_i32 = arith.constant 0 : i32
    %c0_i32_0 = arith.constant 0 : i32
    %c0_i32_1 = arith.constant 0 : i32
    return %c0_i32, %c0_i32_0 : i32, i32
  }
  func.func @transform_7(%arg0: i32) -> (i32, i32) {
    %c0_i32 = arith.constant 0 : i32
    %c0_i32_0 = arith.constant 0 : i32
    %c0_i32_1 = arith.constant 0 : i32
    return %c0_i32, %c0_i32_0 : i32, i32
  }
  func.func @transform_8(%arg0: i32) -> (i32, i32) {
    %c0_i32 = arith.constant 0 : i32
    %c0_i32_0 = arith.constant 0 : i32
    %c0_i32_1 = arith.constant 0 : i32
    return %c0_i32, %c0_i32_0 : i32, i32
  }
  func.func @transform_9(%arg0: i32) -> (i32, i32) {
    %c0_i32 = arith.constant 0 : i32
    %c0_i32_0 = arith.constant 0 : i32
    %c0_i32_1 = arith.constant 0 : i32
    return %c0_i32, %c0_i32_0 : i32, i32
  }
  func.func @transform_10(%arg0: i32) -> (i32, i32, i32) {
    %c0_i32 = arith.constant 0 : i32
    %c0_i32_0 = arith.constant 0 : i32
    %c0_i32_1 = arith.constant 0 : i32
    %c0_i32_2 = arith.constant 0 : i32
    return %c0_i32, %c0_i32_0, %c0_i32_1 : i32, i32, i32
  }
  func.func @transform_11(%arg0: i32) -> (i32, i32, i32) {
    %c0_i32 = arith.constant 0 : i32
    %c0_i32_0 = arith.constant 0 : i32
    %c0_i32_1 = arith.constant 0 : i32
    %c0_i32_2 = arith.constant 0 : i32
    return %c0_i32, %c0_i32_0, %c0_i32_1 : i32, i32, i32
  }
  func.func @transform_12(%arg0: i32) -> (i32, i32) {
    %c0_i32 = arith.constant 0 : i32
    %c0_i32_0 = arith.constant 0 : i32
    %c0_i32_1 = arith.constant 0 : i32
    return %c0_i32, %c0_i32_0 : i32, i32
  }
  func.func @transform_13(%arg0: i32) -> (i32, i32) {
    %c0_i32 = arith.constant 0 : i32
    %c0_i32_0 = arith.constant 0 : i32
    %c0_i32_1 = arith.constant 0 : i32
    return %c0_i32, %c0_i32_0 : i32, i32
  }
  func.func @transform_14(%arg0: i32) -> (i32, i32, i32) {
    %c0_i32 = arith.constant 0 : i32
    %c0_i32_0 = arith.constant 0 : i32
    %c0_i32_1 = arith.constant 0 : i32
    %c0_i32_2 = arith.constant 0 : i32
    return %c0_i32, %c0_i32_0, %c0_i32_1 : i32, i32, i32
  }
  func.func @transform_15(%arg0: i32) -> (i32, i32, i32) {
    %c0_i32 = arith.constant 0 : i32
    %c0_i32_0 = arith.constant 0 : i32
    %c0_i32_1 = arith.constant 0 : i32
    %c0_i32_2 = arith.constant 0 : i32
    return %c0_i32, %c0_i32_0, %c0_i32_1 : i32, i32, i32
  }
  func.func @transform_16(%arg0: i32) -> (i32, i32) {
    %c0_i32 = arith.constant 0 : i32
    %c0_i32_0 = arith.constant 0 : i32
    %c0_i32_1 = arith.constant 0 : i32
    return %c0_i32, %c0_i32_0 : i32, i32
  }
  func.func @transform_17(%arg0: i32) -> (i32, i32, i32) {
    %c0_i32 = arith.constant 0 : i32
    %c0_i32_0 = arith.constant 0 : i32
    %c0_i32_1 = arith.constant 0 : i32
    return %arg0, %c0_i32, %c0_i32_0 : i32, i32, i32
  }
}

</mosaic_0001>

<bundles_post_ra>
// kernel: tpu_custom_call.1
= control target key start
LH: loop header
LB: loop body
LE: loop exit
PB: predicated region body
PF: predicated region fallthrough
CT: control target
= control target key end

     0   :  { %s7519_s0 = inlined_call_operand.vmem [shape: f32[8,32,4], index: 0, kind: input, shape index: {}]   ;;  %s7520_s1 = inlined_call_operand.vmem [shape: f32[32,32], index: 1, kind: input, shape index: {}]   ;;  %s7521_s2 = inlined_call_operand.vmem [shape: f32[16,8], index: 2, kind: input, shape index: {}]   ;;  %s7522_s3 = inlined_call_operand.vmem [shape: f32[32,16], index: 3, kind: input, shape index: {}]   ;;  %s7523_s4 = inlined_call_operand.vmem [shape: f32[32,32], index: 4, kind: input, shape index: {}]   ;;  %s7524_s5 = inlined_call_operand.vmem [shape: f32[8,512], index: 5, kind: input, shape index: {}]   ;;  %s7525_s6 = inlined_call_operand.vmem [shape: f32[8,256], index: 6, kind: input, shape index: {}]   ;;  %s7526_s7 = inlined_call_operand.vmem [shape: f32[512,32], index: 7, kind: input, shape index: {}]   ;;  %s7527_s8 = inlined_call_operand.vmem [shape: f32[512,32], index: 8, kind: input, shape index: {}]   ;;  %s7528_s9 = inlined_call_operand.vmem [shape: f32[256,32], index: 9, kind: input, shape index: {}]   ;;  %s7529_s10 = inlined_call_operand.vmem [shape: f32[3,4,512], index: 10, kind: input, shape index: {}]   ;;  %s7530_s11 = inlined_call_operand.vmem [shape: f32[3,32,512], index: 11, kind: input, shape index: {}]   ;;  %s7531_s12 = inlined_call_operand.vmem [shape: f32[8,32], index: 12, kind: input, shape index: {}]   ;;  %s7532_s13 = inlined_call_operand.vmem [shape: f32[8,32], index: 13, kind: input, shape index: {}]   ;;  %s7533_s14 = inlined_call_operand.vmem [shape: f32[3,4,256], index: 14, kind: input, shape index: {}]   ;;  %s7534_s15 = inlined_call_operand.vmem [shape: f32[3,32,256], index: 15, kind: input, shape index: {}]   ;;  %s7535_s16 = inlined_call_operand.vmem [shape: f32[8,32], index: 16, kind: input, shape index: {}]   ;;  %s7536_s17 = inlined_call_operand.hbm [shape: f32[8,32,32], index: 17, kind: output, shape index: {}]  }
   0x1   :  { %7556 = sst [smem:[#allocation42_spill]] %s7519_s0 }
   0x2   :  { %7557 = sst [smem:[#allocation43_spill]] %s7520_s1 }
   0x3   :  { %7558 = sst [smem:[#allocation44_spill]] %s7521_s2 }
   0x4   :  { %7559 = sst [smem:[#allocation45_spill]] %s7536_s17 }
   0x5   :  { %22 = vsyncpa [#allocation10], 0 }
   0x6   :  { %24 = vsyncpa [#allocation10 + $0x1], 0  ;;  %s5814_s24 = smov 0   ;;  %s5816_s25 = smov 0  }
   0x7   :  { %s5818_s26 = smov 0   ;;  %s5820_s27 = smov 0  }
   0x8 LB: > { %7560 = sst [smem:[#allocation12_spill]] %s5705_s24  ;;  %s5835_s28 = sadd.s32 4294967295, %s5717_s27   ;;  %s5717_s27 = sphi %s5820_s27, %s7626_s27   ;;  %s5713_s26 = sphi %s5818_s26, %s7628_s26   ;;  %s5709_s25 = sphi %s5816_s25, %s7630_s25   ;;  %s5705_s24 = sphi %s5814_s24, %s7629_s24  }
   0x9   : > { %7561 = sst [smem:[#allocation13_spill]] %s5713_s26  ;;  %s4854_s29 = sadd.s32 4294967294, %s5717_s27  }
   0xa   : > { %7562 = sst [smem:[#allocation14_spill]] %s5717_s27  ;;  %s5839_s0 = sadd.s32 1, %s5717_s27  }
   0xb   : > { %7563 = sst [smem:[#allocation15_spill]] %s5839_s0  ;;  %s399_s30 = sadd.s32 1, %s5713_s26 }
   0xc   : > { %s396_s18 = ssub.s32 %s5717_s27, %s5839_s0  ;;  %p409_p0 = scmp.ne.s32.totalorder %s5713_s26, %s5709_s25 }
   0xd   : > { %p397_p1 = scmp.eq.s32.totalorder %s396_s18, 0  ;;  %p410_p2 = scmp.eq.s32.totalorder %s5835_s28, 7 }
   0xe   : > { %p415_p3 = scmp.ne.s32.totalorder %s5709_s25, %s5705_s24  ;;  %p416_p4 = scmp.eq.s32.totalorder %s4854_s29, 7 }
   0xf   : > { %s5850_s19 = scalar_select %p397_p1, %s5713_s26, %s399_s30  }
  0x10   : > { %p5852_p5 = por %p410_p2, %p409_p0  ;;  %p5856_p6 = por %p416_p4, %p415_p3 }
  0x11   : > { %7564 = sst [smem:[#allocation16_spill]] %s5850_s19  ;;  %p4857_p7 = scmp.ge.s32.totalorder %s5717_s27, 1 }
  0x12   : > { %s7566_s20 = scalar_select %p5856_p6, 1, 0 }
  0x13   : > { %p490_p8 = scmp.lt.s32.totalorder %s5717_s27, 9 }
  0x14   : > { %7567 = sst [smem:[#allocation17_spill]] %s7566_s20 }
  0x15   : > { %p491_p9 = pnand %p4857_p7, %p490_p8 }
  0x17   : > { %494 = sbr.rel (%p491_p9) target bundleno = 2725 (0xaa5), region = 88 }
  0x1c   : > { %s7545_s21 = sand.u32 1, %s5709_s25   ;;  %p542_p10 = scmp.lt.s32.totalorder %s5835_s28, 7 }
  0x1d   : > { %s4858_s22 = sshll.u32 %s7545_s21, 5  ;;  %s7568_s19 = sld [smem:[#allocation42_spill]] }
  0x1e   : > { %s543_s23 = scalar_select %p542_p10, %s5835_s28, 7 }
  0x1f   : > { %s5872_s0 = scalar_lea.vmem [#allocation9], %s4858_s22  ;;  %p4861_p11 = scmp.ne.s32.totalorder %s5835_s28, 0 }
  0x20   : > { %s5087_s29 = sshll.u32 %s543_s23, 5  ;;  %s7569_s2 = sld [smem:[#allocation44_spill]] (!%p4861_p11) }
  0x21   : > { %550 = sbr.rel (%p4861_p11) target bundleno = 988 (0x3dc), region = 92  ;;  %s7570_s27 = sld [smem:[#allocation43_spill]] (!%p4861_p11) }
  0x23   : > { %s5870_s26 = scalar_lea.vmem %s7568_s19, %s5087_s29 }
  0x26   : > { %v561_v0 = vld [vmem:[%s7569_s2 + $0x8] sm:$0xff]  ;;  %vm566_vm0 = vcmask 64512   ;;  %v560_v1 = vld [vmem:[%s7569_s2] sm:$0xff]  ;;  %vm650_vm1 = vcmask 130048   ;;  %v5902_v10 = vld [vmem:[%s7522_s3 + $0x10] sm:$0xff]  ;;  %v5719_v25 = vmov 0.0  }
  0x27   : > { %5396 = vmatprep.subr.msk.mxu0 %vm566_vm0, %v561_v0  ;;  %5400 = vmatprep.mubr.msk.f32.mxu0 %vm566_vm0, %v560_v1  ;;  %v5892_v8 = vld [vmem:[%s7522_s3] sm:$0xff]  ;;  %v5897_v9 = vld [vmem:[%s7522_s3 + $0x8] sm:$0xff]  ;;  %v5915_v11 = vld [vmem:[%s7522_s3 + $0x18] sm:$0xff]  ;;  %s7571_s19 = smov %s7570_s27  ;;  %vm555_vm2 = vcmask 261120  }
  0x28   : > { %5397 = vmatpush3.xpose.msk.msra.mxu0 %vm566_vm0, %v561_v0  ;;  %5407 = vmatprep.mubr.msk.f32.mxu1 %vm650_vm1, %v5892_v8  ;;  %v965_v22 = vld [vmem:[%s7524_s5 + $0x8] sm:$0xff]  ;;  %v964_v23 = vld [vmem:[%s7524_s5] sm:$0xff]  ;;  %v967_v38 = vld [vmem:[%s7524_s5 + $0x18] sm:$0xff] }
  0x29   : > { %5398 = vmatprep.subr.msk.mxu0 %vm566_vm0, %v560_v1  ;;  %v1175_v24 = vld [vmem:[%s7525_s6 + $0x8] sm:$0xff]  ;;  %v1174_v27 = vld [vmem:[%s7525_s6] sm:$0xff]  ;;  %v553_v41 = vld [vmem:[%s7571_s19 + $0x10] sm:$0xff] }
  0x2a   : > { %v1363_v29 = vld [vmem:[%s7532_s13] sm:$0xff]  ;;  %v552_v40 = vld [vmem:[%s7571_s19 + $0x8] sm:$0xff]  ;;  %v554_v43 = vld [vmem:[%s7571_s19 + $0x18] sm:$0xff]  ;;  %558 = vst.msk [vmem:[#allocation2 + $0x10] sm:$0xff] %vm555_vm2, %v553_v41 }
  0x2b   : > { %v551_v39 = vld [vmem:[%s7570_s27] sm:$0xff]  ;;  %557 = vst.msk [vmem:[#allocation2 + $0x8] sm:$0xff] %vm555_vm2, %v552_v40  ;;  %559 = vst.msk [vmem:[#allocation2 + $0x18] sm:$0xff] %vm555_vm2, %v554_v43  ;;  %v966_v63 = vld [vmem:[%s7524_s5 + $0x10] sm:$0xff] }
  0x2c   : > { %5399 = vmatpush3.xpose.msk.msra.mxu0 %vm566_vm0, %v560_v1  ;;  %556 = vst.msk [vmem:[#allocation2] sm:$0xff] %vm555_vm2, %v551_v39 }
  0x2d   : > { %5427 = vmatprep.subr.mxu0 %v561_v0 }
  0x2f   : > { %5401 = vmatmul.mubr.msk.f32.vlgmr.msra.gmra.mxu0 %vm566_vm0, %v561_v0 }
  0x30   : > { %5428 = vmatpush3.msra.mxu0 %v561_v0  ;;  %5431 = vmatprep.mubr.msk.f32.mxu0 %vm650_vm1, %v5892_v8  ;;  %v1273_v0 = vld [vmem:[%s7531_s12] sm:$0xff] }
  0x31   : > { %5429 = vmatprep.subr.mxu0 %v560_v1 }
  0x32   : > { %5430 = vmatpush3.msra.mxu0 %v560_v1 }
  0x33   : > { %5432 = vmatmul.mubr.msk.f32.vlgmr.msra.gmra.mxu0 %vm650_vm1, %v5897_v9  ;;  %1010 = vmatprep.subr.mxu0 %v965_v22 }
  0x34   : > { %5434 = vmatprep.mubr.msk.f32.mxu0 %vm650_vm1, %v5902_v10  ;;  %1011 = vmatpush1.msra.mxu0 %v964_v23 }
  0x35   : > { %1206 = vmatprep.subr.mxu0 %v1175_v24 }
  0x37   : > { %5435 = vmatmul.mubr.msk.f32.gmra.mxu0 %vm650_vm1, %v5915_v11 }
  0x38   : > { %1044 = vmatprep.mubr.f32.mxu0 %v5719_v25 }
  0xef   : > { %v5402_v2 = vpop.f32.mrf.mxu0 }
  0xf0   : > { %v649_v3 = vmax.f32 %v5402_v2, 0.0 }
  0xf1   : > { %v639_v4 = vpop.f32.mrf.mxu0 }
  0xf2   : > { %v648_v5 = vmax.f32 %v639_v4, 0.0  ;;  %v654_v6 = vsel %vm650_vm1, %v649_v3, -inf }
  0xf3   : > { %655 = vmax.xlane.f32.xlu0 %v654_v6  ;;  %v5931_v26 = vpop.f32.mrf.mxu0  ;;  %v868_v6 = vld [vmem:[%s7523_s4 + $0x8] sm:$0xff] }
  0xf4   : > { %v651_v7 = vsel %vm650_vm1, %v648_v5, -inf }
  0xf5   : > { %v5936_v28 = vpop.f32.mrf.mxu0 }
  0xf6   : > { %4882 = vmatmul.mubr.msk.f32.vlgmr.msra.gmra.mxu0 %vm566_vm0, %v5936_v28 }
  0xf7   : > { %652 = vmax.xlane.f32.xlu0 %v651_v7  ;;  %1050 = vmatprep.mubr.f32.mxu0 %v5719_v25  ;;  %v5944_v30 = vpop.f32.mrf.mxu0 }
  0xf8   : > { %1207 = vmatpush1.msra.mxu0 %v1174_v27 }
  0xf9   : > { %5445 = vmatprep.subr.mxu0 %v1363_v29  ;;  %v5948_v31 = vpop.f32.mrf.mxu0 }
  0xfa   : > { %4883 = vmatmul.mubr.msk.f32.gmra.mxu0 %vm566_vm0, %v5931_v26 }
  0xfb   : > { %1056 = vmatprep.mubr.f32.mxu0 %v5719_v25 }
  0xfe   : > { %4884 = vmatmul.mubr.msk.f32.gmra.mxu0 %vm566_vm0, %v5948_v31 }
  0xff   : > { %1062 = vmatprep.mubr.f32.mxu0 %v5719_v25 }
 0x102   : > { %4885 = vmatmul.mubr.msk.f32.gmra.mxu0 %vm566_vm0, %v5944_v30 }
 0x103   : > { %1240 = vmatprep.mubr.f32.mxu0 %v5719_v25 }
 0x106   : > { %4890 = vmatmul.mubr.msk.f32.vlgmr.msra.gmra.mxu0 %vm566_vm0, %v5936_v28 }
 0x107   : > { %1246 = vmatprep.mubr.f32.mxu0 %v5719_v25  ;;  %5446 = vmatpush3.msra.mxu0 %v1363_v29 }
 0x10a   : > { %4891 = vmatmul.mubr.msk.f32.gmra.mxu0 %vm566_vm0, %v5931_v26 }
 0x10b   : > { %1252 = vmatprep.mubr.f32.mxu0 %v5719_v25 }
 0x10e   : > { %4892 = vmatmul.mubr.msk.f32.gmra.mxu0 %vm566_vm0, %v5948_v31 }
 0x10f   : > { %1258 = vmatprep.mubr.f32.mxu0 %v5719_v25 }
 0x112   : > { %4893 = vmatmul.mubr.msk.f32.gmra.mxu0 %vm566_vm0, %v5944_v30 }
 0x113   : > { %5447 = vmatprep.mubr.msk.f32.mxu0 %vm566_vm0, %v5936_v28 }
 0x116   : > { %5448 = vmatmul.mubr.msk.f32.vlgmr.msra.gmra.mxu0 %vm566_vm0, %v5931_v26 }
 0x117   : > { %5450 = vmatprep.mubr.msk.f32.mxu0 %vm566_vm0, %v5948_v31 }
 0x11a   : > { %5451 = vmatmul.mubr.msk.f32.gmra.mxu0 %vm566_vm0, %v5944_v30 }
 0x17c   : > { %v656_v12 = vpop.xlane.xlu0 %655 }
 0x17d   : > { %v658_v13 = vsub.f32 %v649_v3, %v656_v12  ;;  %v1453_v3 = vld [vmem:[%s7535_s16] sm:$0xff] }
 0x17f   : > { %v661_v14 = vmul.f32 1.442695, %v658_v13 }
 0x180   : > { %v653_v15 = vpop.xlane.xlu0 %652 }
 0x181   : > { %5588 = vpow2.f32 %v661_v14  ;;  %v657_v16 = vsub.f32 %v648_v5, %v653_v15  ;;  %v869_v14 = vld [vmem:[%s7523_s4 + $0x10] sm:$0xff] }
 0x183   : > { %v659_v17 = vmul.f32 1.442695, %v657_v16 }
 0x185   : > { %5590 = vpow2.f32 %v659_v17 }
 0x18e   : > { %v5589_v18 = vpop.eup %5588 }
 0x18f   : > { %v666_v19 = vsel %vm650_vm1, %v5589_v18, 0.0 }
 0x190   : > { %667 = vadd.xlane.f32.xlu1 %v666_v19 }
 0x192   : > { %v5591_v20 = vpop.eup %5590 }
 0x193   : > { %v663_v21 = vsel %vm650_vm1, %v5591_v20, 0.0 }
 0x194   : > { %664 = vadd.xlane.f32.xlu1 %v663_v21 }
 0x1b6   : > { %v1046_v42 = vpop.f32.mrf.mxu0 }
 0x1b7   : > { %1158 = vst [vmem:[#allocation4 + $0x30] sm:$0xff] %v1046_v42 }
 0x1b8   : > { %v1048_v44 = vpop.f32.mrf.mxu0 }
 0x1b9   : > { %1159 = vst [vmem:[#allocation4] sm:$0xff] %v1048_v44 }
 0x1ba   : > { %v1052_v45 = vpop.f32.mrf.mxu0 }
 0x1bb   : > { %1162 = vst [vmem:[#allocation4 + $0x50] sm:$0xff] %v1052_v45 }
 0x1bc   : > { %v1054_v46 = vpop.f32.mrf.mxu0 }
 0x1bd   : > { %1163 = vst [vmem:[#allocation4 + $0x68] sm:$0xff] %v1054_v46 }
 0x1be   : > { %v1058_v47 = vpop.f32.mrf.mxu0 }
 0x1bf   : > { %1166 = vst [vmem:[#allocation4 + $0x40] sm:$0xff] %v1058_v47 }
 0x1c0   : > { %v1060_v48 = vpop.f32.mrf.mxu0 }
 0x1c1   : > { %1167 = vst [vmem:[#allocation4 + $0x20] sm:$0xff] %v1060_v48 }
 0x1c2   : > { %v1064_v49 = vpop.f32.mrf.mxu0 }
 0x1c3   : > { %1170 = vst [vmem:[#allocation4 + $0x60] sm:$0xff] %v1064_v49 }
 0x1c4   : > { %v1066_v50 = vpop.f32.mrf.mxu0 }
 0x1c5   : > { %1171 = vst [vmem:[#allocation4 + $0x70] sm:$0xff] %v1066_v50 }
 0x1c6   : > { %v1242_v51 = vpop.f32.mrf.mxu0 }
 0x1c7   : > { %1265 = vst [vmem:[#allocation5 + $0x28] sm:$0xff] %v1242_v51 }
 0x1c8   : > { %v1244_v52 = vpop.f32.mrf.mxu0 }
 0x1c9   : > { %1266 = vst [vmem:[#allocation5] sm:$0xff] %v1244_v52 }
 0x1ca   : > { %v1248_v53 = vpop.f32.mrf.mxu0 }
 0x1cb   : > { %1267 = vst [vmem:[#allocation5 + $0x10] sm:$0xff] %v1248_v53 }
 0x1cc   : > { %v1250_v54 = vpop.f32.mrf.mxu0 }
 0x1cd   : > { %1268 = vst [vmem:[#allocation5 + $0x20] sm:$0xff] %v1250_v54 }
 0x1ce   : > { %v1254_v55 = vpop.f32.mrf.mxu0 }
 0x1cf   : > { %1269 = vst [vmem:[#allocation5 + $0x18] sm:$0xff] %v1254_v55 }
 0x1d0   : > { %v1256_v56 = vpop.f32.mrf.mxu0 }
 0x1d1   : > { %1270 = vst [vmem:[#allocation5 + $0x8] sm:$0xff] %v1256_v56 }
 0x1d2   : > { %v1260_v57 = vpop.f32.mrf.mxu0 }
 0x1d3   : > { %1271 = vst [vmem:[#allocation5 + $0x38] sm:$0xff] %v1260_v57 }
 0x1d4   : > { %v1262_v58 = vpop.f32.mrf.mxu0 }
 0x1d5   : > { %1272 = vst [vmem:[#allocation5 + $0x30] sm:$0xff] %v1262_v58 }
 0x1d6   : > { %v5449_v59 = vpop.f32.mrf.mxu0 }
 0x1d7   : > { %1450 = vst.msk [vmem:[#allocation7 + $0x8] sm:$0xff] %vm555_vm2, %v5449_v59 }
 0x1d8   : > { %v1430_v60 = vpop.f32.mrf.mxu0 }
 0x1d9   : > { %1449 = vst.msk [vmem:[#allocation7] sm:$0xff] %vm555_vm2, %v1430_v60 }
 0x1da   : > { %v5452_v4 = vpop.f32.mrf.mxu0 }
 0x1db   : > { %1452 = vst.msk [vmem:[#allocation7 + $0x18] sm:$0xff] %vm555_vm2, %v5452_v4 }
 0x1dc   : > { %v1440_v5 = vpop.f32.mrf.mxu0 }
 0x1dd   : > { %1451 = vst.msk [vmem:[#allocation7 + $0x10] sm:$0xff] %vm555_vm2, %v1440_v5 }
 0x219   : > { %v668_v32 = vpop.xlane.xlu1 %667 }
 0x21a   : > { %5592 = vrcp.f32 %v668_v32 }
 0x21d   : > { %v665_v33 = vpop.xlane.xlu1 %664 }
 0x21e   : > { %5594 = vrcp.f32 %v665_v33 }
 0x227   : > { %v5593_v34 = vpop.eup %5592 }
 0x228   : > { %v672_v35 = vmul.f32 %v5593_v34, %v5589_v18 }
 0x22a   : > { %5403 = vmatprep.subr.mxu1 %v672_v35 }
 0x22b   : > { %v5595_v36 = vpop.eup %5594  ;;  %5404 = vmatpush3.msra.mxu1 %v672_v35 }
 0x22c   : > { %v670_v37 = vmul.f32 %v5595_v36, %v5591_v20 }
 0x22e   : > { %5405 = vmatprep.subr.mxu1 %v670_v37 }
 0x22f   : > { %5406 = vmatpush3.msra.mxu1 %v670_v37 }
 0x230   : > { %5408 = vmatmul.mubr.msk.f32.vlgmr.msra.gmra.mxu1 %vm650_vm1, %v5897_v9  ;;  %5413 = vmatprep.subr.msk.mxu1 %vm650_vm1, %v5915_v11 }
 0x231   : > { %5410 = vmatprep.mubr.msk.f32.mxu1 %vm650_vm1, %v5902_v10  ;;  %5414 = vmatpush3.xpose.msk.msra.mxu1 %vm650_vm1, %v5915_v11 }
 0x232   : > { %5415 = vmatprep.subr.msk.mxu1 %vm650_vm1, %v5902_v10 }
 0x234   : > { %5411 = vmatmul.mubr.msk.f32.gmra.mxu1 %vm650_vm1, %v5915_v11  ;;  %v870_v11 = vld [vmem:[%s7523_s4 + $0x18] sm:$0xff] }
 0x235   : > { %5416 = vmatpush3.xpose.msk.msra.mxu1 %vm650_vm1, %v5902_v10 }
 0x236   : > { %5417 = vmatprep.subr.msk.mxu1 %vm650_vm1, %v5897_v9 }
 0x239   : > { %5418 = vmatpush3.xpose.msk.msra.mxu1 %vm650_vm1, %v5897_v9 }
 0x23a   : > { %5419 = vmatprep.subr.msk.mxu1 %vm650_vm1, %v5892_v8 }
 0x23d   : > { %5420 = vmatpush3.xpose.msk.msra.mxu1 %vm650_vm1, %v5892_v8  ;;  %v867_v8 = vld [vmem:[%s7523_s4] sm:$0xff] }
 0x23e   : > { %1099 = vmatprep.subr.mxu1 %v967_v38 }
 0x2f0   : > { %v5409_v61 = vpop.f32.mrf.mxu1 }
 0x2f2   : > { %v751_v62 = vpop.f32.mrf.mxu1 }
 0x2f3   : > { %5421 = vmatprep.mubr.msk.f32.mxu1 %vm650_vm1, %v751_v62 }
 0x2f4   : > { %v5412_v1 = vpop.f32.mrf.mxu1  ;;  %5422 = vmatmul.mubr.msk.f32.vlgmr.msra.gmra.mxu1 %vm650_vm1, %v5409_v61 }
 0x2f5   : > { %1100 = vmatpush1.msra.mxu1 %v966_v63 }
 0x2f6   : > { %v761_v2 = vpop.f32.mrf.mxu1  ;;  %5437 = vmatprep.subr.mxu1 %v1273_v0 }
 0x2f7   : > { %5424 = vmatprep.mubr.msk.f32.mxu1 %vm650_vm1, %v761_v2 }
 0x2f8   : > { %5425 = vmatmul.mubr.msk.f32.gmra.mxu1 %vm650_vm1, %v5412_v1 }
 0x2f9   : > { %1133 = vmatprep.mubr.f32.mxu1 %v5719_v25 }
 0x2fc   : > { %4886 = vmatmul.mubr.msk.f32.vlgmr.msra.gmra.mxu1 %vm566_vm0, %v5936_v28 }
 0x2fd   : > { %5438 = vmatpush3.msra.mxu1 %v1273_v0  ;;  %1139 = vmatprep.mubr.f32.mxu1 %v5719_v25 }
 0x2fe   : > { %5453 = vmatprep.subr.mxu1 %v1453_v3 }
 0x300   : > { %4887 = vmatmul.mubr.msk.f32.gmra.mxu1 %vm566_vm0, %v5931_v26 }
 0x301   : > { %1145 = vmatprep.mubr.f32.mxu1 %v5719_v25 }
 0x304   : > { %4888 = vmatmul.mubr.msk.f32.gmra.mxu1 %vm566_vm0, %v5948_v31 }
 0x305   : > { %1151 = vmatprep.mubr.f32.mxu1 %v5719_v25 }
 0x308   : > { %4889 = vmatmul.mubr.msk.f32.gmra.mxu1 %vm566_vm0, %v5944_v30 }
 0x309   : > { %5439 = vmatprep.mubr.msk.f32.mxu1 %vm566_vm0, %v5936_v28 }
 0x30c   : > { %5440 = vmatmul.mubr.msk.f32.vlgmr.msra.gmra.mxu1 %vm566_vm0, %v5931_v26 }
 0x30d   : > { %5454 = vmatpush3.msra.mxu1 %v1453_v3  ;;  %5442 = vmatprep.mubr.msk.f32.mxu1 %vm566_vm0, %v5948_v31 }
 0x310   : > { %5443 = vmatmul.mubr.msk.f32.gmra.mxu1 %vm566_vm0, %v5944_v30 }
 0x311   : > { %5455 = vmatprep.mubr.msk.f32.mxu1 %vm566_vm0, %v5936_v28 }
 0x314   : > { %5456 = vmatmul.mubr.msk.f32.vlgmr.msra.gmra.mxu1 %vm566_vm0, %v5931_v26 }
 0x315   : > { %5458 = vmatprep.mubr.msk.f32.mxu1 %vm566_vm0, %v5948_v31 }
 0x318   : > { %5459 = vmatmul.mubr.msk.f32.gmra.mxu1 %vm566_vm0, %v5944_v30 }
 0x3b4   : > { %v5423_v7 = vpop.f32.mrf.mxu1 }
 0x3b5   : > { %v872_v9 = vmul.f32 %v5423_v7, %v868_v6 }
 0x3b6   : > { %v848_v10 = vpop.f32.mrf.mxu1 }
 0x3b7   : > { %876 = vst.msk [vmem:[#allocation3 + $0x8] sm:$0xff] %vm555_vm2, %v872_v9  ;;  %v871_v12 = vmul.f32 %v867_v8, %v848_v10 }
 0x3b8   : > { %v5426_v13 = vpop.f32.mrf.mxu1 }
 0x3b9   : > { %875 = vst.msk [vmem:[#allocation3] sm:$0xff] %vm555_vm2, %v871_v12  ;;  %v874_v15 = vmul.f32 %v5426_v13, %v870_v11 }
 0x3ba   : > { %v858_v16 = vpop.f32.mrf.mxu1 }
 0x3bb   : > { %878 = vst.msk [vmem:[#allocation3 + $0x18] sm:$0xff] %vm555_vm2, %v874_v15  ;;  %v873_v17 = vmul.f32 %v869_v14, %v858_v16 }
 0x3bc   : > { %v1135_v18 = vpop.f32.mrf.mxu1 }
 0x3bd   : > { %877 = vst.msk [vmem:[#allocation3 + $0x10] sm:$0xff] %vm555_vm2, %v873_v17  ;;  %1160 = vst [vmem:[#allocation4 + $0x58] sm:$0xff] %v1135_v18 }
 0x3be   : > { %v1137_v19 = vpop.f32.mrf.mxu1 }
 0x3bf   : > { %1161 = vst [vmem:[#allocation4 + $0x18] sm:$0xff] %v1137_v19 }
 0x3c0   : > { %v1141_v20 = vpop.f32.mrf.mxu1 }
 0x3c1   : > { %1164 = vst [vmem:[#allocation4 + $0x8] sm:$0xff] %v1141_v20 }
 0x3c2   : > { %v1143_v21 = vpop.f32.mrf.mxu1 }
 0x3c3   : > { %1165 = vst [vmem:[#allocation4 + $0x48] sm:$0xff] %v1143_v21 }
 0x3c4   : > { %v1147_v22 = vpop.f32.mrf.mxu1 }
 0x3c5   : > { %1168 = vst [vmem:[#allocation4 + $0x10] sm:$0xff] %v1147_v22 }
 0x3c6   : > { %v1149_v23 = vpop.f32.mrf.mxu1 }
 0x3c7   : > { %1169 = vst [vmem:[#allocation4 + $0x38] sm:$0xff] %v1149_v23 }
 0x3c8   : > { %v1153_v24 = vpop.f32.mrf.mxu1 }
 0x3c9   : > { %1172 = vst [vmem:[#allocation4 + $0x78] sm:$0xff] %v1153_v24 }
 0x3ca   : > { %v1155_v25 = vpop.f32.mrf.mxu1 }
 0x3cb   : > { %1173 = vst [vmem:[#allocation4 + $0x28] sm:$0xff] %v1155_v25 }
 0x3cc   : > { %v5441_v26 = vpop.f32.mrf.mxu1 }
 0x3cd   : > { %1360 = vst.msk [vmem:[#allocation6 + $0x8] sm:$0xff] %vm555_vm2, %v5441_v26 }
 0x3ce   : > { %v1340_v27 = vpop.f32.mrf.mxu1 }
 0x3cf   : > { %1359 = vst.msk [vmem:[#allocation6] sm:$0xff] %vm555_vm2, %v1340_v27 }
 0x3d0   : > { %v5444_v28 = vpop.f32.mrf.mxu1 }
 0x3d1   : > { %1362 = vst.msk [vmem:[#allocation6 + $0x18] sm:$0xff] %vm555_vm2, %v5444_v28 }
 0x3d2   : > { %v1350_v29 = vpop.f32.mrf.mxu1 }
 0x3d3   : > { %1361 = vst.msk [vmem:[#allocation6 + $0x10] sm:$0xff] %vm555_vm2, %v1350_v29 }
 0x3d4   : > { %v5457_v30 = vpop.f32.mrf.mxu1 }
 0x3d5   : > { %1540 = vst.msk [vmem:[#allocation8 + $0x8] sm:$0xff] %vm555_vm2, %v5457_v30 }
 0x3d6   : > { %v1520_v31 = vpop.f32.mrf.mxu1 }
 0x3d7   : > { %1539 = vst.msk [vmem:[#allocation8] sm:$0xff] %vm555_vm2, %v1520_v31 }
 0x3d8   : > { %v5460_v32 = vpop.f32.mrf.mxu1 }
 0x3d9   : > { %1542 = vst.msk [vmem:[#allocation8 + $0x18] sm:$0xff] %vm555_vm2, %v5460_v32 }
 0x3da   : > { %v1530_v33 = vpop.f32.mrf.mxu1 }
 0x3db   : > { %1541 = vst.msk [vmem:[#allocation8 + $0x10] sm:$0xff] %vm555_vm2, %v1530_v33 }
 0x3dc PF: > { %v6087_v34 = vld [vmem:[%s5870_s26 + $0x18] sm:$0xff]  ;;  %v6090_v35 = vld [vmem:[%s5870_s26 + $0x10] sm:$0xff]  ;;  %vm1555_vm3 = vcmask 261120   ;;  %v6093_v36 = vld [vmem:[#allocation3] sm:$0xff]  ;;  %vm2165_vm4 = vcmask 1043456   ;;  %v7546_v48 = vmov 0.0  }
 0x3dd   : > { %5461 = vmatprep.subr.mxu0 %v6087_v34  ;;  %v6097_v37 = vld [vmem:[%s5870_s26 + $0x8] sm:$0xff]  ;;  %5469 = vmatprep.mubr.msk.f32.mxu0 %vm1555_vm3, %v6093_v36  ;;  %v6106_v38 = vld [vmem:[%s5870_s26] sm:$0xff]  ;;  %v6112_v40 = vld [vmem:[#allocation2 + $0x18] sm:$0xff]  ;;  %vm2152_vm5 = vcmask 31744   ;;  %s5088_s24 = sshll.u32 %s5835_s28, 9  ;;  %s4792_s27 = sshll.u32 %s5872_s0, 4  ;;  %s7472_s27 = int_to_ptr.vmem [resolvable:$true] %s4792_s27 }
 0x3de   : > { %5462 = vmatpush3.msra.mxu0 %v6087_v34  ;;  %5483 = vmatprep.mubr.msk.f32.mxu1 %vm1555_vm3, %v6093_v36  ;;  %v6110_v39 = vld [vmem:[#allocation3 + $0x8] sm:$0xff]  ;;  %v6115_v41 = vld [vmem:[#allocation3 + $0x10] sm:$0xff]  ;;  %v6126_v43 = vld [vmem:[#allocation3 + $0x18] sm:$0xff]  ;;  %s7621_s23 = sld [smem:[#allocation45_spill]]  ;;  %s7622_s28 = sand.u32 1, %s5709_s25  }
 0x3df   : > { %5463 = vmatprep.subr.mxu0 %v6090_v35  ;;  %v6118_v42 = vld [vmem:[#allocation2 + $0x10] sm:$0xff]  ;;  %v6128_v44 = vld [vmem:[#allocation2 + $0x8] sm:$0xff]  ;;  %v1940_v45 = vld [vmem:[%s7529_s10] sm:$0xff]  ;;  %s5657_s2 = scalar_lea.vmem %s7472_s27, 512  ;;  %s5721_s21 = smov [#allocation9]  }
 0x3e0   : > { %5464 = vmatpush3.msra.mxu0 %v6090_v35  ;;  %v6135_v46 = vld [vmem:[#allocation2] sm:$0xff]  ;;  %v2150_v47 = vcombine.high %v1940_v45, %v1940_v45  ;;  %v4942_v49 = vld [vmem:[%s7529_s10 + $0x10] sm:$0xff]  ;;  %v4969_v51 = vld [vmem:[%s7530_s11 + $0xe8] sm:$0xff]  ;;  %p5658_p12 = scmp.ne.s32.totalorder %s7472_s27, %s5657_s2  ;;  %s5661_s30 = sshll.u32 %s5721_s21, 4  ;;  %s5662_s30 = int_to_ptr.vmem [resolvable:$false] %s5661_s30 }
 0x3e1   : > { %5465 = vmatprep.subr.mxu0 %v6097_v37  ;;  %v2357_v50 = vcombine.high %v4942_v49, %v4942_v49  ;;  %v4968_v53 = vld [vmem:[%s7530_s11 + $0xe0] sm:$0xff]  ;;  %v4965_v55 = vld [vmem:[%s7530_s11 + $0xc8] sm:$0xff]  ;;  %v1957_v11 = vld [vmem:[%s7530_s11 + $0x78] sm:$0xff]  ;;  %s5663_s18 = scalar_lea.vmem %s5662_s30, 1024  ;;  %p5664_p1 = scmp.lt.s32.totalorder %s7472_s27, %s5662_s30 }
 0x3e2   : > { %5466 = vmatpush3.msra.mxu0 %v6097_v37  ;;  %v4964_v56 = vld [vmem:[%s7530_s11 + $0xc0] sm:$0xff]  ;;  %v4961_v59 = vld [vmem:[%s7530_s11 + $0xa8] sm:$0xff]  ;;  %v1956_v12 = vld [vmem:[%s7530_s11 + $0x70] sm:$0xff]  ;;  %p5659_p13 = pnand %p5658_p12, %p5852_p5  ;;  %p5665_p2 = scmp.lt.s32.totalorder %s5663_s18, %s5657_s2 }
 0x3e3   : > { %5467 = vmatprep.subr.mxu0 %v6106_v38  ;;  %v4960_v60 = vld [vmem:[%s7530_s11 + $0xa0] sm:$0xff]  ;;  %v4957_v0 = vld [vmem:[%s7530_s11 + $0x88] sm:$0xff]  ;;  %v1953_v13 = vld [vmem:[%s7530_s11 + $0x58] sm:$0xff] }
 0x3e4   : > { %5468 = vmatpush3.msra.mxu0 %v6106_v38  ;;  %v4956_v2 = vld [vmem:[%s7530_s11 + $0x80] sm:$0xff]  ;;  %v1955_v3 = vld [vmem:[%s7530_s11 + $0x68] sm:$0xff]  ;;  %v1952_v14 = vld [vmem:[%s7530_s11 + $0x50] sm:$0xff]  ;;  %s7470_s29 = scalar_lea.hbm %s7621_s23, %s5088_s24  ;;  %p5660_p0 = pneg %p5659_p13 }
 0x3e5   : > { %5470 = vmatmul.mubr.msk.f32.vlgmr.msra.gmra.mxu0 %vm1555_vm3, %v6110_v39  ;;  %5489 = vmatprep.subr.mxu0 %v6112_v40  ;;  %v1954_v4 = vld [vmem:[%s7530_s11 + $0x60] sm:$0xff]  ;;  %v1951_v5 = vld [vmem:[%s7530_s11 + $0x48] sm:$0xff]  ;;  %v1949_v15 = vld [vmem:[%s7530_s11 + $0x38] sm:$0xff]  ;;  %p5666_p3 = por %p5665_p2, %p5664_p1 }
 0x3e6   : > { %5490 = vmatpush3.msra.mxu0 %v6112_v40  ;;  %5472 = vmatprep.mubr.msk.f32.mxu0 %vm1555_vm3, %v6115_v41  ;;  %v1950_v6 = vld [vmem:[%s7530_s11 + $0x40] sm:$0xff]  ;;  %v1947_v7 = vld [vmem:[%s7530_s11 + $0x28] sm:$0xff]  ;;  %v1948_v17 = vld [vmem:[%s7530_s11 + $0x30] sm:$0xff] }
 0x3e7   : > { %5491 = vmatprep.subr.mxu0 %v6118_v42  ;;  %v1946_v8 = vld [vmem:[%s7530_s11 + $0x20] sm:$0xff]  ;;  %v1943_v9 = vld [vmem:[%s7530_s11 + $0x8] sm:$0xff]  ;;  %v1945_v18 = vld [vmem:[%s7530_s11 + $0x18] sm:$0xff]  ;;  %p5667_p4 = pnand %p5666_p3, %p5660_p0 }
 0x3e8   : > { %5492 = vmatpush3.msra.mxu0 %v6118_v42  ;;  %v1942_v10 = vld [vmem:[%s7530_s11] sm:$0xff]  ;;  %v1941_v16 = vld [vmem:[%s7529_s10 + $0x8] sm:$0xff]  ;;  %v1944_v19 = vld [vmem:[%s7530_s11 + $0x10] sm:$0xff] }
 0x3e9   : > { %5473 = vmatmul.mubr.msk.f32.gmra.mxu0 %vm1555_vm3, %v6126_v43  ;;  %5493 = vmatprep.subr.mxu0 %v6128_v44  ;;  %v2151_v20 = vcombine.high %v1941_v16, %v1941_v16  ;;  %v4943_v21 = vld [vmem:[%s7529_s10 + $0x18] sm:$0xff]  ;;  %v4980_v24 = vld [vmem:[%s7529_s10 + $0x20] sm:$0xff]  ;;  %v4970_v25 = vld [vmem:[%s7530_s11 + $0xf0] sm:$0xff] }
 0x3ea   : > { %5494 = vmatpush3.msra.mxu0 %v6128_v44  ;;  %5497 = vmatprep.mubr.msk.f32.mxu0 %vm1555_vm3, %v6093_v36  ;;  %v2358_v22 = vcombine.high %v4943_v21, %v4943_v21  ;;  %v4971_v23 = vld [vmem:[%s7530_s11 + $0xf8] sm:$0xff]  ;;  %v2801_v26 = vcombine.high %v4980_v24, %v4980_v24  ;;  %v4966_v28 = vld [vmem:[%s7530_s11 + $0xd0] sm:$0xff]  ;;  %v4981_v31 = vld [vmem:[%s7529_s10 + $0x28] sm:$0xff] }
 0x3eb   : > { %5495 = vmatprep.subr.mxu0 %v6135_v46  ;;  %v4967_v27 = vld [vmem:[%s7530_s11 + $0xd8] sm:$0xff]  ;;  %v4962_v30 = vld [vmem:[%s7530_s11 + $0xb0] sm:$0xff] }
 0x3ec   : > { %5496 = vmatpush3.msra.mxu0 %v6135_v46  ;;  %v4963_v29 = vld [vmem:[%s7530_s11 + $0xb8] sm:$0xff]  ;;  %v4958_v33 = vld [vmem:[%s7530_s11 + $0x90] sm:$0xff] }
 0x3ed   : > { %5498 = vmatmul.mubr.msk.f32.vlgmr.msra.gmra.mxu0 %vm1555_vm3, %v6110_v39  ;;  %4930 = vmatprep.subr.msk.mxu0 %vm2165_vm4, %v2150_v47  ;;  %v4959_v32 = vld [vmem:[%s7530_s11 + $0x98] sm:$0xff] }
 0x3ee   : > { %5500 = vmatprep.mubr.msk.f32.mxu0 %vm1555_vm3, %v6115_v41  ;;  %4931 = vmatpush1.msk.msra.mxu0 %vm2165_vm4, %v1940_v45 }
 0x3ef   : > { %4944 = vmatprep.subr.msk.mxu0 %vm2165_vm4, %v2357_v50 }
 0x3f1   : > { %5501 = vmatmul.mubr.msk.f32.gmra.mxu0 %vm1555_vm3, %v6126_v43 }
 0x3f2   : > { %2238 = vmatprep.mubr.f32.mxu0 %v7546_v48 }
 0x3f5   : > { %4932 = vmatmul.mubr.msk.f32.vlgmr.msra.gmra.mxu0 %vm2152_vm5, %v6106_v38 }
 0x3f6   : > { %2244 = vmatprep.mubr.f32.mxu0 %v7546_v48  ;;  %4945 = vmatpush1.msk.msra.mxu0 %vm2165_vm4, %v4942_v49 }
 0x3f7   : > { %2626 = vmatprep.subr.mxu0 %v4969_v51 }
 0x3f9   : > { %4933 = vmatmul.mubr.msk.f32.gmra.mxu0 %vm2152_vm5, %v6097_v37 }
 0x3fa   : > { %2250 = vmatprep.mubr.f32.mxu0 %v7546_v48 }
 0x3fd   : > { %4934 = vmatmul.mubr.msk.f32.gmra.mxu0 %vm2152_vm5, %v6090_v35 }
 0x3fe   : > { %2256 = vmatprep.mubr.f32.mxu0 %v7546_v48 }
 0x401   : > { %4935 = vmatmul.mubr.msk.f32.gmra.mxu0 %vm2152_vm5, %v6087_v34 }
 0x402   : > { %2443 = vmatprep.mubr.f32.mxu0 %v7546_v48 }
 0x4a5   : > { %v6174_v52 = vpop.f32.mrf.mxu0 }
 0x4a6   : > { %7572 = vst [vmem:[#allocation18_spill] sm:$0xff] %v6174_v52 }
 0x4a7   : > { %v6179_v54 = vpop.f32.mrf.mxu0 }
 0x4a8   : > { %7573 = vst [vmem:[#allocation19_spill] sm:$0xff] %v6179_v54  ;;  %4946 = vmatmul.mubr.msk.f32.vlgmr.msra.gmra.mxu0 %vm2152_vm5, %v6179_v54 }
 0x4a9   : > { %v6189_v57 = vpop.f32.mrf.mxu0  ;;  %2449 = vmatprep.mubr.f32.mxu0 %v7546_v48  ;;  %2627 = vmatpush1.msra.mxu0 %v4968_v53 }
 0x4aa   : > { %7574 = vst [vmem:[#allocation20_spill] sm:$0xff] %v6189_v57  ;;  %5475 = vmatprep.subr.mxu1 %v6189_v57  ;;  %2628 = vmatprep.subr.mxu0 %v4965_v55  ;;  %v5006_v55 = vld [vmem:[%s7530_s11 + $0x160] sm:$0xff] }
 0x4ab   : > { %v6193_v58 = vpop.f32.mrf.mxu0  ;;  %5476 = vmatpush3.msra.mxu1 %v6189_v57  ;;  %2629 = vmatpush1.msra.mxu0 %v4964_v56  ;;  %v5008_v56 = vld [vmem:[%s7530_s11 + $0x170] sm:$0xff] }
 0x4ac   : > { %7575 = vst [vmem:[#allocation21_spill] sm:$0xff] %v6193_v58  ;;  %5477 = vmatprep.subr.mxu1 %v6193_v58  ;;  %4947 = vmatmul.mubr.msk.f32.gmra.mxu0 %vm2152_vm5, %v6174_v52 }
 0x4ad   : > { %5478 = vmatpush3.msra.mxu1 %v6193_v58  ;;  %v6206_v61 = vpop.f32.mrf.mxu0  ;;  %2455 = vmatprep.mubr.f32.mxu0 %v7546_v48 }
 0x4ae   : > { %5479 = vmatprep.subr.mxu1 %v6174_v52  ;;  %2630 = vmatprep.subr.mxu0 %v4961_v59  ;;  %v5005_v59 = vld [vmem:[%s7530_s11 + $0x158] sm:$0xff] }
 0x4af   : > { %5480 = vmatpush3.msra.mxu1 %v6174_v52  ;;  %v6211_v62 = vpop.f32.mrf.mxu0  ;;  %2631 = vmatpush1.msra.mxu0 %v4960_v60 }
 0x4b0   : > { %5481 = vmatprep.subr.mxu1 %v6179_v54  ;;  %4948 = vmatmul.mubr.msk.f32.gmra.mxu0 %vm2152_vm5, %v6193_v58 }
 0x4b1   : > { %5482 = vmatpush3.msra.mxu1 %v6179_v54  ;;  %v6217_v63 = vpop.f32.mrf.mxu0  ;;  %2461 = vmatprep.mubr.f32.mxu0 %v7546_v48 }
 0x4b2   : > { %5484 = vmatmul.mubr.msk.f32.vlgmr.msra.gmra.mxu1 %vm1555_vm3, %v6110_v39  ;;  %5503 = vmatprep.subr.mxu1 %v6217_v63 }
 0x4b3   : > { %v6226_v1 = vpop.f32.mrf.mxu0  ;;  %5504 = vmatpush3.msra.mxu1 %v6217_v63  ;;  %5486 = vmatprep.mubr.msk.f32.mxu1 %vm1555_vm3, %v6115_v41 }
 0x4b4   : > { %5505 = vmatprep.subr.mxu1 %v6226_v1  ;;  %4949 = vmatmul.mubr.msk.f32.gmra.mxu0 %vm2152_vm5, %v6189_v57 }
 0x4b5   : > { %5506 = vmatpush3.msra.mxu1 %v6226_v1  ;;  %2632 = vmatprep.subr.mxu0 %v4957_v0  ;;  %v6445_v60 = vpop.f32.mrf.mxu0  ;;  %v5002_v0 = vld [vmem:[%s7530_s11 + $0x140] sm:$0xff] }
 0x4b6   : > { %5487 = vmatmul.mubr.msk.f32.gmra.mxu1 %vm1555_vm3, %v6126_v43  ;;  %5507 = vmatprep.subr.mxu1 %v6206_v61 }
 0x4b7   : > { %5508 = vmatpush3.msra.mxu1 %v6206_v61  ;;  %2633 = vmatpush1.msra.mxu0 %v4956_v2 }
 0x4b8   : > { %2666 = vmatprep.mubr.f32.mxu0 %v7546_v48  ;;  %5509 = vmatprep.subr.mxu1 %v6211_v62 }
 0x4b9   : > { %4972 = vmatmul.mubr.msk.f32.vlgmr.msra.gmra.mxu0 %vm1555_vm3, %v6211_v62  ;;  %5510 = vmatpush3.msra.mxu1 %v6211_v62 }
 0x4ba   : > { %5511 = vmatprep.mubr.msk.f32.mxu1 %vm1555_vm3, %v6093_v36  ;;  %1994 = vmatprep.subr.mxu1 %v1955_v3  ;;  %v2802_v36 = vcombine.high %v4981_v31, %v4981_v31  ;;  %v5001_v3 = vld [vmem:[%s7530_s11 + $0x138] sm:$0xff] }
 0x4bb   : > { %5512 = vmatmul.mubr.msk.f32.vlgmr.msra.gmra.mxu1 %vm1555_vm3, %v6110_v39  ;;  %2672 = vmatprep.mubr.f32.mxu0 %v7546_v48  ;;  %v5007_v39 = vld [vmem:[%s7530_s11 + $0x168] sm:$0xff] }
 0x4bc   : > { %1995 = vmatpush1.msra.mxu1 %v1954_v4  ;;  %5514 = vmatprep.mubr.msk.f32.mxu1 %vm1555_vm3, %v6115_v41  ;;  %v5009_v41 = vld [vmem:[%s7530_s11 + $0x178] sm:$0xff]  ;;  %v6468_v4 = vpop.f32.mrf.mxu0 }
 0x4bd   : > { %1996 = vmatprep.subr.mxu1 %v1951_v5  ;;  %4973 = vmatmul.mubr.msk.f32.gmra.mxu0 %vm1555_vm3, %v6206_v61 }
 0x4be   : > { %1997 = vmatpush1.msra.mxu1 %v1950_v6  ;;  %2678 = vmatprep.mubr.f32.mxu0 %v7546_v48 }
 0x4bf   : > { %5515 = vmatmul.mubr.msk.f32.gmra.mxu1 %vm1555_vm3, %v6126_v43  ;;  %1998 = vmatprep.subr.mxu1 %v1947_v7 }
 0x4c0   : > { %1999 = vmatpush1.msra.mxu1 %v1946_v8  ;;  %2034 = vmatprep.mubr.f32.mxu1 %v7546_v48  ;;  %v4998_v8 = vld [vmem:[%s7530_s11 + $0x120] sm:$0xff] }
 0x4c1   : > { %2000 = vmatprep.subr.mxu1 %v1943_v9  ;;  %4974 = vmatmul.mubr.msk.f32.gmra.mxu0 %vm1555_vm3, %v6226_v1  ;;  %v5000_v9 = vld [vmem:[%s7530_s11 + $0x130] sm:$0xff] }
 0x4c2   : > { %2001 = vmatpush1.msra.mxu1 %v1942_v10  ;;  %2684 = vmatprep.mubr.f32.mxu0 %v7546_v48 }
 0x4c3   : > { %4922 = vmatmul.mubr.msk.f32.vlgmr.msra.gmra.mxu1 %vm1555_vm3, %v6135_v46  ;;  %2083 = vmatprep.subr.mxu1 %v1957_v11  ;;  %v4997_v11 = vld [vmem:[%s7530_s11 + $0x118] sm:$0xff] }
 0x4c4   : > { %2040 = vmatprep.mubr.f32.mxu1 %v7546_v48  ;;  %2084 = vmatpush1.msra.mxu1 %v1956_v12  ;;  %v6493_v12 = vpop.f32.mrf.mxu0 }
 0x4c5   : > { %4975 = vmatmul.mubr.msk.f32.gmra.mxu0 %vm1555_vm3, %v6217_v63  ;;  %2085 = vmatprep.subr.mxu1 %v1953_v13 }
 0x4c6   : > { %2086 = vmatpush1.msra.mxu1 %v1952_v14  ;;  %2887 = vmatprep.mubr.f32.mxu0 %v7546_v48 }
 0x4c7   : > { %4923 = vmatmul.mubr.msk.f32.gmra.mxu1 %vm1555_vm3, %v6128_v44  ;;  %2087 = vmatprep.subr.mxu1 %v1949_v15 }
 0x4c8   : > { %2046 = vmatprep.mubr.f32.mxu1 %v7546_v48  ;;  %2088 = vmatpush1.msra.mxu1 %v1948_v17  ;;  %v4996_v17 = vld [vmem:[%s7530_s11 + $0x110] sm:$0xff] }
 0x4c9   : > { %2089 = vmatprep.subr.mxu1 %v1945_v18  ;;  %4982 = vmatprep.subr.msk.mxu0 %vm2165_vm4, %v2801_v26 }
 0x4ca   : > { %2090 = vmatpush1.msra.mxu1 %v1944_v19  ;;  %4983 = vmatpush1.msk.msra.mxu0 %vm2165_vm4, %v4980_v24  ;;  %v3319_v19 = vld [vmem:[%s7526_s7 + $0x1f8] sm:$0xff] }
 0x4cb   : > { %4924 = vmatmul.mubr.msk.f32.gmra.mxu1 %vm1555_vm3, %v6118_v42  ;;  %4936 = vmatprep.subr.msk.mxu1 %vm2165_vm4, %v2151_v20  ;;  %v6519_v20 = vpop.f32.mrf.mxu0  ;;  %v3271_v24 = vld [vmem:[%s7526_s7 + $0x78] sm:$0xff] }
 0x4cc   : > { %2052 = vmatprep.mubr.f32.mxu1 %v7546_v48  ;;  %3070 = vmatprep.subr.mxu0 %v5007_v39 }
 0x4cf   : > { %4925 = vmatmul.mubr.msk.f32.gmra.mxu1 %vm1555_vm3, %v6112_v40 }
 0x4d0   : > { %2123 = vmatprep.mubr.f32.mxu1 %v7546_v48 }
 0x4d3   : > { %4926 = vmatmul.mubr.msk.f32.vlgmr.msra.gmra.mxu1 %vm1555_vm3, %v6135_v46 }
 0x4d4   : > { %2129 = vmatprep.mubr.f32.mxu1 %v7546_v48  ;;  %4937 = vmatpush1.msk.msra.mxu1 %vm2165_vm4, %v1941_v16  ;;  %v4994_v16 = vld [vmem:[%s7530_s11 + $0x100] sm:$0xff] }
 0x4d5   : > { %4950 = vmatprep.subr.msk.mxu1 %vm2165_vm4, %v2358_v22 }
 0x4d7   : > { %4927 = vmatmul.mubr.msk.f32.gmra.mxu1 %vm1555_vm3, %v6128_v44 }
 0x4d8   : > { %2135 = vmatprep.mubr.f32.mxu1 %v7546_v48 }
 0x4db   : > { %4928 = vmatmul.mubr.msk.f32.gmra.mxu1 %vm1555_vm3, %v6118_v42 }
 0x4dc   : > { %2141 = vmatprep.mubr.f32.mxu1 %v7546_v48 }
 0x4df   : > { %4929 = vmatmul.mubr.msk.f32.gmra.mxu1 %vm1555_vm3, %v6112_v40 }
 0x4e0   : > { %2327 = vmatprep.mubr.f32.mxu1 %v7546_v48 }
 0x4e3   : > { %4938 = vmatmul.mubr.msk.f32.vlgmr.msra.gmra.mxu1 %vm2152_vm5, %v6106_v38 }
 0x4e4   : > { %2333 = vmatprep.mubr.f32.mxu1 %v7546_v48  ;;  %4951 = vmatpush1.msk.msra.mxu1 %vm2165_vm4, %v4943_v21 }
 0x4e5   : > { %2715 = vmatprep.subr.mxu1 %v4971_v23 }
 0x4e7   : > { %4939 = vmatmul.mubr.msk.f32.gmra.mxu1 %vm2152_vm5, %v6097_v37 }
 0x4e8   : > { %2339 = vmatprep.mubr.f32.mxu1 %v7546_v48 }
 0x4eb   : > { %4940 = vmatmul.mubr.msk.f32.gmra.mxu1 %vm2152_vm5, %v6090_v35 }
 0x4ec   : > { %2345 = vmatprep.mubr.f32.mxu1 %v7546_v48 }
 0x4ef   : > { %4941 = vmatmul.mubr.msk.f32.gmra.mxu1 %vm2152_vm5, %v6087_v34 }
 0x4f0   : > { %2532 = vmatprep.mubr.f32.mxu1 %v7546_v48 }
 0x4f3   : > { %4952 = vmatmul.mubr.msk.f32.vlgmr.msra.gmra.mxu1 %vm2152_vm5, %v6179_v54 }
 0x4f4   : > { %2538 = vmatprep.mubr.f32.mxu1 %v7546_v48  ;;  %2716 = vmatpush1.msra.mxu1 %v4970_v25  ;;  %v3303_v25 = vld [vmem:[%s7526_s7 + $0x178] sm:$0xff] }
 0x4f5   : > { %2717 = vmatprep.subr.mxu1 %v4967_v27  ;;  %v3318_v27 = vld [vmem:[%s7526_s7 + $0x1f0] sm:$0xff] }
 0x4f6   : > { %2718 = vmatpush1.msra.mxu1 %v4966_v28  ;;  %v2252_v28 = vpop.f32.mrf.mxu0 }
 0x4f7   : > { %4953 = vmatmul.mubr.msk.f32.gmra.mxu1 %vm2152_vm5, %v6174_v52  ;;  %2719 = vmatprep.subr.mxu1 %v4963_v29 }
 0x4f8   : > { %2544 = vmatprep.mubr.f32.mxu1 %v7546_v48  ;;  %2720 = vmatpush1.msra.mxu1 %v4962_v30 }
 0x4f9   : > { %2721 = vmatprep.subr.mxu1 %v4959_v32 }
 0x4fa   : > { %2722 = vmatpush1.msra.mxu1 %v4958_v33  ;;  %v3270_v33 = vld [vmem:[%s7526_s7 + $0x70] sm:$0xff] }
 0x4fb   : > { %4954 = vmatmul.mubr.msk.f32.gmra.mxu1 %vm2152_vm5, %v6193_v58  ;;  %4988 = vmatprep.subr.msk.mxu1 %vm2165_vm4, %v2802_v36  ;;  %v3302_v36 = vld [vmem:[%s7526_s7 + $0x170] sm:$0xff] }
 0x4fc   : > { %2550 = vmatprep.mubr.f32.mxu1 %v7546_v48 }
 0x4ff   : > { %4955 = vmatmul.mubr.msk.f32.gmra.mxu1 %vm2152_vm5, %v6189_v57 }
 0x500   : > { %2755 = vmatprep.mubr.f32.mxu1 %v7546_v48 }
 0x503   : > { %4976 = vmatmul.mubr.msk.f32.vlgmr.msra.gmra.mxu1 %vm1555_vm3, %v6211_v62 }
 0x504   : > { %2761 = vmatprep.mubr.f32.mxu1 %v7546_v48  ;;  %4989 = vmatpush1.msk.msra.mxu1 %vm2165_vm4, %v4981_v31 }
 0x505   : > { %3159 = vmatprep.subr.mxu1 %v5009_v41  ;;  %v3317_v41 = vld [vmem:[%s7526_s7 + $0x1e8] sm:$0xff] }
 0x507   : > { %4977 = vmatmul.mubr.msk.f32.gmra.mxu1 %vm1555_vm3, %v6206_v61 }
 0x508   : > { %2767 = vmatprep.mubr.f32.mxu1 %v7546_v48 }
 0x50b   : > { %4978 = vmatmul.mubr.msk.f32.gmra.mxu1 %vm1555_vm3, %v6226_v1  ;;  %v5004_v1 = vld [vmem:[%s7530_s11 + $0x150] sm:$0xff] }
 0x50c   : > { %2773 = vmatprep.mubr.f32.mxu1 %v7546_v48 }
 0x50f   : > { %4979 = vmatmul.mubr.msk.f32.gmra.mxu1 %vm1555_vm3, %v6217_v63 }
 0x510   : > { %2976 = vmatprep.mubr.f32.mxu1 %v7546_v48 }
 0x572   : > { %v5485_v43 = vpop.f32.mrf.mxu1 }
 0x573   : > { %v1739_v50 = vmul.f32 2.0, %v5485_v43 }
 0x574   : > { %v1719_v45 = vpop.f32.mrf.mxu1 }
 0x575   : > { %v1738_v47 = vmul.f32 2.0, %v1719_v45  ;;  %v6448_v61 = vsub.f32 %v1739_v50, %v6097_v37  ;;  %v4999_v37 = vld [vmem:[%s7530_s11 + $0x128] sm:$0xff] }
 0x576   : > { %v5488_v49 = vpop.f32.mrf.mxu1  ;;  %v3301_v50 = vld [vmem:[%s7526_s7 + $0x168] sm:$0xff] }
 0x577   : > { %v6425_v51 = vsub.f32 %v1738_v47, %v6106_v38  ;;  %v5003_v38 = vld [vmem:[%s7530_s11 + $0x148] sm:$0xff]  ;;  %7577 = vst [vmem:[#allocation23_spill] sm:$0xff] %v6448_v61  ;;  %v1741_v5 = vmul.f32 2.0, %v5488_v49 }
 0x578   : > { %v1729_v53 = vpop.f32.mrf.mxu1  ;;  %v3269_v49 = vld [vmem:[%s7526_s7 + $0x68] sm:$0xff] }
 0x579   : > { %7576 = vst [vmem:[#allocation22_spill] sm:$0xff] %v6425_v51  ;;  %4984 = vmatmul.mubr.msk.f32.vlgmr.msra.gmra.mxu0 %vm2152_vm5, %v6425_v51  ;;  %4990 = vmatmul.mubr.msk.f32.vlgmr.msra.gmra.mxu1 %vm2152_vm5, %v6425_v51  ;;  %v1740_v62 = vmul.f32 2.0, %v1729_v53  ;;  %v6496_v13 = vsub.f32 %v1741_v5, %v6087_v34  ;;  %v3287_v34 = vld [vmem:[%s7526_s7 + $0xf8] sm:$0xff] }
 0x57a   : > { %2893 = vmatprep.mubr.f32.mxu0 %v7546_v48  ;;  %2982 = vmatprep.mubr.f32.mxu1 %v7546_v48 }
 0x57b   : > { %v5513_v63 = vpop.f32.mrf.mxu1  ;;  %3071 = vmatpush1.msra.mxu0 %v5006_v55  ;;  %3160 = vmatpush1.msra.mxu1 %v5008_v56  ;;  %v6471_v6 = vsub.f32 %v1740_v62, %v6090_v35  ;;  %v4995_v35 = vld [vmem:[%s7530_s11 + $0x108] sm:$0xff]  ;;  %7579 = vst [vmem:[#allocation25_spill] sm:$0xff] %v6496_v13  ;;  %v3316_v55 = vld [vmem:[%s7526_s7 + $0x1e0] sm:$0xff] }
 0x57c   : > { %3072 = vmatprep.subr.mxu0 %v5003_v38  ;;  %3161 = vmatprep.subr.mxu1 %v5005_v59  ;;  %v1933_v21 = vmul.f32 2.0, %v5513_v63  ;;  %v3268_v59 = vld [vmem:[%s7526_s7 + $0x60] sm:$0xff]  ;;  %v3283_v63 = vld [vmem:[%s7526_s7 + $0xd8] sm:$0xff] }
 0x57d   : > { %v1913_v2 = vpop.f32.mrf.mxu1  ;;  %4985 = vmatmul.mubr.msk.f32.gmra.mxu0 %vm2152_vm5, %v6448_v61  ;;  %4991 = vmatmul.mubr.msk.f32.gmra.mxu1 %vm2152_vm5, %v6448_v61  ;;  %7578 = vst [vmem:[#allocation24_spill] sm:$0xff] %v6471_v6  ;;  %v3300_v62 = vld [vmem:[%s7526_s7 + $0x160] sm:$0xff] }
 0x57e   : > { %2899 = vmatprep.mubr.f32.mxu0 %v7546_v48  ;;  %2988 = vmatprep.mubr.f32.mxu1 %v7546_v48  ;;  %v1932_v14 = vmul.f32 2.0, %v1913_v2  ;;  %v1937_v29 = vsub.f32 %v1933_v21, %v6128_v44  ;;  %v3285_v44 = vld [vmem:[%s7526_s7 + $0xe8] sm:$0xff]  ;;  %v3282_v21 = vld [vmem:[%s7526_s7 + $0xd0] sm:$0xff] }
 0x57f   : > { %v6473_v7 = vpop.f32.mrf.mxu1  ;;  %3073 = vmatpush1.msra.mxu0 %v5002_v0  ;;  %3162 = vmatpush1.msra.mxu1 %v5004_v1 }
 0x580   : > { %3074 = vmatprep.subr.mxu0 %v4999_v37  ;;  %3163 = vmatprep.subr.mxu1 %v5001_v3  ;;  %v1936_v22 = vsub.f32 %v1932_v14, %v6135_v46  ;;  %v3286_v46 = vld [vmem:[%s7526_s7 + $0xf0] sm:$0xff]  ;;  %v1935_v43 = vmul.f32 2.0, %v6473_v7 }
 0x581   : > { %v1923_v10 = vpop.f32.mrf.mxu1  ;;  %4986 = vmatmul.mubr.msk.f32.gmra.mxu0 %vm2152_vm5, %v6471_v6  ;;  %4992 = vmatmul.mubr.msk.f32.gmra.mxu1 %vm2152_vm5, %v6471_v6 }
 0x582   : > { %2905 = vmatprep.mubr.f32.mxu0 %v7546_v48  ;;  %2994 = vmatprep.mubr.f32.mxu1 %v7546_v48  ;;  %v1934_v30 = vmul.f32 2.0, %v1923_v10  ;;  %v1939_v56 = vsub.f32 %v1935_v43, %v6112_v40  ;;  %v3315_v40 = vld [vmem:[%s7526_s7 + $0x1d8] sm:$0xff] }
 0x583   : > { %v6498_v15 = vpop.f32.mrf.mxu1  ;;  %3075 = vmatpush1.msra.mxu0 %v4998_v8  ;;  %3164 = vmatpush1.msra.mxu1 %v5000_v9  ;;  %v3263_v43 = vld [vmem:[%s7526_s7 + $0x38] sm:$0xff] }
 0x584   : > { %3076 = vmatprep.subr.mxu0 %v4995_v35  ;;  %3165 = vmatprep.subr.mxu1 %v4997_v11  ;;  %v1938_v45 = vsub.f32 %v1934_v30, %v6118_v42  ;;  %v3284_v42 = vld [vmem:[%s7526_s7 + $0xe0] sm:$0xff] }
 0x585   : > { %v6506_v18 = vpop.f32.mrf.mxu1  ;;  %4987 = vmatmul.mubr.msk.f32.gmra.mxu0 %vm2152_vm5, %v6496_v13  ;;  %4993 = vmatmul.mubr.msk.f32.gmra.mxu1 %vm2152_vm5, %v6496_v13  ;;  %v3280_v30 = vld [vmem:[%s7526_s7 + $0xc0] sm:$0xff] }
 0x586   : > { %3077 = vmatpush1.msra.mxu0 %v4994_v16  ;;  %3110 = vmatprep.mubr.f32.mxu0 %v7546_v48 }
 0x587   : > { %v6522_v23 = vpop.f32.mrf.mxu1  ;;  %3166 = vmatpush1.msra.mxu1 %v4996_v17  ;;  %3199 = vmatprep.mubr.f32.mxu1 %v7546_v48 }
 0x588   : > { %5160 = vmatprep.subr.mxu0 %v3287_v34  ;;  %5204 = vmatprep.subr.mxu1 %v3319_v19  ;;  %v3267_v34 = vld [vmem:[%s7526_s7 + $0x58] sm:$0xff] }
 0x589   : > { %v6531_v26 = vpop.f32.mrf.mxu1  ;;  %5010 = vmatmul.mubr.msk.f32.vlgmr.msra.gmra.mxu0 %vm1555_vm3, %v1936_v22  ;;  %5014 = vmatmul.mubr.msk.f32.vlgmr.msra.gmra.mxu1 %vm1555_vm3, %v1936_v22  ;;  %v3299_v19 = vld [vmem:[%s7526_s7 + $0x158] sm:$0xff]  ;;  %v3314_v22 = vld [vmem:[%s7526_s7 + $0x1d0] sm:$0xff] }
 0x58a   : > { %3116 = vmatprep.mubr.f32.mxu0 %v7546_v48  ;;  %3205 = vmatprep.mubr.f32.mxu1 %v7546_v48 }
 0x58b   : > { %v2048_v31 = vpop.f32.mrf.mxu1  ;;  %5161 = vmatpush3.msra.mxu0 %v3271_v24  ;;  %5205 = vmatpush3.msra.mxu1 %v3303_v25  ;;  %v3266_v24 = vld [vmem:[%s7526_s7 + $0x50] sm:$0xff] }
 0x58c   : > { %v6544_v32 = vadd.f32 %v2252_v28, %v2048_v31  ;;  %5162 = vmatprep.subr.mxu0 %v3286_v46  ;;  %5206 = vmatprep.subr.mxu1 %v3318_v27  ;;  %v3298_v25 = vld [vmem:[%s7526_s7 + $0x150] sm:$0xff]  ;;  %v3281_v46 = vld [vmem:[%s7526_s7 + $0xc8] sm:$0xff]  ;;  %v3312_v31 = vld [vmem:[%s7526_s7 + $0x1c0] sm:$0xff] }
 0x58d   : > { %v6552_v39 = vpop.f32.mrf.mxu1  ;;  %5011 = vmatmul.mubr.msk.f32.gmra.mxu0 %vm1555_vm3, %v1937_v29  ;;  %5015 = vmatmul.mubr.msk.f32.gmra.mxu1 %vm1555_vm3, %v1937_v29  ;;  %v3313_v27 = vld [vmem:[%s7526_s7 + $0x1c8] sm:$0xff] }
 0x58e   : > { %3122 = vmatprep.mubr.f32.mxu0 %v7546_v48  ;;  %3211 = vmatprep.mubr.f32.mxu1 %v7546_v48  ;;  %v3265_v28 = vld [vmem:[%s7526_s7 + $0x48] sm:$0xff] }
 0x58f   : > { %v6566_v47 = vpop.f32.mrf.mxu1  ;;  %5163 = vmatpush3.msra.mxu0 %v3270_v33  ;;  %5207 = vmatpush3.msra.mxu1 %v3302_v36  ;;  %v3297_v29 = vld [vmem:[%s7526_s7 + $0x148] sm:$0xff]  ;;  %v3264_v33 = vld [vmem:[%s7526_s7 + $0x40] sm:$0xff] }
 0x590   : > { %5164 = vmatprep.subr.mxu0 %v3285_v44  ;;  %5208 = vmatprep.subr.mxu1 %v3317_v41  ;;  %v3296_v36 = vld [vmem:[%s7526_s7 + $0x140] sm:$0xff]  ;;  %v3279_v44 = vld [vmem:[%s7526_s7 + $0xb8] sm:$0xff] }
 0x591   : > { %v6574_v53 = vpop.f32.mrf.mxu1  ;;  %5012 = vmatmul.mubr.msk.f32.gmra.mxu0 %vm1555_vm3, %v1938_v45  ;;  %5016 = vmatmul.mubr.msk.f32.gmra.mxu1 %vm1555_vm3, %v1938_v45  ;;  %v3311_v41 = vld [vmem:[%s7526_s7 + $0x1b8] sm:$0xff] }
 0x592   : > { %3128 = vmatprep.mubr.f32.mxu0 %v7546_v48  ;;  %3217 = vmatprep.mubr.f32.mxu1 %v7546_v48  ;;  %v3295_v45 = vld [vmem:[%s7526_s7 + $0x138] sm:$0xff] }
 0x593   : > { %v6587_v38 = vpop.f32.mrf.mxu1  ;;  %5165 = vmatpush3.msra.mxu0 %v3269_v49  ;;  %5209 = vmatpush3.msra.mxu1 %v3301_v50  ;;  %v3278_v49 = vld [vmem:[%s7526_s7 + $0xb0] sm:$0xff] }
 0x594   : > { %5166 = vmatprep.subr.mxu0 %v3284_v42  ;;  %5210 = vmatprep.subr.mxu1 %v3316_v55  ;;  %v3310_v50 = vld [vmem:[%s7526_s7 + $0x1b0] sm:$0xff] }
 0x595   : > { %v6601_v0 = vpop.f32.mrf.mxu1  ;;  %5013 = vmatmul.mubr.msk.f32.gmra.mxu0 %vm1555_vm3, %v1939_v56  ;;  %5017 = vmatmul.mubr.msk.f32.gmra.mxu1 %vm1555_vm3, %v1939_v56  ;;  %v3262_v42 = vld [vmem:[%s7526_s7 + $0x30] sm:$0xff]  ;;  %v3277_v56 = vld [vmem:[%s7526_s7 + $0xa8] sm:$0xff] }
 0x596   : > { %5167 = vmatpush3.msra.mxu0 %v3268_v59  ;;  %5211 = vmatpush3.msra.mxu1 %v3300_v62  ;;  %v3294_v55 = vld [vmem:[%s7526_s7 + $0x130] sm:$0xff]  ;;  %v3309_v59 = vld [vmem:[%s7526_s7 + $0x1a8] sm:$0xff] }
 0x597   : > { %v6605_v1 = vpop.f32.mrf.mxu1  ;;  %5168 = vmatprep.subr.mxu0 %v3283_v63  ;;  %5212 = vmatprep.subr.mxu1 %v3315_v40  ;;  %v3261_v62 = vld [vmem:[%s7526_s7 + $0x28] sm:$0xff]  ;;  %v3276_v40 = vld [vmem:[%s7526_s7 + $0xa0] sm:$0xff] }
 0x598   : > { %5169 = vmatpush3.msra.mxu0 %v3267_v34  ;;  %5213 = vmatpush3.msra.mxu1 %v3299_v19  ;;  %v3293_v63 = vld [vmem:[%s7526_s7 + $0x128] sm:$0xff]  ;;  %v3292_v34 = vld [vmem:[%s7526_s7 + $0x120] sm:$0xff]  ;;  %v3275_v19 = vld [vmem:[%s7526_s7 + $0x98] sm:$0xff] }
 0x599   : > { %v6607_v2 = vpop.f32.mrf.mxu1  ;;  %5170 = vmatprep.subr.mxu0 %v3282_v21  ;;  %5214 = vmatprep.subr.mxu1 %v3314_v22  ;;  %v3307_v21 = vld [vmem:[%s7526_s7 + $0x198] sm:$0xff] }
 0x59a   : > { %5171 = vmatpush3.msra.mxu0 %v3266_v24  ;;  %5215 = vmatpush3.msra.mxu1 %v3298_v25  ;;  %v3259_v22 = vld [vmem:[%s7526_s7 + $0x18] sm:$0xff]  ;;  %v3274_v25 = vld [vmem:[%s7526_s7 + $0x90] sm:$0xff] }
 0x59b   : > { %v6609_v37 = vpop.f32.mrf.mxu1  ;;  %5172 = vmatprep.subr.mxu0 %v3281_v46  ;;  %5216 = vmatprep.subr.mxu1 %v3313_v27  ;;  %v3291_v24 = vld [vmem:[%s7526_s7 + $0x118] sm:$0xff]  ;;  %v3306_v46 = vld [vmem:[%s7526_s7 + $0x190] sm:$0xff] }
 0x59c   : > { %5173 = vmatpush3.msra.mxu0 %v3265_v28  ;;  %5217 = vmatpush3.msra.mxu1 %v3297_v29  ;;  %v3258_v27 = vld [vmem:[%s7526_s7 + $0x10] sm:$0xff]  ;;  %v3273_v29 = vld [vmem:[%s7526_s7 + $0x88] sm:$0xff] }
 0x59d   : > { %v6611_v3 = vpop.f32.mrf.mxu1  ;;  %5174 = vmatprep.subr.mxu0 %v3280_v30  ;;  %5218 = vmatprep.subr.mxu1 %v3312_v31  ;;  %v3290_v28 = vld [vmem:[%s7526_s7 + $0x110] sm:$0xff]  ;;  %v3305_v30 = vld [vmem:[%s7526_s7 + $0x188] sm:$0xff] }
 0x59e   : > { %5175 = vmatpush3.msra.mxu0 %v3264_v33  ;;  %5219 = vmatpush3.msra.mxu1 %v3296_v36  ;;  %v3257_v31 = vld [vmem:[%s7526_s7 + $0x8] sm:$0xff]  ;;  %v3272_v36 = vld [vmem:[%s7526_s7 + $0x80] sm:$0xff] }
 0x59f   : > { %v2143_v5 = vpop.f32.mrf.mxu1  ;;  %5176 = vmatprep.subr.mxu0 %v3279_v44  ;;  %5220 = vmatprep.subr.mxu1 %v3311_v41  ;;  %v3289_v33 = vld [vmem:[%s7526_s7 + $0x108] sm:$0xff]  ;;  %v3304_v44 = vld [vmem:[%s7526_s7 + $0x180] sm:$0xff] }
 0x5a0   : > { %5177 = vmatpush3.msra.mxu0 %v3263_v43  ;;  %5221 = vmatpush3.msra.mxu1 %v3295_v45  ;;  %v3256_v41 = vld [vmem:[%s7526_s7] sm:$0xff]  ;;  %v3549_v45 = vld [vmem:[%s7527_s8 + $0xf8] sm:$0xff] }
 0x5a1   : > { %v6613_v7 = vpop.f32.mrf.mxu1  ;;  %5178 = vmatprep.subr.mxu0 %v3278_v49  ;;  %5222 = vmatprep.subr.mxu1 %v3310_v50  ;;  %v3288_v43 = vld [vmem:[%s7526_s7 + $0x100] sm:$0xff]  ;;  %v3581_v49 = vld [vmem:[%s7527_s8 + $0x1f8] sm:$0xff]  ;;  %v2254_v50 = vpop.f32.mrf.mxu0 }
 0x5a2   : > { %5179 = vmatpush3.msra.mxu0 %v3262_v42  ;;  %5223 = vmatpush3.msra.mxu1 %v3294_v55 }
 0x5a3   : > { %v6615_v8 = vpop.f32.mrf.mxu1  ;;  %5180 = vmatprep.subr.mxu0 %v3277_v56  ;;  %5224 = vmatprep.subr.mxu1 %v3309_v59  ;;  %v6773_v42 = vpop.f32.mrf.mxu0 }
 0x5a4   : > { %5181 = vmatpush3.msra.mxu0 %v3261_v62  ;;  %5225 = vmatpush3.msra.mxu1 %v3293_v63 }
 0x5a5   : > { %v6617_v9 = vpop.f32.mrf.mxu1  ;;  %5182 = vmatprep.subr.mxu0 %v3276_v40  ;;  %v6775_v55 = vpop.f32.mrf.mxu0 }
 0x5a7   : > { %v6619_v10 = vpop.f32.mrf.mxu1  ;;  %v2445_v59 = vpop.f32.mrf.mxu0 }
 0x5a9   : > { %v6621_v35 = vpop.f32.mrf.mxu1  ;;  %v2447_v63 = vpop.f32.mrf.mxu0 }
 0x5ab   : > { %v6623_v11 = vpop.f32.mrf.mxu1 }
 0x5ad   : > { %v6625_v14 = vpop.f32.mrf.mxu1 }
 0x5af   : > { %v2347_v16 = vpop.f32.mrf.mxu1 }
 0x5b0   : > { %v6627_v17 = vadd.f32 %v2347_v16, %v2143_v5  ;;  %v3308_v5 = vld [vmem:[%s7526_s7 + $0x1a0] sm:$0xff] }
 0x5b1   : > { %5226 = vmatprep.subr.mxu1 %v3308_v5  ;;  %v3260_v16 = vld [vmem:[%s7526_s7 + $0x20] sm:$0xff]  ;;  %v6777_v56 = vpop.f32.mrf.mxu1  ;;  %v2451_v5 = vpop.f32.mrf.mxu0 }
 0x5b2   : > { %7580 = vst [vmem:[#allocation26_spill] sm:$0xff] %v6627_v17  ;;  %5183 = vmatpush3.msra.mxu0 %v3260_v16  ;;  %5227 = vmatpush3.msra.mxu1 %v3292_v34  ;;  %7581 = vst [vmem:[#allocation27_spill] sm:$0xff] %v6777_v56 }
 0x5b3   : > { %5184 = vmatprep.subr.mxu0 %v3275_v19  ;;  %5228 = vmatprep.subr.mxu1 %v3307_v21  ;;  %v2534_v62 = vpop.f32.mrf.mxu1  ;;  %v2453_v34 = vpop.f32.mrf.mxu0 }
 0x5b4   : > { %5185 = vmatpush3.msra.mxu0 %v3259_v22  ;;  %5229 = vmatpush3.msra.mxu1 %v3291_v24 }
 0x5b5   : > { %5186 = vmatprep.subr.mxu0 %v3274_v25  ;;  %5230 = vmatprep.subr.mxu1 %v3306_v46  ;;  %v2536_v40 = vpop.f32.mrf.mxu1  ;;  %v2457_v21 = vpop.f32.mrf.mxu0 }
 0x5b6   : > { %5187 = vmatpush3.msra.mxu0 %v3258_v27  ;;  %5231 = vmatpush3.msra.mxu1 %v3290_v28 }
 0x5b7   : > { %5188 = vmatprep.subr.mxu0 %v3273_v29  ;;  %5232 = vmatprep.subr.mxu1 %v3305_v30  ;;  %v6779_v16 = vpop.f32.mrf.mxu1  ;;  %v2459_v24 = vpop.f32.mrf.mxu0 }
 0x5b8   : > { %5189 = vmatpush3.msra.mxu0 %v3257_v31  ;;  %5233 = vmatpush3.msra.mxu1 %v3289_v33 }
 0x5b9   : > { %5190 = vmatprep.subr.mxu0 %v3272_v36  ;;  %5234 = vmatprep.subr.mxu1 %v3304_v44  ;;  %v6781_v19 = vpop.f32.mrf.mxu1  ;;  %v6787_v46 = vpop.f32.mrf.mxu0 }
 0x5ba   : > { %5191 = vmatpush3.msra.mxu0 %v3256_v41  ;;  %5235 = vmatpush3.msra.mxu1 %v3288_v43 }
 0x5bb   : > { %5248 = vmatprep.subr.mxu0 %v3549_v45  ;;  %5292 = vmatprep.subr.mxu1 %v3581_v49  ;;  %v6783_v22 = vpop.f32.mrf.mxu1  ;;  %v6791_v28 = vpop.f32.mrf.mxu0 }
 0x5bc   : > { %7582 = vst [vmem:[#allocation28_spill] sm:$0xff] %v6783_v22 }
 0x5bd   : > { %v6785_v25 = vpop.f32.mrf.mxu1  ;;  %v2668_v30 = vpop.f32.mrf.mxu0 }
 0x5be   : > { %7583 = vst [vmem:[#allocation29_spill] sm:$0xff] %v6785_v25 }
 0x5bf   : > { %v6789_v27 = vpop.f32.mrf.mxu1  ;;  %v2670_v33 = vpop.f32.mrf.mxu0 }
 0x5c0   : > { %7584 = vst [vmem:[#allocation30_spill] sm:$0xff] %v6789_v27 }
 0x5c1   : > { %v6793_v29 = vpop.f32.mrf.mxu1  ;;  %v2674_v44 = vpop.f32.mrf.mxu0 }
 0x5c2   : > { %7585 = vst [vmem:[#allocation31_spill] sm:$0xff] %v6793_v29 }
 0x5c3   : > { %v2757_v31 = vpop.f32.mrf.mxu1  ;;  %v2676_v43 = vpop.f32.mrf.mxu0 }
 0x5c5   : > { %v2759_v36 = vpop.f32.mrf.mxu1  ;;  %v2680_v49 = vpop.f32.mrf.mxu0 }
 0x5c7   : > { %v6795_v41 = vpop.f32.mrf.mxu1  ;;  %v6801_v13 = vpop.f32.mrf.mxu0 }
 0x5c9   : > { %v6797_v45 = vpop.f32.mrf.mxu1  ;;  %v6805_v61 = vpop.f32.mrf.mxu0 }
 0x5ca   : > { %7588 = vst [vmem:[#allocation34_spill] sm:$0xff] %v6805_v61  ;;  %v2243_v61 = vadd.f32 %v6468_v4, %v6506_v18 }
 0x5cb   : > { %v6799_v48 = vpop.f32.mrf.mxu1  ;;  %v6809_v57 = vpop.f32.mrf.mxu0 }
 0x5cc   : > { %7586 = vst [vmem:[#allocation32_spill] sm:$0xff] %v6799_v48  ;;  %7590 = vst [vmem:[#allocation36_spill] sm:$0xff] %v6809_v57  ;;  %v2241_v48 = vadd.f32 %v6445_v60, %v6498_v15  ;;  %v2247_v57 = vadd.f32 %v6493_v12, %v6522_v23  ;;  %v2332_v60 = vadd.f32 %v6617_v9, %v6601_v0 }
 0x5cd   : > { %v6803_v6 = vpop.f32.mrf.mxu1  ;;  %v2558_v4 = vadd.f32 %v2447_v63, %v2243_v61  ;;  %v2259_v61 = vadd.f32 %v6773_v42, %v6566_v47 }
 0x5ce   : > { %7587 = vst [vmem:[#allocation33_spill] sm:$0xff] %v6803_v6  ;;  %v2557_v15 = vadd.f32 %v2445_v59, %v2241_v48  ;;  %v2561_v12 = vadd.f32 %v2451_v5, %v2247_v57  ;;  %v2560_v48 = vadd.f32 %v2536_v40, %v2332_v60  ;;  %v2336_v57 = vadd.f32 %v6619_v10, %v6605_v1 }
 0x5cf   : > { %v6807_v51 = vpop.f32.mrf.mxu1 }
 0x5d0   : > { %7589 = vst [vmem:[#allocation35_spill] sm:$0xff] %v6807_v51  ;;  %v2784_v59 = vadd.f32 %v2674_v44, %v2561_v12 }
 0x5d1   : > { %v6811_v58 = vpop.f32.mrf.mxu1 }
 0x5d2   : > { %7591 = vst [vmem:[#allocation37_spill] sm:$0xff] %v6811_v58  ;;  %v2249_v58 = vadd.f32 %v6519_v20, %v6531_v26  ;;  %v2565_v20 = vadd.f32 %v2457_v21, %v6544_v32  ;;  %v2255_v26 = vadd.f32 %v2254_v50, %v6552_v39  ;;  %v2783_v50 = vadd.f32 %v2759_v36, %v2560_v48  ;;  %v1746_v36 = vld [vmem:[#allocation4 + $0x30] sm:$0xff] }
 0x5d3   : > { %v6859_v21 = vadd.f32 %v6787_v46, %v2259_v61  ;;  %v2342_v46 = vadd.f32 %v6623_v11, %v6609_v37 }
 0x5d4   : > { %v2562_v23 = vadd.f32 %v2453_v34, %v2249_v58  ;;  %v2780_v58 = vadd.f32 %v2668_v30, %v2557_v15  ;;  %v2566_v5 = vadd.f32 %v2459_v24, %v2255_v26  ;;  %v2563_v24 = vadd.f32 %v6779_v16, %v2336_v57  ;;  %v1748_v16 = vld [vmem:[#allocation4 + $0x58] sm:$0xff]  ;;  %v1753_v26 = vld [vmem:[#allocation4 + $0x48] sm:$0xff] }
 0x5d5   : > { %v3565_v57 = vld [vmem:[%s7527_s8 + $0x178] sm:$0xff] }
 0x5d6   : > { %v2785_v63 = vadd.f32 %v2676_v43, %v2562_v23 }
 0x639   : > { %v2889_v52 = vpop.f32.mrf.mxu0  ;;  %v2978_v54 = vpop.f32.mrf.mxu1 }
 0x63b   : > { %v2891_v27 = vpop.f32.mrf.mxu0  ;;  %v2980_v17 = vpop.f32.mrf.mxu1 }
 0x63c   : > { %v3004_v34 = vadd.f32 %v2980_v17, %v2783_v50 }
 0x63d   : > { %v6813_v29 = vpop.f32.mrf.mxu0  ;;  %v6815_v22 = vpop.f32.mrf.mxu1 }
 0x63e   : > { %7592 = vst [vmem:[#allocation38_spill] sm:$0xff] %v6813_v29  ;;  %7593 = vst [vmem:[#allocation39_spill] sm:$0xff] %v6815_v22  ;;  %v2330_v22 = vadd.f32 %v6615_v8, %v6587_v38  ;;  %v2338_v38 = vadd.f32 %v6621_v35, %v6607_v2  ;;  %v2781_v8 = vadd.f32 %v2670_v33, %v2558_v4  ;;  %v7596_v4 = vld [vmem:[#allocation27_spill] sm:$0xff] }
 0x63f   : > { %v2897_v6 = vpop.f32.mrf.mxu0  ;;  %v2986_v51 = vpop.f32.mrf.mxu1  ;;  %v2261_v2 = vadd.f32 %v6775_v55, %v6574_v53  ;;  %v3001_v35 = vadd.f32 %v2889_v52, %v2780_v58  ;;  %v1747_v53 = vld [vmem:[#allocation4] sm:$0xff]  ;;  %v1749_v55 = vld [vmem:[#allocation4 + $0x18] sm:$0xff]  ;;  %v2350_v12 = vadd.f32 %v7596_v4, %v6613_v7  ;;  %v7600_v58 = vld [vmem:[#allocation28_spill] sm:$0xff] }
 0x640   : > { %v2559_v0 = vadd.f32 %v2534_v62, %v2330_v22  ;;  %v6855_v62 = vadd.f32 %v2680_v49, %v2565_v20  ;;  %v2564_v1 = vadd.f32 %v6781_v19, %v2338_v38  ;;  %v3002_v40 = vadd.f32 %v2891_v27, %v2781_v8  ;;  %v3533_v7 = vld [vmem:[%s7527_s8 + $0x78] sm:$0xff] }
 0x641   : > { %v6825_v25 = vpop.f32.mrf.mxu0  ;;  %v6827_v56 = vpop.f32.mrf.mxu1  ;;  %v2344_v22 = vadd.f32 %v6625_v14, %v6611_v3  ;;  %v2570_v17 = vadd.f32 %v6791_v28, %v2261_v2  ;;  %v2786_v3 = vadd.f32 %v6795_v41, %v2563_v24  ;;  %v2789_v14 = vadd.f32 %v6801_v13, %v2566_v5  ;;  %v7597_v28 = vld [vmem:[#allocation29_spill] sm:$0xff]  ;;  %v1751_v41 = vld [vmem:[#allocation4 + $0x68] sm:$0xff]  ;;  %v3548_v2 = vld [vmem:[%s7527_s8 + $0xf0] sm:$0xff] }
 0x642   : > { %7594 = vst [vmem:[#allocation40_spill] sm:$0xff] %v6825_v25  ;;  %7595 = vst [vmem:[#allocation41_spill] sm:$0xff] %v6827_v56  ;;  %v2782_v9 = vadd.f32 %v2757_v31, %v2559_v0  ;;  %v2787_v33 = vadd.f32 %v6797_v45, %v2564_v1  ;;  %v3006_v49 = vadd.f32 %v2897_v6, %v2785_v63 }
 0x643   : > { %v6833_v18 = vpop.f32.mrf.mxu0  ;;  %v6835_v29 = vpop.f32.mrf.mxu1  ;;  %v2568_v23 = vadd.f32 %v7597_v28, %v2344_v22  ;;  %v2567_v8 = vadd.f32 %v7600_v58, %v2342_v46 }
 0x644   : > { %v3003_v10 = vadd.f32 %v2978_v54, %v2782_v9  ;;  %v3008_v60 = vadd.f32 %v2986_v51, %v2787_v33  ;;  %v7601_v9 = vld [vmem:[#allocation33_spill] sm:$0xff] }
 0x645   : > { %v6839_v25 = vpop.f32.mrf.mxu0  ;;  %v6841_v56 = vpop.f32.mrf.mxu1  ;;  %v7598_v20 = vld [vmem:[#allocation38_spill] sm:$0xff]  ;;  %v7599_v0 = vld [vmem:[#allocation39_spill] sm:$0xff]  ;;  %v2791_v50 = vadd.f32 %v7601_v9, %v2568_v23 }
 0x646   : > { %v3005_v37 = vadd.f32 %v7598_v20, %v2784_v59  ;;  %v3007_v6 = vadd.f32 %v7599_v0, %v2786_v3  ;;  %v3010_v59 = vadd.f32 %v6833_v18, %v2789_v14  ;;  %v3532_v18 = vld [vmem:[%s7527_s8 + $0x70] sm:$0xff]  ;;  %v7607_v14 = vld [vmem:[#allocation37_spill] sm:$0xff]  ;;  %v7610_v9 = vld [vmem:[#allocation34_spill] sm:$0xff] }
 0x647   : > { %v6849_v32 = vpop.f32.mrf.mxu0  ;;  %v6851_v39 = vpop.f32.mrf.mxu1  ;;  %v3012_v24 = vadd.f32 %v6835_v29, %v2791_v50  ;;  %v3547_v29 = vld [vmem:[%s7527_s8 + $0xe8] sm:$0xff]  ;;  %v2792_v50 = vadd.f32 %v7610_v9, %v6859_v21  ;;  %v3521_v9 = vld [vmem:[%s7527_s8 + $0x18] sm:$0xff] }
 0x649   : > { %v3112_v47 = vpop.f32.mrf.mxu0  ;;  %v3201_v42 = vpop.f32.mrf.mxu1  ;;  %v7609_v23 = vld [vmem:[#allocation41_spill] sm:$0xff]  ;;  %v3013_v21 = vadd.f32 %v6839_v25, %v2792_v50 }
 0x64a   : > { %v3224_v30 = vadd.f32 %v3112_v47, %v3001_v35  ;;  %v3226_v19 = vadd.f32 %v3201_v42, %v3003_v10  ;;  %v3580_v35 = vld [vmem:[%s7527_s8 + $0x1f0] sm:$0xff]  ;;  %v3561_v25 = vld [vmem:[%s7527_s8 + $0x158] sm:$0xff] }
 0x64b   : > { %v3114_v52 = vpop.f32.mrf.mxu0  ;;  %v3203_v31 = vpop.f32.mrf.mxu1  ;;  %v3553_v50 = vld [vmem:[%s7527_s8 + $0x118] sm:$0xff] }
 0x64c   : > { %v3225_v54 = vadd.f32 %v3114_v52, %v3002_v40  ;;  %v3227_v27 = vadd.f32 %v3203_v31, %v3004_v34  ;;  %v6878_v11 = vmul.f32 %v3224_v30, %v1746_v36  ;;  %v6881_v51 = vmul.f32 %v3226_v19, %v1748_v16  ;;  %v3564_v40 = vld [vmem:[%s7527_s8 + $0x170] sm:$0xff]  ;;  %v7602_v34 = vld [vmem:[#allocation31_spill] sm:$0xff]  ;;  %v7604_v36 = vld [vmem:[#allocation26_spill] sm:$0xff] }
 0x64d   : > { %v3118_v44 = vpop.f32.mrf.mxu0  ;;  %v3207_v43 = vpop.f32.mrf.mxu1  ;;  %v2572_v22 = vadd.f32 %v7602_v34, %v2350_v12  ;;  %v7603_v30 = vld [vmem:[#allocation36_spill] sm:$0xff]  ;;  %v7605_v19 = vld [vmem:[#allocation30_spill] sm:$0xff]  ;;  %v1761_v34 = vld [vmem:[#allocation4 + $0x28] sm:$0xff] }
 0x64e   : > { %v6870_v15 = vmul.f32 %v3225_v54, %v1747_v53  ;;  %v6872_v45 = vmul.f32 %v3227_v27, %v1749_v55  ;;  %v3228_v47 = vadd.f32 %v3118_v44, %v3005_v37  ;;  %v3230_v42 = vadd.f32 %v3207_v43, %v3007_v6  ;;  %v1750_v52 = vld [vmem:[#allocation4 + $0x50] sm:$0xff]  ;;  %v1752_v55 = vld [vmem:[#allocation4 + $0x8] sm:$0xff]  ;;  %v3546_v6 = vld [vmem:[%s7527_s8 + $0xe0] sm:$0xff] }
 0x64f   : > { %v3120_v13 = vpop.f32.mrf.mxu0  ;;  %v3209_v38 = vpop.f32.mrf.mxu1  ;;  %v2793_v53 = vadd.f32 %v7603_v30, %v2570_v17  ;;  %v2571_v54 = vadd.f32 %v7605_v19, %v7604_v36  ;;  %v7606_v27 = vld [vmem:[#allocation32_spill] sm:$0xff]  ;;  %v3579_v17 = vld [vmem:[%s7527_s8 + $0x1e8] sm:$0xff]  ;;  %v2795_v16 = vadd.f32 %v7607_v14, %v2572_v22 }
 0x650   : > { %v3229_v48 = vadd.f32 %v3120_v13, %v3006_v49  ;;  %v3231_v61 = vadd.f32 %v3209_v38, %v3008_v60  ;;  %3388 = vmatprep.mubr.f32.mxu0 %v6870_v15  ;;  %3473 = vmatprep.mubr.f32.mxu1 %v6872_v45  ;;  %v2790_v46 = vadd.f32 %v7606_v27, %v2567_v8  ;;  %v7608_v44 = vld [vmem:[#allocation40_spill] sm:$0xff]  ;;  %v1755_v49 = vld [vmem:[#allocation4 + $0x20] sm:$0xff]  ;;  %v1757_v60 = vld [vmem:[#allocation4 + $0x38] sm:$0xff] }
 0x651   : > { %v3124_v63 = vpop.f32.mrf.mxu0  ;;  %v3213_v5 = vpop.f32.mrf.mxu1  ;;  %3389 = vmatmul.mubr.f32.vlgmr.msra.gmra.mxu0 %v6878_v11  ;;  %3474 = vmatmul.mubr.f32.vlgmr.msra.gmra.mxu1 %v6881_v51  ;;  %v3009_v43 = vadd.f32 %v7608_v44, %v6855_v62  ;;  %v6928_v37 = vmul.f32 %v3228_v47, %v1750_v52  ;;  %v3531_v62 = vld [vmem:[%s7527_s8 + $0x68] sm:$0xff]  ;;  %v3016_v38 = vadd.f32 %v6851_v39, %v2795_v16  ;;  %v3562_v39 = vld [vmem:[%s7527_s8 + $0x160] sm:$0xff]  ;;  %v3528_v19 = vld [vmem:[%s7527_s8 + $0x50] sm:$0xff] }
 0x652   : > { %v6901_v1 = vmul.f32 %v3229_v48, %v1751_v41  ;;  %v6903_v10 = vmul.f32 %v3231_v61, %v1753_v26  ;;  %5249 = vmatpush3.msra.mxu0 %v3533_v7  ;;  %5293 = vmatpush3.msra.mxu1 %v3565_v57  ;;  %v3011_v20 = vadd.f32 %v7609_v23, %v2790_v46  ;;  %v3563_v13 = vld [vmem:[%s7527_s8 + $0x168] sm:$0xff]  ;;  %v3578_v48 = vld [vmem:[%s7527_s8 + $0x1e0] sm:$0xff]  ;;  %v1760_v46 = vld [vmem:[#allocation4 + $0x78] sm:$0xff] }
 0x653   : > { %v3126_v31 = vpop.f32.mrf.mxu0  ;;  %v3215_v33 = vpop.f32.mrf.mxu1  ;;  %5250 = vmatprep.subr.mxu0 %v3548_v2  ;;  %5294 = vmatprep.subr.mxu1 %v3580_v35  ;;  %v6930_v41 = vmul.f32 %v3230_v42, %v1752_v55  ;;  %v3014_v26 = vadd.f32 %v6849_v32, %v2793_v53  ;;  %v3232_v0 = vadd.f32 %v3124_v63, %v3009_v43  ;;  %v3530_v32 = vld [vmem:[%s7527_s8 + $0x60] sm:$0xff]  ;;  %v1756_v63 = vld [vmem:[#allocation4 + $0x10] sm:$0xff]  ;;  %v3545_v42 = vld [vmem:[%s7527_s8 + $0xd8] sm:$0xff] }
 0x654   : > { %v3233_v3 = vadd.f32 %v3126_v31, %v3010_v59  ;;  %v3235_v4 = vadd.f32 %v3215_v33, %v3012_v24  ;;  %5251 = vmatpush3.msra.mxu0 %v3532_v18  ;;  %5295 = vmatpush3.msra.mxu1 %v3564_v40  ;;  %v3234_v57 = vadd.f32 %v3213_v5, %v3011_v20  ;;  %v1754_v59 = vld [vmem:[#allocation4 + $0x40] sm:$0xff]  ;;  %v7611_v5 = vld [vmem:[#allocation35_spill] sm:$0xff]  ;;  %v3577_v18 = vld [vmem:[%s7527_s8 + $0x1d8] sm:$0xff] }
 0x655   : > { %v3130_v12 = vpop.f32.mrf.mxu0  ;;  %v3219_v28 = vpop.f32.mrf.mxu1  ;;  %3393 = vmatprep.mubr.f32.mxu0 %v6901_v1  ;;  %3478 = vmatprep.mubr.f32.mxu1 %v6903_v10  ;;  %v2794_v2 = vadd.f32 %v7611_v5, %v2571_v54  ;;  %v1759_v40 = vld [vmem:[#allocation4 + $0x70] sm:$0xff]  ;;  %v6971_v24 = vmul.f32 %v3232_v0, %v1754_v59  ;;  %v3529_v53 = vld [vmem:[%s7527_s8 + $0x58] sm:$0xff]  ;;  %v1758_v27 = vld [vmem:[#allocation4 + $0x60] sm:$0xff] }
 0x656   : > { %5252 = vmatprep.subr.mxu0 %v3547_v29  ;;  %5296 = vmatprep.subr.mxu1 %v3579_v17  ;;  %v6948_v58 = vmul.f32 %v3233_v3, %v1755_v49  ;;  %v6950_v8 = vmul.f32 %v3235_v4, %v1757_v60  ;;  %v6973_v30 = vmul.f32 %v3234_v57, %v1756_v63  ;;  %v3576_v55 = vld [vmem:[%s7527_s8 + $0x1d0] sm:$0xff]  ;;  %v3543_v3 = vld [vmem:[%s7527_s8 + $0xc8] sm:$0xff]  ;;  %v3542_v43 = vld [vmem:[%s7527_s8 + $0xc0] sm:$0xff] }
 0x657   : > { %v3132_v61 = vpop.f32.mrf.mxu0  ;;  %v3221_v7 = vpop.f32.mrf.mxu1  ;;  %3394 = vmatmul.mubr.f32.gmra.mxu0 %v6928_v37  ;;  %3479 = vmatmul.mubr.f32.gmra.mxu1 %v6930_v41  ;;  %v3015_v22 = vadd.f32 %v6841_v56, %v2794_v2  ;;  %v3236_v52 = vadd.f32 %v3130_v12, %v3013_v21  ;;  %v3544_v56 = vld [vmem:[%s7527_s8 + $0xd0] sm:$0xff]  ;;  %v3575_v29 = vld [vmem:[%s7527_s8 + $0x1c8] sm:$0xff]  ;;  %v3574_v49 = vld [vmem:[%s7527_s8 + $0x1c0] sm:$0xff] }
 0x658   : > { %5253 = vmatpush3.msra.mxu0 %v3531_v62  ;;  %5297 = vmatpush3.msra.mxu1 %v3563_v13  ;;  %v3237_v35 = vadd.f32 %v3132_v61, %v3014_v26  ;;  %v3239_v47 = vadd.f32 %v3221_v7, %v3016_v38  ;;  %v3560_v54 = vld [vmem:[%s7527_s8 + $0x150] sm:$0xff]  ;;  %v3527_v16 = vld [vmem:[%s7527_s8 + $0x48] sm:$0xff]  ;;  %v3526_v60 = vld [vmem:[%s7527_s8 + $0x40] sm:$0xff] }
 0x659   : > { %5254 = vmatprep.subr.mxu0 %v3546_v6  ;;  %5298 = vmatprep.subr.mxu1 %v3578_v48  ;;  %v3238_v31 = vadd.f32 %v3219_v28, %v3015_v22  ;;  %v7007_v17 = vmul.f32 %v3236_v52, %v1758_v27  ;;  %v3559_v44 = vld [vmem:[%s7527_s8 + $0x148] sm:$0xff]  ;;  %v3558_v4 = vld [vmem:[%s7527_s8 + $0x140] sm:$0xff]  ;;  %v3541_v12 = vld [vmem:[%s7527_s8 + $0xb8] sm:$0xff] }
 0x65a   : > { %5255 = vmatpush3.msra.mxu0 %v3530_v32  ;;  %5299 = vmatpush3.msra.mxu1 %v3562_v39  ;;  %v6989_v33 = vmul.f32 %v3237_v35, %v1759_v40  ;;  %v6991_v36 = vmul.f32 %v3239_v47, %v1761_v34  ;;  %v3573_v28 = vld [vmem:[%s7527_s8 + $0x1b8] sm:$0xff]  ;;  %v3572_v62 = vld [vmem:[%s7527_s8 + $0x1b0] sm:$0xff]  ;;  %v3539_v26 = vld [vmem:[%s7527_s8 + $0xa8] sm:$0xff] }
 0x65b   : > { %3398 = vmatprep.mubr.f32.mxu0 %v6948_v58  ;;  %3483 = vmatprep.mubr.f32.mxu1 %v6950_v8  ;;  %v7009_v14 = vmul.f32 %v3238_v31, %v1760_v46  ;;  %v3525_v23 = vld [vmem:[%s7527_s8 + $0x38] sm:$0xff]  ;;  %v3556_v13 = vld [vmem:[%s7527_s8 + $0x130] sm:$0xff]  ;;  %v3571_v38 = vld [vmem:[%s7527_s8 + $0x1a8] sm:$0xff] }
 0x65c   : > { %5256 = vmatprep.subr.mxu0 %v3545_v42  ;;  %5300 = vmatprep.subr.mxu1 %v3577_v18  ;;  %v3557_v20 = vld [vmem:[%s7527_s8 + $0x138] sm:$0xff]  ;;  %v3523_v0 = vld [vmem:[%s7527_s8 + $0x28] sm:$0xff]  ;;  %v3538_v48 = vld [vmem:[%s7527_s8 + $0xa0] sm:$0xff] }
 0x65d   : > { %3399 = vmatmul.mubr.f32.gmra.mxu0 %v6971_v24  ;;  %3484 = vmatmul.mubr.f32.gmra.mxu1 %v6973_v30  ;;  %v3555_v6 = vld [vmem:[%s7527_s8 + $0x128] sm:$0xff]  ;;  %v3570_v61 = vld [vmem:[%s7527_s8 + $0x1a0] sm:$0xff]  ;;  %v3537_v32 = vld [vmem:[%s7527_s8 + $0x98] sm:$0xff] }
 0x65e   : > { %5257 = vmatpush3.msra.mxu0 %v3529_v53  ;;  %5301 = vmatpush3.msra.mxu1 %v3561_v25  ;;  %v3522_v7 = vld [vmem:[%s7527_s8 + $0x20] sm:$0xff]  ;;  %v3569_v39 = vld [vmem:[%s7527_s8 + $0x198] sm:$0xff]  ;;  %v3536_v59 = vld [vmem:[%s7527_s8 + $0x90] sm:$0xff] }
 0x65f   : > { %5258 = vmatprep.subr.mxu0 %v3544_v56  ;;  %5302 = vmatprep.subr.mxu1 %v3576_v55  ;;  %v3554_v57 = vld [vmem:[%s7527_s8 + $0x120] sm:$0xff]  ;;  %v3568_v63 = vld [vmem:[%s7527_s8 + $0x190] sm:$0xff]  ;;  %v3535_v35 = vld [vmem:[%s7527_s8 + $0x88] sm:$0xff] }
 0x660   : > { %5259 = vmatpush3.msra.mxu0 %v3528_v19  ;;  %5303 = vmatpush3.msra.mxu1 %v3560_v54  ;;  %v3520_v5 = vld [vmem:[%s7527_s8 + $0x10] sm:$0xff]  ;;  %v3567_v47 = vld [vmem:[%s7527_s8 + $0x188] sm:$0xff]  ;;  %v3534_v21 = vld [vmem:[%s7527_s8 + $0x80] sm:$0xff] }
 0x661   : > { %3403 = vmatprep.mubr.f32.mxu0 %v6989_v33  ;;  %3488 = vmatprep.mubr.f32.mxu1 %v6991_v36  ;;  %v3552_v2 = vld [vmem:[%s7527_s8 + $0x110] sm:$0xff]  ;;  %v3519_v42 = vld [vmem:[%s7527_s8 + $0x8] sm:$0xff]  ;;  %v3566_v40 = vld [vmem:[%s7527_s8 + $0x180] sm:$0xff] }
 0x662   : > { %5260 = vmatprep.subr.mxu0 %v3543_v3  ;;  %5304 = vmatprep.subr.mxu1 %v3575_v29  ;;  %v3551_v18 = vld [vmem:[%s7527_s8 + $0x108] sm:$0xff]  ;;  %v3518_v34 = vld [vmem:[%s7527_s8] sm:$0xff]  ;;  %v3322_v31 = vld [vmem:[#allocation6 + $0x10] sm:$0xff] }
 0x663   : > { %3404 = vmatmul.mubr.f32.gmra.mxu0 %v7007_v17  ;;  %3489 = vmatmul.mubr.f32.gmra.mxu1 %v7009_v14  ;;  %v3550_v22 = vld [vmem:[%s7527_s8 + $0x100] sm:$0xff]  ;;  %v3321_v25 = vld [vmem:[#allocation6 + $0x8] sm:$0xff] }
 0x664   : > { %5261 = vmatpush3.msra.mxu0 %v3527_v16  ;;  %5305 = vmatpush3.msra.mxu1 %v3559_v44  ;;  %v3320_v55 = vld [vmem:[#allocation6] sm:$0xff] }
 0x665   : > { %5262 = vmatprep.subr.mxu0 %v3542_v43  ;;  %3650 = vmatprep.mubr.f32.mxu0 %v6870_v15  ;;  %v3540_v15 = vld [vmem:[%s7527_s8 + $0xb0] sm:$0xff] }
 0x666   : > { %5306 = vmatprep.subr.mxu1 %v3574_v49  ;;  %3735 = vmatprep.mubr.f32.mxu1 %v6872_v45  ;;  %v3524_v45 = vld [vmem:[%s7527_s8 + $0x30] sm:$0xff] }
 0x667   : > { %5263 = vmatpush3.msra.mxu0 %v3526_v60  ;;  %5307 = vmatpush3.msra.mxu1 %v3558_v4  ;;  %v3323_v60 = vld [vmem:[#allocation6 + $0x18] sm:$0xff] }
 0x668   : > { %5264 = vmatprep.subr.mxu0 %v3541_v12  ;;  %5308 = vmatprep.subr.mxu1 %v3573_v28 }
 0x669   : > { %5265 = vmatpush3.msra.mxu0 %v3525_v23  ;;  %5309 = vmatpush3.msra.mxu1 %v3557_v20 }
 0x66a   : > { %5266 = vmatprep.subr.mxu0 %v3540_v15  ;;  %5310 = vmatprep.subr.mxu1 %v3572_v62 }
 0x66b   : > { %5267 = vmatpush3.msra.mxu0 %v3524_v45  ;;  %5311 = vmatpush3.msra.mxu1 %v3556_v13 }
 0x66c   : > { %5268 = vmatprep.subr.mxu0 %v3539_v26  ;;  %5312 = vmatprep.subr.mxu1 %v3571_v38 }
 0x66d   : > { %5269 = vmatpush3.msra.mxu0 %v3523_v0  ;;  %5313 = vmatpush3.msra.mxu1 %v3555_v6 }
 0x66e   : > { %5270 = vmatprep.subr.mxu0 %v3538_v48  ;;  %5314 = vmatprep.subr.mxu1 %v3570_v61 }
 0x66f   : > { %5271 = vmatpush3.msra.mxu0 %v3522_v7  ;;  %5315 = vmatpush3.msra.mxu1 %v3554_v57  ;;  %v3582_v57 = vld [vmem:[#allocation7] sm:$0xff] }
 0x670   : > { %5272 = vmatprep.subr.mxu0 %v3537_v32  ;;  %5316 = vmatprep.subr.mxu1 %v3569_v39 }
 0x671   : > { %5273 = vmatpush3.msra.mxu0 %v3521_v9  ;;  %5317 = vmatpush3.msra.mxu1 %v3553_v50 }
 0x672   : > { %5274 = vmatprep.subr.mxu0 %v3536_v59  ;;  %5318 = vmatprep.subr.mxu1 %v3568_v63 }
 0x673   : > { %5275 = vmatpush3.msra.mxu0 %v3520_v5  ;;  %5319 = vmatpush3.msra.mxu1 %v3552_v2 }
 0x674   : > { %5276 = vmatprep.subr.mxu0 %v3535_v35  ;;  %5320 = vmatprep.subr.mxu1 %v3567_v47 }
 0x675   : > { %5277 = vmatpush3.msra.mxu0 %v3519_v42  ;;  %5321 = vmatpush3.msra.mxu1 %v3551_v18  ;;  %v3583_v18 = vld [vmem:[#allocation7 + $0x8] sm:$0xff] }
 0x676   : > { %5278 = vmatprep.subr.mxu0 %v3534_v21  ;;  %5322 = vmatprep.subr.mxu1 %v3566_v40 }
 0x677   : > { %5279 = vmatpush3.msra.mxu0 %v3518_v34  ;;  %5323 = vmatpush3.msra.mxu1 %v3550_v22 }
 0x678   : > { %3651 = vmatmul.mubr.f32.vlgmr.msra.gmra.mxu0 %v6878_v11  ;;  %3736 = vmatmul.mubr.f32.vlgmr.msra.gmra.mxu1 %v6881_v51  ;;  %v5645_v11 = vld [vmem:[#allocation3] sm:$0xff] }
 0x679   : > { %3655 = vmatprep.mubr.f32.mxu0 %v6901_v1  ;;  %3740 = vmatprep.mubr.f32.mxu1 %v6903_v10 }
 0x67c   : > { %3656 = vmatmul.mubr.f32.gmra.mxu0 %v6928_v37  ;;  %3741 = vmatmul.mubr.f32.gmra.mxu1 %v6930_v41 }
 0x67d   : > { %3660 = vmatprep.mubr.f32.mxu0 %v6948_v58  ;;  %3745 = vmatprep.mubr.f32.mxu1 %v6950_v8 }
 0x680   : > { %3661 = vmatmul.mubr.f32.gmra.mxu0 %v6971_v24  ;;  %3746 = vmatmul.mubr.f32.gmra.mxu1 %v6973_v30 }
 0x681   : > { %3665 = vmatprep.mubr.f32.mxu0 %v6989_v33  ;;  %3750 = vmatprep.mubr.f32.mxu1 %v6991_v36 }
 0x684   : > { %3666 = vmatmul.mubr.f32.gmra.mxu0 %v7007_v17  ;;  %3751 = vmatmul.mubr.f32.gmra.mxu1 %v7009_v14 }
 0x685   : > { %5525 = vmatprep.mubr.msk.f32.mxu0 %vm1555_vm3, %v5645_v11  ;;  %5539 = vmatprep.mubr.msk.f32.mxu1 %vm1555_vm3, %v5645_v11 }
 0x711   : > { %v5192_v51 = vpop.f32.mrf.mxu0  ;;  %v5236_v1 = vpop.f32.mrf.mxu1 }
 0x713   : > { %v5193_v10 = vpop.f32.mrf.mxu0  ;;  %v5237_v37 = vpop.f32.mrf.mxu1 }
 0x714   : > { %v5194_v53 = vadd.f32 %v5193_v10, %v5192_v51  ;;  %v5238_v17 = vadd.f32 %v5237_v37, %v5236_v1  ;;  %v3584_v37 = vld [vmem:[#allocation7 + $0x10] sm:$0xff] }
 0x716   : > { %v3391_v27 = vadd.f32 %v5194_v53, %v3320_v55 }
 0x717   : > { %v5195_v41 = vpop.f32.mrf.mxu0  ;;  %v5239_v58 = vpop.f32.mrf.mxu1 }
 0x718   : > { %v3476_v49 = vadd.f32 %v5238_v17, %v3391_v27 }
 0x719   : > { %v5196_v8 = vpop.f32.mrf.mxu0  ;;  %v5240_v24 = vpop.f32.mrf.mxu1 }
 0x71a   : > { %v5197_v30 = vadd.f32 %v5196_v8, %v5195_v41  ;;  %v5241_v46 = vadd.f32 %v5240_v24, %v5239_v58  ;;  %v5018_v45 = vmul.f32 -1.442695, %v3476_v49  ;;  %v7168_v49 = vld [vmem:[#allocation2 + $0x8] sm:$0xff] }
 0x71c   : > { %v3396_v19 = vadd.f32 %v5197_v30, %v3321_v25 }
 0x71d   : > { %v5198_v52 = vpop.f32.mrf.mxu0  ;;  %v5242_v56 = vpop.f32.mrf.mxu1 }
 0x71e   : > { %v3481_v44 = vadd.f32 %v5241_v46, %v3396_v19 }
 0x71f   : > { %v5199_v33 = vpop.f32.mrf.mxu0  ;;  %v5243_v36 = vpop.f32.mrf.mxu1 }
 0x720   : > { %v5200_v54 = vadd.f32 %v5199_v33, %v5198_v52  ;;  %v5244_v29 = vadd.f32 %v5243_v36, %v5242_v56  ;;  %v5019_v20 = vmul.f32 -1.442695, %v3481_v44  ;;  %v3585_v56 = vld [vmem:[#allocation7 + $0x18] sm:$0xff] }
 0x722   : > { %v3401_v3 = vadd.f32 %v5200_v54, %v3322_v31 }
 0x723   : > { %v5201_v14 = vpop.f32.mrf.mxu0  ;;  %v5245_v16 = vpop.f32.mrf.mxu1 }
 0x724   : > { %v3486_v43 = vadd.f32 %v5244_v29, %v3401_v3  ;;  %v7155_v29 = vld [vmem:[#allocation2 + $0x18] sm:$0xff] }
 0x725   : > { %v5202_v4 = vpop.f32.mrf.mxu0  ;;  %v5246_v12 = vpop.f32.mrf.mxu1 }
 0x726   : > { %v5020_v28 = vmul.f32 -1.442695, %v3486_v43  ;;  %v5203_v23 = vadd.f32 %v5202_v4, %v5201_v14  ;;  %v5247_v62 = vadd.f32 %v5246_v12, %v5245_v16  ;;  %v7161_v16 = vld [vmem:[#allocation2 + $0x10] sm:$0xff]  ;;  %v7175_v4 = vld [vmem:[#allocation2] sm:$0xff] }
 0x728   : > { %v3406_v15 = vadd.f32 %v5203_v23, %v3323_v60  ;;  %5605 = vpow2.f32 %v5020_v28  ;;  %v3978_v28 = vld [vmem:[%s7534_s15 + $0x38] sm:$0xff]  ;;  %v3977_v23 = vld [vmem:[%s7534_s15 + $0x30] sm:$0xff] }
 0x729   : > { %5607 = vpow2.f32 %v5019_v20  ;;  %v3976_v20 = vld [vmem:[%s7534_s15 + $0x28] sm:$0xff] }
 0x72a   : > { %v3491_v13 = vadd.f32 %v5247_v62, %v3406_v15  ;;  %5609 = vpow2.f32 %v5018_v45  ;;  %v7192_v15 = vld [vmem:[#allocation3 + $0x8] sm:$0xff]  ;;  %v3975_v62 = vld [vmem:[%s7534_s15 + $0x20] sm:$0xff]  ;;  %v7199_v45 = vld [vmem:[#allocation3 + $0x10] sm:$0xff] }
 0x72c   : > { %v5021_v26 = vmul.f32 -1.442695, %v3491_v13  ;;  %v3974_v13 = vld [vmem:[%s7534_s15 + $0x18] sm:$0xff] }
 0x72e   : > { %5611 = vpow2.f32 %v5021_v26  ;;  %v5044_v26 = vld [vmem:[%s7533_s14 + $0x8] sm:$0xff] }
 0x735   : > { %v5606_v38 = vpop.eup %5605 }
 0x736   : > { %v5608_v48 = vpop.eup %5607  ;;  %v3508_v61 = vadd.f32 1.0, %v5606_v38  ;;  %v3973_v38 = vld [vmem:[%s7534_s15 + $0x10] sm:$0xff] }
 0x737   : > { %v5610_v7 = vpop.eup %5609  ;;  %v3507_v63 = vadd.f32 1.0, %v5608_v48  ;;  %v5652_v48 = vld [vmem:[#allocation3 + $0x18] sm:$0xff] }
 0x738   : > { %v5280_v0 = vpop.f32.mrf.mxu0  ;;  %v5324_v6 = vpop.f32.mrf.mxu1  ;;  %5613 = vrcp.f32 %v3508_v61  ;;  %v3506_v42 = vadd.f32 1.0, %v5610_v7  ;;  %v3971_v61 = vld [vmem:[%s7534_s15] sm:$0xff]  ;;  %v4178_v7 = vcombine.high %v5044_v26, %v5044_v26 }
 0x73a   : > { %v5281_v32 = vpop.f32.mrf.mxu0  ;;  %v5325_v39 = vpop.f32.mrf.mxu1 }
 0x73b   : > { %v5612_v9 = vpop.eup %5611  ;;  %v5282_v50 = vadd.f32 %v5281_v32, %v5280_v0  ;;  %v5326_v59 = vadd.f32 %v5325_v39, %v5324_v6  ;;  %v3972_v0 = vld [vmem:[%s7534_s15 + $0x8] sm:$0xff]  ;;  %v5063_v6 = vld [vmem:[%s7533_s14 + $0x10] sm:$0xff] }
 0x73c   : > { %v3509_v5 = vadd.f32 1.0, %v5612_v9  ;;  %v5283_v2 = vpop.f32.mrf.mxu0  ;;  %v5327_v35 = vpop.f32.mrf.mxu1  ;;  %v4401_v32 = vcombine.high %v5063_v6, %v5063_v6  ;;  %v7613_v39 = vld [vmem:[#allocation19_spill] sm:$0xff]  ;;  %v7614_v9 = vld [vmem:[#allocation18_spill] sm:$0xff] }
 0x73d   : > { %v3653_v47 = vadd.f32 %v5282_v50, %v3582_v57  ;;  %v7612_v57 = vmov 0.0   ;;  %v7615_v50 = vld [vmem:[#allocation21_spill] sm:$0xff] }
 0x73e   : > { %5615 = vrcp.f32 %v3509_v5  ;;  %v5284_v21 = vpop.f32.mrf.mxu0  ;;  %v5328_v40 = vpop.f32.mrf.mxu1  ;;  %v7618_v5 = vld [vmem:[#allocation23_spill] sm:$0xff] }
 0x73f   : > { %v7147_v34 = vadd.f32 %v5326_v59, %v3653_v47  ;;  %v5285_v22 = vadd.f32 %v5284_v21, %v5283_v2  ;;  %v5329_v11 = vadd.f32 %v5328_v40, %v5327_v35  ;;  %5617 = vrcp.f32 %v3507_v63  ;;  %v7616_v59 = vld [vmem:[#allocation20_spill] sm:$0xff]  ;;  %v7617_v63 = vld [vmem:[#allocation22_spill] sm:$0xff]  ;;  %v7620_v35 = vld [vmem:[#allocation25_spill] sm:$0xff] }
 0x740   : > { %v5286_v51 = vpop.f32.mrf.mxu0  ;;  %v5330_v1 = vpop.f32.mrf.mxu1  ;;  %5619 = vrcp.f32 %v3506_v42  ;;  %v7619_v2 = vld [vmem:[#allocation24_spill] sm:$0xff]  ;;  %v3970_v40 = vld [vmem:[%s7533_s14] sm:$0xff] }
 0x741   : > { %v3658_v10 = vadd.f32 %v5285_v22, %v3583_v18  ;;  %v4081_v22 = vcombine.high %v3970_v40, %v3970_v40 }
 0x742   : > { %v5287_v41 = vpop.f32.mrf.mxu0  ;;  %v5331_v58 = vpop.f32.mrf.mxu1 }
 0x743   : > { %v7149_v8 = vadd.f32 %v5329_v11, %v3658_v10  ;;  %v5288_v24 = vadd.f32 %v5287_v41, %v5286_v51  ;;  %v5332_v30 = vadd.f32 %v5331_v58, %v5330_v1  ;;  %v5058_v11 = vld [vmem:[%s7534_s15 + $0x78] sm:$0xff]  ;;  %v5057_v51 = vld [vmem:[%s7534_s15 + $0x70] sm:$0xff]  ;;  %v5056_v1 = vld [vmem:[%s7534_s15 + $0x68] sm:$0xff] }
 0x744   : > { %v5289_v53 = vpop.f32.mrf.mxu0  ;;  %v5333_v25 = vpop.f32.mrf.mxu1  ;;  %v5653_v10 = vld [vmem:[%s5870_s26] sm:$0xff]  ;;  %v5054_v41 = vld [vmem:[%s7534_s15 + $0x58] sm:$0xff]  ;;  %v5053_v58 = vld [vmem:[%s7534_s15 + $0x50] sm:$0xff] }
 0x745   : > { %v3663_v52 = vadd.f32 %v5288_v24, %v3584_v37  ;;  %v5614_v27 = vpop.eup %5613  ;;  %v5055_v37 = vld [vmem:[%s7534_s15 + $0x60] sm:$0xff]  ;;  %v5052_v24 = vld [vmem:[%s7534_s15 + $0x48] sm:$0xff] }
 0x746   : > { %v5290_v55 = vpop.f32.mrf.mxu0  ;;  %v5334_v31 = vpop.f32.mrf.mxu1  ;;  %v7164_v44 = vmul.f32 %v7161_v16, %v5614_v27  ;;  %v5071_v27 = vld [vmem:[%s7534_s15 + $0x88] sm:$0xff] }
 0x747   : > { %v7151_v33 = vadd.f32 %v5332_v30, %v3663_v52  ;;  %v5291_v36 = vadd.f32 %v5290_v55, %v5289_v53  ;;  %v5335_v54 = vadd.f32 %v5334_v31, %v5333_v25  ;;  %v5654_v30 = vld [vmem:[%s5870_s26 + $0x8] sm:$0xff]  ;;  %v5051_v53 = vld [vmem:[%s7534_s15 + $0x40] sm:$0xff]  ;;  %v5077_v25 = vld [vmem:[%s7534_s15 + $0xb8] sm:$0xff] }
 0x748   : > { %v5655_v52 = vld [vmem:[%s5870_s26 + $0x10] sm:$0xff]  ;;  %v5075_v31 = vld [vmem:[%s7534_s15 + $0xa8] sm:$0xff] }
 0x749   : > { %v3668_v19 = vadd.f32 %v5291_v36, %v3585_v56  ;;  %v5656_v56 = vld [vmem:[%s5870_s26 + $0x18] sm:$0xff]  ;;  %v5076_v55 = vld [vmem:[%s7534_s15 + $0xb0] sm:$0xff]  ;;  %v5074_v36 = vld [vmem:[%s7534_s15 + $0xa0] sm:$0xff]  ;;  %s7479_s26 = scalar_lea.sflag [#allocation10], %s7622_s28 }
 0x74b   : > { %v5616_v46 = vpop.eup %5615  ;;  %v7153_v3 = vadd.f32 %v5335_v54, %v3668_v19  ;;  %v5073_v19 = vld [vmem:[%s7534_s15 + $0x98] sm:$0xff]  ;;  %v5072_v54 = vld [vmem:[%s7534_s15 + $0x90] sm:$0xff] }
 0x74c   : > { %v7158_v17 = vmul.f32 %v7155_v29, %v5616_v46  ;;  %v5618_v14 = vpop.eup %5617  ;;  %v5070_v46 = vld [vmem:[%s7534_s15 + $0x80] sm:$0xff] }
 0x74d   : > { %v5620_v43 = vpop.eup %5619  ;;  %v7171_v60 = vmul.f32 %v7168_v49, %v5618_v14  ;;  %v4660_v14 = vld [vmem:[%s7528_s9 + $0xf8] sm:$0xff] }
 0x74e   : > { %5517 = vmatprep.subr.mxu0 %v7158_v17  ;;  %v7178_v12 = vmul.f32 %v7175_v4, %v5620_v43  ;;  %v4644_v43 = vld [vmem:[%s7528_s9 + $0x78] sm:$0xff] }
 0x74f   : > { %5518 = vmatpush3.msra.mxu0 %v7158_v17 }
 0x750   : > { %5519 = vmatprep.subr.mxu0 %v7164_v44 }
 0x751   : > { %5520 = vmatpush3.msra.mxu0 %v7164_v44 }
 0x752   : > { %5521 = vmatprep.subr.mxu0 %v7171_v60 }
 0x753   : > { %5522 = vmatpush3.msra.mxu0 %v7171_v60 }
 0x754   : > { %5523 = vmatprep.subr.mxu0 %v7178_v12 }
 0x755   : > { %5524 = vmatpush3.msra.mxu0 %v7178_v12 }
 0x756   : > { %5526 = vmatmul.mubr.msk.f32.vlgmr.msra.gmra.mxu0 %vm1555_vm3, %v7192_v15  ;;  %4015 = vmatprep.subr.mxu0 %v3978_v28  ;;  %v4659_v28 = vld [vmem:[%s7528_s9 + $0xf0] sm:$0xff] }
 0x757   : > { %4016 = vmatpush1.msra.mxu0 %v3977_v23  ;;  %5528 = vmatprep.mubr.msk.f32.mxu0 %vm1555_vm3, %v7199_v45  ;;  %v4643_v23 = vld [vmem:[%s7528_s9 + $0x70] sm:$0xff] }
 0x758   : > { %4017 = vmatprep.subr.mxu0 %v3976_v20  ;;  %v4658_v20 = vld [vmem:[%s7528_s9 + $0xe8] sm:$0xff] }
 0x759   : > { %4018 = vmatpush1.msra.mxu0 %v3975_v62  ;;  %v4657_v62 = vld [vmem:[%s7528_s9 + $0xe0] sm:$0xff] }
 0x75a   : > { %5529 = vmatmul.mubr.msk.f32.gmra.mxu0 %vm1555_vm3, %v5652_v48  ;;  %4019 = vmatprep.subr.mxu0 %v3974_v13  ;;  %v4656_v13 = vld [vmem:[%s7528_s9 + $0xd8] sm:$0xff] }
 0x75b   : > { %4020 = vmatpush1.msra.mxu0 %v3973_v38  ;;  %4055 = vmatprep.mubr.f32.mxu0 %v7612_v57  ;;  %v4655_v38 = vld [vmem:[%s7528_s9 + $0xd0] sm:$0xff] }
 0x75c   : > { %4021 = vmatprep.subr.mxu0 %v3972_v0  ;;  %v4639_v0 = vld [vmem:[%s7528_s9 + $0x50] sm:$0xff] }
 0x75d   : > { %4022 = vmatpush1.msra.mxu0 %v3971_v61  ;;  %v4653_v61 = vld [vmem:[%s7528_s9 + $0xc0] sm:$0xff] }
 0x75e   : > { %5034 = vmatmul.mubr.msk.f32.vlgmr.msra.gmra.mxu0 %vm1555_vm3, %v7178_v12  ;;  %5045 = vmatprep.subr.msk.mxu0 %vm2165_vm4, %v4178_v7  ;;  %v4637_v7 = vld [vmem:[%s7528_s9 + $0x40] sm:$0xff] }
 0x75f   : > { %4061 = vmatprep.mubr.f32.mxu0 %v7612_v57  ;;  %5046 = vmatpush1.msk.msra.mxu0 %vm2165_vm4, %v5044_v26  ;;  %v4640_v26 = vld [vmem:[%s7528_s9 + $0x58] sm:$0xff] }
 0x760   : > { %5064 = vmatprep.subr.msk.mxu0 %vm2165_vm4, %v4401_v32  ;;  %v4652_v32 = vld [vmem:[%s7528_s9 + $0xb8] sm:$0xff] }
 0x762   : > { %5035 = vmatmul.mubr.msk.f32.gmra.mxu0 %vm1555_vm3, %v7171_v60 }
 0x763   : > { %4067 = vmatprep.mubr.f32.mxu0 %v7612_v57 }
 0x766   : > { %5036 = vmatmul.mubr.msk.f32.gmra.mxu0 %vm1555_vm3, %v7164_v44 }
 0x767   : > { %4073 = vmatprep.mubr.f32.mxu0 %v7612_v57 }
 0x76a   : > { %5037 = vmatmul.mubr.msk.f32.gmra.mxu0 %vm1555_vm3, %v7158_v17 }
 0x76b   : > { %4247 = vmatprep.mubr.f32.mxu0 %v7612_v57 }
 0x76e   : > { %5047 = vmatmul.mubr.msk.f32.vlgmr.msra.gmra.mxu0 %vm2152_vm5, %v7613_v39  ;;  %v4636_v39 = vld [vmem:[%s7528_s9 + $0x38] sm:$0xff] }
 0x76f   : > { %4253 = vmatprep.mubr.f32.mxu0 %v7612_v57  ;;  %5065 = vmatpush1.msk.msra.mxu0 %vm2165_vm4, %v5063_v6  ;;  %v4654_v6 = vld [vmem:[%s7528_s9 + $0xc8] sm:$0xff] }
 0x770   : > { %5352 = vmatprep.subr.mxu0 %v4660_v14 }
 0x772   : > { %5048 = vmatmul.mubr.msk.f32.gmra.mxu0 %vm2152_vm5, %v7614_v9  ;;  %v4651_v9 = vld [vmem:[%s7528_s9 + $0xb0] sm:$0xff] }
 0x773   : > { %4259 = vmatprep.mubr.f32.mxu0 %v7612_v57 }
 0x776   : > { %5049 = vmatmul.mubr.msk.f32.gmra.mxu0 %vm2152_vm5, %v7615_v50  ;;  %v4635_v50 = vld [vmem:[%s7528_s9 + $0x30] sm:$0xff] }
 0x777   : > { %4265 = vmatprep.mubr.f32.mxu0 %v7612_v57 }
 0x77a   : > { %5050 = vmatmul.mubr.msk.f32.gmra.mxu0 %vm2152_vm5, %v7616_v59  ;;  %v4650_v59 = vld [vmem:[%s7528_s9 + $0xa8] sm:$0xff] }
 0x77b   : > { %4470 = vmatprep.mubr.f32.mxu0 %v7612_v57 }
 0x77e   : > { %5066 = vmatmul.mubr.msk.f32.vlgmr.msra.gmra.mxu0 %vm2152_vm5, %v7617_v63  ;;  %v4634_v63 = vld [vmem:[%s7528_s9 + $0x28] sm:$0xff] }
 0x77f   : > { %4476 = vmatprep.mubr.f32.mxu0 %v7612_v57  ;;  %5353 = vmatpush3.msra.mxu0 %v4644_v43 }
 0x780   : > { %5354 = vmatprep.subr.mxu0 %v4659_v28 }
 0x781   : > { %5355 = vmatpush3.msra.mxu0 %v4643_v23 }
 0x782   : > { %5067 = vmatmul.mubr.msk.f32.gmra.mxu0 %vm2152_vm5, %v7618_v5  ;;  %5356 = vmatprep.subr.mxu0 %v4658_v20  ;;  %v4649_v5 = vld [vmem:[%s7528_s9 + $0xa0] sm:$0xff] }
 0x783   : > { %4482 = vmatprep.mubr.f32.mxu0 %v7612_v57 }
 0x786   : > { %5068 = vmatmul.mubr.msk.f32.gmra.mxu0 %vm2152_vm5, %v7619_v2  ;;  %v4633_v2 = vld [vmem:[%s7528_s9 + $0x20] sm:$0xff] }
 0x787   : > { %4488 = vmatprep.mubr.f32.mxu0 %v7612_v57 }
 0x78a   : > { %5069 = vmatmul.mubr.msk.f32.gmra.mxu0 %vm2152_vm5, %v7620_v35 }
 0x816   : > { %v5527_v47 = vpop.f32.mrf.mxu0 }
 0x818   : > { %v3858_v42 = vpop.f32.mrf.mxu0 }
 0x81a   : > { %v5530_v18 = vpop.f32.mrf.mxu0 }
 0x81b   : > { %5531 = vmatprep.subr.mxu1 %v5530_v18 }
 0x81c   : > { %v3868_v21 = vpop.f32.mrf.mxu0  ;;  %5532 = vmatpush3.msra.mxu1 %v5530_v18 }
 0x81d   : > { %5533 = vmatprep.subr.mxu1 %v3868_v21 }
 0x81e   : > { %5534 = vmatpush3.msra.mxu1 %v3868_v21 }
 0x81f   : > { %5535 = vmatprep.subr.mxu1 %v5527_v47 }
 0x820   : > { %5536 = vmatpush3.msra.mxu1 %v5527_v47 }
 0x821   : > { %5537 = vmatprep.subr.mxu1 %v3858_v42 }
 0x822   : > { %5538 = vmatpush3.msra.mxu1 %v3858_v42 }
 0x823   : > { %5540 = vmatmul.mubr.msk.f32.vlgmr.msra.gmra.mxu1 %vm1555_vm3, %v7192_v15  ;;  %5038 = vmatprep.subr.msk.mxu1 %vm2165_vm4, %v4081_v22  ;;  %v4642_v15 = vld [vmem:[%s7528_s9 + $0x68] sm:$0xff] }
 0x824   : > { %5542 = vmatprep.mubr.msk.f32.mxu1 %vm1555_vm3, %v7199_v45  ;;  %5039 = vmatpush1.msk.msra.mxu1 %vm2165_vm4, %v3970_v40  ;;  %v4641_v45 = vld [vmem:[%s7528_s9 + $0x60] sm:$0xff] }
 0x825   : > { %4325 = vmatprep.subr.mxu1 %v5058_v11  ;;  %5357 = vmatpush3.msra.mxu0 %v4642_v15 }
 0x826   : > { %5358 = vmatprep.subr.mxu0 %v4657_v62 }
 0x827   : > { %5543 = vmatmul.mubr.msk.f32.gmra.mxu1 %vm1555_vm3, %v5652_v48  ;;  %5359 = vmatpush3.msra.mxu0 %v4641_v45  ;;  %v4638_v48 = vld [vmem:[%s7528_s9 + $0x48] sm:$0xff] }
 0x828   : > { %4150 = vmatprep.mubr.f32.mxu1 %v7612_v57  ;;  %5360 = vmatprep.subr.mxu0 %v4656_v13 }
 0x829   : > { %5361 = vmatpush3.msra.mxu0 %v4640_v26 }
 0x82a   : > { %5362 = vmatprep.subr.mxu0 %v4655_v38 }
 0x82b   : > { %5040 = vmatmul.mubr.msk.f32.vlgmr.msra.gmra.mxu1 %vm2152_vm5, %v5653_v10  ;;  %5363 = vmatpush3.msra.mxu0 %v4639_v0 }
 0x82c   : > { %4156 = vmatprep.mubr.f32.mxu1 %v7612_v57  ;;  %4326 = vmatpush1.msra.mxu1 %v5057_v51 }
 0x82d   : > { %4327 = vmatprep.subr.mxu1 %v5056_v1  ;;  %5364 = vmatprep.subr.mxu0 %v4654_v6 }
 0x82e   : > { %4328 = vmatpush1.msra.mxu1 %v5055_v37  ;;  %5365 = vmatpush3.msra.mxu0 %v4638_v48  ;;  %v4632_v37 = vld [vmem:[%s7528_s9 + $0x18] sm:$0xff] }
 0x82f   : > { %5041 = vmatmul.mubr.msk.f32.gmra.mxu1 %vm2152_vm5, %v5654_v30  ;;  %4329 = vmatprep.subr.mxu1 %v5054_v41  ;;  %v4630_v41 = vld [vmem:[%s7528_s9 + $0x8] sm:$0xff]  ;;  %v4057_v30 = vpop.f32.mrf.mxu0 }
 0x830   : > { %4162 = vmatprep.mubr.f32.mxu1 %v7612_v57  ;;  %4330 = vmatpush1.msra.mxu1 %v5053_v58  ;;  %v4645_v58 = vld [vmem:[%s7528_s9 + $0x80] sm:$0xff] }
 0x831   : > { %4331 = vmatprep.subr.mxu1 %v5052_v24  ;;  %5366 = vmatprep.subr.mxu0 %v4653_v61  ;;  %v4629_v24 = vld [vmem:[%s7528_s9] sm:$0xff] }
 0x832   : > { %4332 = vmatpush1.msra.mxu1 %v5051_v53  ;;  %5367 = vmatpush3.msra.mxu0 %v4637_v7  ;;  %v4059_v53 = vpop.f32.mrf.mxu0 }
 0x833   : > { %5042 = vmatmul.mubr.msk.f32.gmra.mxu1 %vm2152_vm5, %v5655_v52  ;;  %4548 = vmatprep.subr.mxu1 %v5077_v25 }
 0x834   : > { %4168 = vmatprep.mubr.f32.mxu1 %v7612_v57  ;;  %5368 = vmatprep.subr.mxu0 %v4652_v32  ;;  %v4063_v25 = vpop.f32.mrf.mxu0 }
 0x835   : > { %5369 = vmatpush3.msra.mxu0 %v4636_v39 }
 0x836   : > { %5370 = vmatprep.subr.mxu0 %v4651_v9  ;;  %v4065_v52 = vpop.f32.mrf.mxu0 }
 0x837   : > { %5043 = vmatmul.mubr.msk.f32.gmra.mxu1 %vm2152_vm5, %v5656_v56  ;;  %5371 = vmatpush3.msra.mxu0 %v4635_v50 }
 0x838   : > { %4365 = vmatprep.mubr.f32.mxu1 %v7612_v57  ;;  %5372 = vmatprep.subr.mxu0 %v4650_v59  ;;  %v4069_v56 = vpop.f32.mrf.mxu0 }
 0x839   : > { %5373 = vmatpush3.msra.mxu0 %v4634_v63 }
 0x83a   : > { %5374 = vmatprep.subr.mxu0 %v4649_v5 }
 0x83b   : > { %5059 = vmatmul.mubr.msk.f32.vlgmr.msra.gmra.mxu1 %vm1555_vm3, %v3858_v42  ;;  %5375 = vmatpush3.msra.mxu0 %v4633_v2 }
 0x83c   : > { %4371 = vmatprep.mubr.f32.mxu1 %v7612_v57  ;;  %4549 = vmatpush1.msra.mxu1 %v5076_v55 }
 0x83d   : > { %4550 = vmatprep.subr.mxu1 %v5075_v31  ;;  %v4071_v31 = vpop.f32.mrf.mxu0 }
 0x83e   : > { %4551 = vmatpush1.msra.mxu1 %v5074_v36 }
 0x83f   : > { %5060 = vmatmul.mubr.msk.f32.gmra.mxu1 %vm1555_vm3, %v5527_v47  ;;  %4552 = vmatprep.subr.mxu1 %v5073_v19  ;;  %v4075_v19 = vpop.f32.mrf.mxu0 }
 0x840   : > { %4377 = vmatprep.mubr.f32.mxu1 %v7612_v57  ;;  %4553 = vmatpush1.msra.mxu1 %v5072_v54 }
 0x841   : > { %4554 = vmatprep.subr.mxu1 %v5071_v27  ;;  %v4077_v27 = vpop.f32.mrf.mxu0 }
 0x842   : > { %4555 = vmatpush1.msra.mxu1 %v5070_v46 }
 0x843   : > { %5061 = vmatmul.mubr.msk.f32.gmra.mxu1 %vm1555_vm3, %v3868_v21  ;;  %v4249_v14 = vpop.f32.mrf.mxu0 }
 0x844   : > { %4383 = vmatprep.mubr.f32.mxu1 %v7612_v57 }
 0x845   : > { %v4251_v28 = vpop.f32.mrf.mxu0 }
 0x847   : > { %5062 = vmatmul.mubr.msk.f32.gmra.mxu1 %vm1555_vm3, %v5530_v18  ;;  %v4255_v20 = vpop.f32.mrf.mxu0 }
 0x848   : > { %4588 = vmatprep.mubr.f32.mxu1 %v7612_v57 }
 0x849   : > { %v4257_v62 = vpop.f32.mrf.mxu0 }
 0x84b   : > { %v4261_v13 = vpop.f32.mrf.mxu0 }
 0x84d   : > { %v4263_v38 = vpop.f32.mrf.mxu0 }
 0x84f   : > { %v4267_v6 = vpop.f32.mrf.mxu0 }
 0x851   : > { %v4269_v61 = vpop.f32.mrf.mxu0 }
 0x853   : > { %v4472_v32 = vpop.f32.mrf.mxu0 }
 0x855   : > { %v4474_v9 = vpop.f32.mrf.mxu0 }
 0x857   : > { %v4478_v5 = vpop.f32.mrf.mxu0 }
 0x8e3   : > { %v5541_v35 = vpop.f32.mrf.mxu1 }
 0x8e4   : > { %v3963_v21 = vmul.f32 2.0, %v5541_v35 }
 0x8e5   : > { %v3943_v47 = vpop.f32.mrf.mxu1 }
 0x8e6   : > { %v3962_v42 = vmul.f32 2.0, %v3943_v47  ;;  %v3967_v11 = vsub.f32 %v3963_v21, %v7171_v60  ;;  %v4648_v60 = vld [vmem:[%s7528_s9 + $0x98] sm:$0xff]  ;;  %v4480_v21 = vpop.f32.mrf.mxu0 }
 0x8e7   : > { %v5544_v18 = vpop.f32.mrf.mxu1  ;;  %5376 = vmatprep.subr.mxu0 %v4648_v60 }
 0x8e8   : > { %v3966_v40 = vsub.f32 %v3962_v42, %v7178_v12  ;;  %v3965_v1 = vmul.f32 2.0, %v5544_v18  ;;  %5377 = vmatpush3.msra.mxu0 %v4632_v37  ;;  %v4484_v60 = vpop.f32.mrf.mxu0 }
 0x8e9   : > { %v3953_v22 = vpop.f32.mrf.mxu1 }
 0x8ea   : > { %5078 = vmatmul.mubr.msk.f32.vlgmr.msra.gmra.mxu1 %vm1555_vm3, %v3966_v40  ;;  %v3964_v51 = vmul.f32 2.0, %v3953_v22  ;;  %v3969_v12 = vsub.f32 %v3965_v1, %v7158_v17  ;;  %v4631_v17 = vld [vmem:[%s7528_s9 + $0x10] sm:$0xff] }
 0x8eb   : > { %4594 = vmatprep.mubr.f32.mxu1 %v7612_v57  ;;  %v4152_v55 = vpop.f32.mrf.mxu1 }
 0x8ec   : > { %v3968_v10 = vsub.f32 %v3964_v51, %v7164_v44  ;;  %v4647_v44 = vld [vmem:[%s7528_s9 + $0x90] sm:$0xff]  ;;  %v4153_v50 = vadd.f32 %v4152_v55, %v4057_v30 }
 0x8ed   : > { %5378 = vmatprep.subr.mxu0 %v4647_v44  ;;  %v4154_v36 = vpop.f32.mrf.mxu1 }
 0x8ee   : > { %5079 = vmatmul.mubr.msk.f32.gmra.mxu1 %vm1555_vm3, %v3967_v11  ;;  %5379 = vmatpush3.msra.mxu0 %v4631_v17  ;;  %v4155_v63 = vadd.f32 %v4154_v36, %v4059_v53  ;;  %v4272_v35 = vadd.f32 %v4249_v14, %v4153_v50  ;;  %v3785_v53 = vld [vmem:[#allocation5] sm:$0xff]  ;;  %v3784_v36 = vld [vmem:[#allocation5 + $0x28] sm:$0xff] }
 0x8ef   : > { %4600 = vmatprep.mubr.f32.mxu1 %v7612_v57  ;;  %v4158_v54 = vpop.f32.mrf.mxu1 }
 0x8f0   : > { %v4159_v2 = vadd.f32 %v4158_v54, %v4063_v25  ;;  %v4273_v18 = vadd.f32 %v4251_v28, %v4155_v63  ;;  %v3789_v63 = vld [vmem:[#allocation5 + $0x8] sm:$0xff] }
 0x8f1   : > { %v4160_v46 = vpop.f32.mrf.mxu1 }
 0x8f2   : > { %5080 = vmatmul.mubr.msk.f32.gmra.mxu1 %vm1555_vm3, %v3968_v10  ;;  %v4161_v42 = vadd.f32 %v4160_v46, %v4065_v52  ;;  %v4274_v51 = vadd.f32 %v4255_v20, %v4159_v2 }
 0x8f3   : > { %4606 = vmatprep.mubr.f32.mxu1 %v7612_v57  ;;  %v4646_v57 = vld [vmem:[%s7528_s9 + $0x88] sm:$0xff]  ;;  %v4164_v43 = vpop.f32.mrf.mxu1 }
 0x8f4   : > { %5380 = vmatprep.subr.mxu0 %v4646_v57  ;;  %v4165_v11 = vadd.f32 %v4164_v43, %v4069_v56  ;;  %v4486_v56 = vpop.f32.mrf.mxu0 }
 0x8f5   : > { %5381 = vmatpush3.msra.mxu0 %v4630_v41  ;;  %v4166_v23 = vpop.f32.mrf.mxu1 }
 0x8f6   : > { %5081 = vmatmul.mubr.msk.f32.gmra.mxu1 %vm1555_vm3, %v3969_v12  ;;  %5382 = vmatprep.subr.mxu0 %v4645_v58  ;;  %v4167_v10 = vadd.f32 %v4166_v23, %v4071_v31  ;;  %v4275_v12 = vadd.f32 %v4257_v62, %v4161_v42 }
 0x8f7   : > { %5383 = vmatpush3.msra.mxu0 %v4629_v24  ;;  %v4170_v15 = vpop.f32.mrf.mxu1  ;;  %v4276_v24 = vadd.f32 %v4261_v13, %v4165_v11  ;;  %v3786_v13 = vld [vmem:[#allocation5 + $0x10] sm:$0xff] }
 0x8f8   : > { %v4171_v58 = vadd.f32 %v4170_v15, %v4075_v19  ;;  %v4277_v55 = vadd.f32 %v4263_v38, %v4167_v10 }
 0x8f9   : > { %v4172_v45 = vpop.f32.mrf.mxu1 }
 0x8fa   : > { %v4173_v52 = vadd.f32 %v4172_v45, %v4077_v27  ;;  %v4278_v20 = vadd.f32 %v4267_v6, %v4171_v58  ;;  %v4490_v27 = vpop.f32.mrf.mxu0 }
 0x8fb   : > { %v4367_v26 = vpop.f32.mrf.mxu1 }
 0x8fc   : > { %v4390_v40 = vadd.f32 %v4367_v26, %v4272_v35  ;;  %v4279_v15 = vadd.f32 %v4269_v61, %v4173_v52  ;;  %v4492_v35 = vpop.f32.mrf.mxu0 }
 0x8fd   : > { %v4369_v0 = vpop.f32.mrf.mxu1 }
 0x8fe   : > { %v4391_v22 = vadd.f32 %v4369_v0, %v4273_v18  ;;  %v4495_v44 = vadd.f32 %v4472_v32, %v4390_v40  ;;  %v3787_v0 = vld [vmem:[#allocation5 + $0x20] sm:$0xff] }
 0x8ff   : > { %v4373_v48 = vpop.f32.mrf.mxu1 }
 0x900   : > { %v4392_v37 = vadd.f32 %v4373_v48, %v4274_v51  ;;  %v4496_v41 = vadd.f32 %v4474_v9, %v4391_v22  ;;  %v3791_v22 = vld [vmem:[#allocation5 + $0x30] sm:$0xff]  ;;  %v3790_v51 = vld [vmem:[#allocation5 + $0x38] sm:$0xff] }
 0x901   : > { %v4375_v7 = vpop.f32.mrf.mxu1 }
 0x902   : > { %v4393_v57 = vadd.f32 %v4375_v7, %v4275_v12  ;;  %v4497_v14 = vadd.f32 %v4478_v5, %v4392_v37  ;;  %v3788_v5 = vld [vmem:[#allocation5 + $0x18] sm:$0xff]  ;;  %v5023_v37 = vmul.f32 -1.442695, %v7149_v8 }
 0x903   : > { %v4379_v39 = vpop.f32.mrf.mxu1 }
 0x904   : > { %v4394_v46 = vadd.f32 %v4379_v39, %v4276_v24  ;;  %v4498_v23 = vadd.f32 %v4480_v21, %v4393_v57 }
 0x905   : > { %v4381_v59 = vpop.f32.mrf.mxu1 }
 0x906   : > { %v4395_v43 = vadd.f32 %v4381_v59, %v4277_v55  ;;  %v4499_v38 = vadd.f32 %v4484_v60, %v4394_v46  ;;  %v5022_v60 = vmul.f32 -1.442695, %v7147_v34 }
 0x907   : > { %v4385_v47 = vpop.f32.mrf.mxu1 }
 0x908   : > { %v4396_v45 = vadd.f32 %v4385_v47, %v4278_v20  ;;  %v4500_v9 = vadd.f32 %v4486_v56, %v4395_v43  ;;  %5621 = vpow2.f32 %v5022_v60  ;;  %v4663_v43 = vld [vmem:[#allocation8 + $0x10] sm:$0xff] }
 0x909   : > { %v4387_v1 = vpop.f32.mrf.mxu1  ;;  %5623 = vpow2.f32 %v5023_v37 }
 0x90a   : > { %v4397_v32 = vadd.f32 %v4387_v1, %v4279_v15  ;;  %v4501_v61 = vadd.f32 %v4490_v27, %v4396_v45 }
 0x90c   : > { %v4502_v21 = vadd.f32 %v4492_v35, %v4397_v32 }
 0x915   : > { %v5622_v57 = vpop.eup %5621 }
 0x916   : > { %v3768_v58 = vadd.f32 1.0, %v5622_v57 }
 0x9aa   : > { %v4590_v17 = vpop.f32.mrf.mxu1 }
 0x9ab   : > { %v4613_v30 = vadd.f32 %v4590_v17, %v4495_v44  ;;  %v5024_v44 = vmul.f32 -1.442695, %v7151_v33  ;;  %v5025_v17 = vmul.f32 -1.442695, %v7153_v3 }
 0x9ac   : > { %v4592_v25 = vpop.f32.mrf.mxu1 }
 0x9ad   : > { %v4614_v54 = vadd.f32 %v4592_v25, %v4496_v41  ;;  %v4621_v62 = vmul.f32 %v4613_v30, %v3784_v36  ;;  %5625 = vpow2.f32 %v5024_v44  ;;  %v5624_v41 = vpop.eup %5623 }
 0x9ae   : > { %v4596_v31 = vpop.f32.mrf.mxu1  ;;  %5627 = vpow2.f32 %v5025_v17  ;;  %v3769_v30 = vadd.f32 1.0, %v5624_v41 }
 0x9af   : > { %v4622_v28 = vmul.f32 %v4614_v54, %v3785_v53  ;;  %v4615_v26 = vadd.f32 %v4596_v31, %v4497_v14  ;;  %v4661_v53 = vld [vmem:[#allocation8] sm:$0xff]  ;;  %5629 = vrcp.f32 %v3768_v58  ;;  %v4662_v54 = vld [vmem:[#allocation8 + $0x8] sm:$0xff] }
 0x9b0   : > { %v4598_v19 = vpop.f32.mrf.mxu1  ;;  %5631 = vrcp.f32 %v3769_v30 }
 0x9b1   : > { %v4616_v48 = vadd.f32 %v4598_v19, %v4498_v23  ;;  %4729 = vmatprep.mubr.f32.mxu0 %v4622_v28  ;;  %v4623_v50 = vmul.f32 %v4615_v26, %v3786_v13  ;;  %v4664_v26 = vld [vmem:[#allocation8 + $0x18] sm:$0xff] }
 0x9b2   : > { %v4602_v7 = vpop.f32.mrf.mxu1  ;;  %4730 = vmatmul.mubr.f32.vlgmr.msra.gmra.mxu0 %v4621_v62 }
 0x9b3   : > { %v4624_v39 = vmul.f32 %v4616_v48, %v3787_v0  ;;  %v4617_v59 = vadd.f32 %v4602_v7, %v4499_v38 }
 0x9b4   : > { %v4604_v6 = vpop.f32.mrf.mxu1 }
 0x9b5   : > { %v4618_v2 = vadd.f32 %v4604_v6, %v4500_v9  ;;  %4734 = vmatprep.mubr.f32.mxu0 %v4624_v39  ;;  %v4625_v47 = vmul.f32 %v4617_v59, %v3788_v5 }
 0x9b6   : > { %v4608_v42 = vpop.f32.mrf.mxu1  ;;  %4735 = vmatmul.mubr.f32.gmra.mxu0 %v4623_v50 }
 0x9b7   : > { %v4626_v18 = vmul.f32 %v4618_v2, %v3789_v63  ;;  %v4619_v40 = vadd.f32 %v4608_v42, %v4501_v61 }
 0x9b8   : > { %v4610_v11 = vpop.f32.mrf.mxu1 }
 0x9b9   : > { %v4620_v1 = vadd.f32 %v4610_v11, %v4502_v21  ;;  %4739 = vmatprep.mubr.f32.mxu0 %v4626_v18  ;;  %v4627_v12 = vmul.f32 %v4619_v40, %v3790_v51 }
 0x9ba   : > { %4740 = vmatmul.mubr.f32.gmra.mxu0 %v4625_v47  ;;  %v5626_v52 = vpop.eup %5625 }
 0x9bb   : > { %v4628_v10 = vmul.f32 %v4620_v1, %v3791_v22  ;;  %v3770_v36 = vadd.f32 1.0, %v5626_v52  ;;  %v5628_v56 = vpop.eup %5627 }
 0x9bc   : > { %v3771_v31 = vadd.f32 1.0, %v5628_v56  ;;  %v5630_v15 = vpop.eup %5629 }
 0x9bd   : > { %4744 = vmatprep.mubr.f32.mxu0 %v4628_v10  ;;  %v5632_v48 = vpop.eup %5631  ;;  %v4758_v27 = vsub.f32 1.0, %v5630_v15  ;;  %v4754_v38 = vmul.f32 %v7175_v4, %v5630_v15 }
 0x9be   : > { %4745 = vmatmul.mubr.f32.gmra.mxu0 %v4627_v12  ;;  %v4759_v9 = vsub.f32 1.0, %v5632_v48  ;;  %v4755_v59 = vmul.f32 %v7168_v49, %v5632_v48 }
 0xa72   : > { %v5384_v24 = vpop.f32.mrf.mxu0 }
 0xa74   : > { %v5385_v25 = vpop.f32.mrf.mxu0 }
 0xa75   : > { %v5386_v34 = vadd.f32 %v5385_v25, %v5384_v24 }
 0xa76   : > { %v5387_v55 = vpop.f32.mrf.mxu0 }
 0xa77   : > { %v4732_v8 = vadd.f32 %v5386_v34, %v4661_v53 }
 0xa78   : > { %v5388_v33 = vpop.f32.mrf.mxu0 }
 0xa79   : > { %5633 = vtanh.f32 %v4732_v8  ;;  %v5389_v3 = vadd.f32 %v5388_v33, %v5387_v55 }
 0xa7a   : > { %v5390_v46 = vpop.f32.mrf.mxu0  ;;  %5635 = vrcp.f32 %v3770_v36 }
 0xa7b   : > { %v4737_v14 = vadd.f32 %v5389_v3, %v4662_v54 }
 0xa7c   : > { %v5391_v28 = vpop.f32.mrf.mxu0 }
 0xa7d   : > { %5637 = vtanh.f32 %v4737_v14  ;;  %v5392_v23 = vadd.f32 %v5391_v28, %v5390_v46 }
 0xa7e   : > { %v5393_v20 = vpop.f32.mrf.mxu0  ;;  %5639 = vrcp.f32 %v3771_v31 }
 0xa7f   : > { %v4742_v62 = vadd.f32 %v5392_v23, %v4663_v43 }
 0xa80   : > { %v5394_v0 = vpop.f32.mrf.mxu0 }
 0xa81   : > { %5641 = vtanh.f32 %v4742_v62  ;;  %v5395_v19 = vadd.f32 %v5394_v0, %v5393_v20 }
 0xa83   : > { %v4747_v13 = vadd.f32 %v5395_v19, %v4664_v26 }
 0xa85   : > { %5643 = vtanh.f32 %v4747_v13 }
 0xa86   : > { %v5634_v45 = vpop.eup %5633 }
 0xa87   : > { %v4762_v7 = vmul.f32 %v5634_v45, %v4758_v27  ;;  %v5636_v32 = vpop.eup %5635 }
 0xa88   : > { %v4760_v2 = vsub.f32 1.0, %v5636_v32  ;;  %v4756_v4 = vmul.f32 %v7161_v16, %v5636_v32 }
 0xa89   : > { %v4766_v39 = vadd.f32 %v4762_v7, %v4754_v38 }
 0xa8a   : > { %v5638_v50 = vpop.eup %5637 }
 0xa8b   : > { %4770 = vst.msk [vmem:[#allocation2] sm:$0xff] %vm1555_vm3, %v4766_v39  ;;  %4774 = vst.msk [vmem:[%s5872_s0] sm:$0xff] %vm1555_vm3, %v4766_v39  ;;  %v4763_v63 = vmul.f32 %v5638_v50, %v4759_v9  ;;  %v5640_v6 = vpop.eup %5639 }
 0xa8c   : > { %v4761_v18 = vsub.f32 1.0, %v5640_v6  ;;  %v4757_v21 = vmul.f32 %v7155_v29, %v5640_v6 }
 0xa8d   : > { %v4767_v5 = vadd.f32 %v4763_v63, %v4755_v59 }
 0xa8e   : > { %v5642_v35 = vpop.eup %5641 }
 0xa8f   : > { %4771 = vst.msk [vmem:[#allocation2 + $0x8] sm:$0xff] %vm1555_vm3, %v4767_v5  ;;  %4775 = vst.msk [vmem:[%s5872_s0 + $0x8] sm:$0xff] %vm1555_vm3, %v4767_v5  ;;  %v4764_v61 = vmul.f32 %v5642_v35, %v4760_v2 }
 0xa91   : > { %v4768_v42 = vadd.f32 %v4764_v61, %v4756_v4 }
 0xa92   : > { %v5644_v49 = vpop.eup %5643 }
 0xa93   : > { %4772 = vst.msk [vmem:[#allocation2 + $0x10] sm:$0xff] %vm1555_vm3, %v4768_v42  ;;  %4776 = vst.msk [vmem:[%s5872_s0 + $0x10] sm:$0xff] %vm1555_vm3, %v4768_v42  ;;  %v4765_v47 = vmul.f32 %v5644_v49, %v4761_v18 }
 0xa95   : > { %v4769_v16 = vadd.f32 %v4765_v47, %v4757_v21 }
 0xa97   : > { %4773 = vst.msk [vmem:[#allocation2 + $0x18] sm:$0xff] %vm1555_vm3, %v4769_v16  ;;  %4777 = vst.msk [vmem:[%s5872_s0 + $0x18] sm:$0xff] %vm1555_vm3, %v4769_v16 }
 0xa98   : > { %5670 = shalt.err (!%p5667_p4)
}
 0xa99   : > { %s5671_s0 = scalar_lea.hbm %s7470_s29, 512  ;;  %s5675_s20 = scalar_lea.hbm %s7621_s23, 4096 }
 0xa9a   : > { %p5672_p7 = scmp.ne.s32.totalorder %s7470_s29, %s5671_s0  ;;  %p5676_p10 = scmp.lt.s32.totalorder %s7470_s29, %s7621_s23 }
 0xa9b   : > { %p5677_p11 = scmp.lt.s32.totalorder %s5675_s20, %s5671_s0 }
 0xa9c   : > { %p5673_p8 = pnand %p5672_p7, %p5852_p5 }
 0xa9d   : > { %p5678_p12 = por %p5677_p11, %p5676_p10 }
 0xa9e   : > { %p5674_p9 = pneg %p5673_p8 }
 0xaa0   : > { %p5679_p13 = pnand %p5678_p12, %p5674_p9 }
 0xaa2   : > { %5682 = shalt.err (!%p5679_p13)
}
 0xaa3   : > { %s5722_s2 = smov 128   ;;  %s5723_s21 = smov 8  }
 0xaa4   : > { %5545 = dma.vmem_to_hbm [thread:$0]  (%p5852_p5), %s7472_s27, 512, %s7470_s29, %s7479_s26, %s5722_s2, %s5722_s2, %s5723_s21  }
 0xaa5 PF: > { %s7623_s30 = sld [smem:[#allocation14_spill]] }
 0xaa6   : > { %s7624_s18 = sld [smem:[#allocation12_spill]] }
 0xaab   : > { %p5551_p0 = scmp.ge.s32.totalorder %s7623_s30, 2 }
 0xaac   : > { %s4807_s24 = sand.u32 1, %s7624_s18  }
 0xaad   : > { %p5548_p1 = pnand %p5551_p0, %p5856_p6  ;;  %s4808_s0 = scalar_lea.sflag [#allocation10], %s4807_s24 }
 0xaaf   : > { %p5549_p2 = pneg %p5548_p1 }
 0xab1   : > { %5700 = dma.done.wait (%p5549_p2), %s4808_s0, 512  }
 0xab2   : > { %5702 = vsyncadd (%p5549_p2), %s4808_s0, 4294966784  ;;  %s7626_s27 = sld [smem:[#allocation15_spill]]  ;;  %s7629_s24 = smov %s5709_s25 }
 0xab3   : > { %s7627_s20 = sld [smem:[#allocation13_spill]] }
 0xab4   : > { %s7628_s26 = sld [smem:[#allocation16_spill]] }
 0xab8   : > { %p27_p3 = scmp.ge.s32.totalorder %s7626_s27, 10  }
 0xab9   : > { %s7630_s25 = smov %s7627_s20 }
 0xaba   :  { %29 = sbr.rel (!%p27_p3) target bundleno = 8 (0x8), region = 135 }
 0xabf   :  { %4813 = vsyncpa [#allocation10], 1 }
 0xac0   :  { %4815 = vsyncpa [#allocation10 + $0x1], 1 }

</bundles_post_ra>
